<compile_context>
chip_gen: v5e
topology: v5e:2x2
jax: 0.10.0
libtpu: 0.0.40
codegen_flags: <defaults>
</compile_context>

<pallas_src>
import functools
import math

import jax
import jax.numpy as jnp
from jax.experimental import pallas as pl
from jax.experimental.pallas import tpu as pltpu

GROUPS = 32      # nn.GroupNorm(32, channels)
EPS = 1e-5       # PyTorch GroupNorm default eps


def _silu(v):
    return v * jax.nn.sigmoid(v)


def residual_block_kernel(
    x_ref, temb_ref,
    g1_ref, be1_ref, m1_ref, w1_ref,
    g2_ref, be2_ref, m2_ref, w2_ref,
    ws_ref, bsum_ref,
    o_ref,
    pad1_ref, pad2_ref,
    *, Bblk, H, W, Cin, Cout):
    """One grid step == Bblk batch elements. Elementwise math in f32, MXU in bf16."""
    HW = H * W

    def group_norm(v, m_ref, g_ref, b_ref):
        # v: (Bblk, H, W, C) f32.  Per-sample group statistics via a single
        # fused (2*Bblk, C) @ (C, C) group-map matmul (channel sums and
        # sums-of-squares stacked), avoiding lane-dim reshapes in the kernel.
        C = v.shape[-1]
        n = float(HW * (C // GROUPS))
        ch_sum = jnp.sum(v, axis=(1, 2))                      # (Bblk, C)
        ch_sq = jnp.sum(v * v, axis=(1, 2))                   # (Bblk, C)
        stats = jnp.concatenate([ch_sum, ch_sq], axis=0)      # (2*Bblk, C)
        g_stats = jnp.dot(stats, m_ref[...],
                          preferred_element_type=jnp.float32)
        mean = g_stats[:Bblk] / n                             # (Bblk, C)
        var = g_stats[Bblk:] / n - mean * mean                # biased (PyTorch)
        inv = jax.lax.rsqrt(var + EPS)
        return ((v - mean[:, None, None, :]) * inv[:, None, None, :]
                * g_ref[0] + b_ref[0])

    def fill_padded(pad_ref, a, ci):
        # Zero only the halo (perimeter) each step; the interior is fully
        # overwritten.  Per-step halo stores are O(perimeter) and stay
        # correct even if the batch grid axis is sharded across TensorCores
        # (per-core scratch would miss a program_id==0 one-time init).
        zrow = jnp.zeros((Bblk, 1, W + 2, ci), jnp.float32)
        zcol = jnp.zeros((Bblk, H + 2, 1, ci), jnp.float32)
        pad_ref[:, 0:1, :, :] = zrow
        pad_ref[:, H + 1:H + 2, :, :] = zrow
        pad_ref[:, :, 0:1, :] = zcol
        pad_ref[:, :, W + 1:W + 2, :] = zcol
        pad_ref[:, 1:H + 1, 1:W + 1, :] = a

    def conv3x3(pad_ref, w_ref, ci):
        # 3x3 "same" conv as ONE (Bblk*HW, 9*ci) @ (9*ci, Cout) bf16 matmul:
        # cast the padded tile to bf16 once, then materialize the 9 shifted
        # taps (im2col along the lane axis).  Bias is folded elsewhere.
        padb = pad_ref[...].astype(jnp.bfloat16)              # single cast
        taps = [padb[:, dy:dy + H, dx:dx + W, :]
                for dy in range(3) for dx in range(3)]
        slab = jnp.concatenate(taps, axis=-1).reshape(Bblk * HW, 9 * ci)
        return jnp.dot(slab, w_ref[...],
                       preferred_element_type=jnp.float32)    # (Bblk*HW, Cout)

    x = x_ref[...]                                            # (Bblk, H, W, Cin)

    # --- conv1 branch: GroupNorm -> SiLU -> Conv2d(3x3, pad=1) ---
    a1 = _silu(group_norm(x, m1_ref, g1_ref, be1_ref))
    fill_padded(pad1_ref, a1, Cin)
    h = conv3x3(pad1_ref, w1_ref, Cin)                        # (Bblk*HW, Cout)

    # --- time embedding (precomputed + conv1 bias folded in the wrapper) ---
    h4 = h.reshape(Bblk, H, W, Cout) + temb_ref[...][:, :, None, :]

    # --- conv2 branch: GroupNorm -> SiLU -> Dropout -> Conv2d(3x3, pad=1) ---
    # TODO(synk): nn.Dropout is identity here (eval-mode semantics); training-
    # mode random masking is not implemented.
    a2 = _silu(group_norm(h4, m2_ref, g2_ref, be2_ref))
    fill_padded(pad2_ref, a2, Cout)
    h2 = conv3x3(pad2_ref, w2_ref, Cout)                      # (Bblk*HW, Cout)

    # --- shortcut (1x1 conv since Cin != Cout) + residual add ---
    xs = jnp.dot(x.reshape(Bblk * HW, Cin).astype(jnp.bfloat16), ws_ref[...],
                 preferred_element_type=jnp.float32)
    # bsum = conv2 bias + shortcut bias, added once (lane-dense store, no reshape).
    o_ref[...] = h2 + xs + bsum_ref[...]


def residual_block_forward(x_nchw, t, params):
    B, Cin, H, W = x_nchw.shape
    Cout = params["conv1_w"].shape[0]

    # Batch-block: Bblk samples per grid step -> M = Bblk*H*W rows per matmul.
    Bblk = 2 if B % 2 == 0 else 1

    x_nhwc = jnp.transpose(x_nchw, (0, 2, 3, 1)).astype(jnp.float32)

    f32 = jnp.float32

    # Time embedding (SiLU -> Linear) precomputed outside the kernel; the
    # conv1 bias is folded in (exact, f32) so the kernel adds it only once.
    temb = (_silu(t.astype(f32)) @ params["time_w"].T.astype(f32)
            + params["time_b"].astype(f32)
            + params["conv1_b"].astype(f32)).reshape(B, 1, Cout)

    # conv2 bias + shortcut bias folded into one output bias.
    bsum = (params["conv2_b"].astype(f32)
            + params["short_b"].astype(f32)).reshape(1, Cout)

    def group_map(C):
        gid = jnp.arange(C) // (C // GROUPS)
        return (gid[:, None] == gid[None, :]).astype(f32)     # (C, C)

    # Conv weights OIHW -> im2col (9*ci, co); 1x1 shortcut -> (Cin, Cout).
    # MXU operands in bf16 (f32 accumulation inside the kernel).
    w1 = jnp.transpose(params["conv1_w"], (2, 3, 1, 0)).reshape(9 * Cin, Cout)
    w2 = jnp.transpose(params["conv2_w"], (2, 3, 1, 0)).reshape(9 * Cout, Cout)
    ws = params["short_w"][:, :, 0, 0].T
    w1, w2, ws = (w.astype(jnp.bfloat16) for w in (w1, w2, ws))

    args = (
        x_nhwc, temb,
        params["gn1_g"].reshape(1, Cin).astype(f32),
        params["gn1_b"].reshape(1, Cin).astype(f32),
        group_map(Cin),
        w1,
        params["gn2_g"].reshape(1, Cout).astype(f32),
        params["gn2_b"].reshape(1, Cout).astype(f32),
        group_map(Cout),
        w2,
        ws, bsum,
    )

    def full_spec(a):
        return pl.BlockSpec(a.shape, lambda b, _n=a.ndim: (0,) * _n)

    in_specs = [
        pl.BlockSpec((Bblk, H, W, Cin), lambda b: (b, 0, 0, 0)),   # x block
        pl.BlockSpec((Bblk, 1, Cout), lambda b: (b, 0, 0)),        # temb block
    ] + [full_spec(a) for a in args[2:]]                           # params resident

    kernel = functools.partial(residual_block_kernel,
                               Bblk=Bblk, H=H, W=W, Cin=Cin, Cout=Cout)

    # NOTE: at real UNet resolutions (e.g. 64x64x512) on v7x (64 MiB VMEM),
    # tile the spatial dim over an extra grid axis and reuse a single
    # max(Cin, Cout)-wide pad scratch; unnecessary at these test shapes.
    out_flat = pl.pallas_call(
        kernel,
        out_shape=jax.ShapeDtypeStruct((B * H * W, Cout), jnp.float32),
        grid_spec=pltpu.PrefetchScalarGridSpec(
            num_scalar_prefetch=0,
            grid=(B // Bblk,),
            in_specs=in_specs,
            out_specs=pl.BlockSpec((Bblk * H * W, Cout), lambda b: (b, 0)),
            scratch_shapes=[
                pltpu.VMEM((Bblk, H + 2, W + 2, Cin), jnp.float32),   # pad act 1
                pltpu.VMEM((Bblk, H + 2, W + 2, Cout), jnp.float32),  # pad act 2
            ],
        ),
        compiler_params=pltpu.CompilerParams(dimension_semantics=("parallel",)),
    )(*args)

    out_nhwc = out_flat.reshape(B, H, W, Cout)
    return jnp.transpose(out_nhwc, (0, 3, 1, 2))   # back to NCHW


def ref_forward(x, t, p):
    """Pure-JAX reference matching the PyTorch module (eval mode)."""
    def gn(v, gamma, beta):
        B, C, H, W = v.shape
        vg = v.reshape(B, GROUPS, C // GROUPS, H, W)
        mean = vg.mean(axis=(2, 3, 4), keepdims=True)
        var = vg.var(axis=(2, 3, 4), keepdims=True)
        vn = ((vg - mean) / jnp.sqrt(var + EPS)).reshape(B, C, H, W)
        return vn * gamma[None, :, None, None] + beta[None, :, None, None]

    def conv(v, w, b, pad):
        out = jax.lax.conv_general_dilated(
            v, w, (1, 1), [(pad, pad), (pad, pad)],
            dimension_numbers=("NCHW", "OIHW", "NCHW"))
        return out + b[None, :, None, None]

    silu = lambda v: v * jax.nn.sigmoid(v)
    h = conv(silu(gn(x, p["gn1_g"], p["gn1_b"])), p["conv1_w"], p["conv1_b"], 1)
    temb = silu(t) @ p["time_w"].T + p["time_b"]
    h = h + temb[:, :, None, None]
    h = conv(silu(gn(h, p["gn2_g"], p["gn2_b"])), p["conv2_w"], p["conv2_b"], 1)
    return h + conv(x, p["short_w"], p["short_b"], 0)


if __name__ == "__main__":
    # GroupNorm(32, C) requires C % 32 == 0 -> smallest sensible channels.
    B, Cin, Cout, Tc, H, W = 2, 32, 64, 32, 8, 8

    key = jax.random.PRNGKey(0)
    ks = jax.random.split(key, 14)
    init = lambda k, shape, s: (s * jax.random.normal(k, shape)).astype(jnp.float32)

    params = {
        "gn1_g": (1.0 + 0.1 * jax.random.normal(ks[0], (Cin,))).astype(jnp.float32),
        "gn1_b": init(ks[1], (Cin,), 0.1),
        "conv1_w": init(ks[2], (Cout, Cin, 3, 3), 1.0 / (3.0 * math.sqrt(Cin))),
        "conv1_b": init(ks[3], (Cout,), 0.1),
        "time_w": init(ks[4], (Cout, Tc), 1.0 / math.sqrt(Tc)),
        "time_b": init(ks[5], (Cout,), 0.1),
        "gn2_g": (1.0 + 0.1 * jax.random.normal(ks[6], (Cout,))).astype(jnp.float32),
        "gn2_b": init(ks[7], (Cout,), 0.1),
        "conv2_w": init(ks[8], (Cout, Cout, 3, 3), 1.0 / (3.0 * math.sqrt(Cout))),
        "conv2_b": init(ks[9], (Cout,), 0.1),
        "short_w": init(ks[10], (Cout, Cin, 1, 1), 1.0 / math.sqrt(Cin)),
        "short_b": init(ks[11], (Cout,), 0.1),
    }

    x = jax.random.normal(ks[12], (B, Cin, H, W), jnp.float32)
    t = jax.random.normal(ks[13], (B, Tc), jnp.float32)

    out = residual_block_forward(x, t, params)
    out = jax.block_until_ready(out)

    ref = ref_forward(x, t, params)
    assert out.shape == (B, Cout, H, W), out.shape
    # bf16 MXU operands -> slightly looser tolerance than the pure-f32 version.
    assert jnp.allclose(out, ref, atol=3e-2, rtol=3e-2), float(
        jnp.max(jnp.abs(out - ref)))

    print("KERNEL_OK")
</pallas_src>

<mosaic_0001>
module attributes {stable_mosaic.version = 11 : i64} {
  func.func @residual_block_kernel(%arg0: i32, %arg1: memref<2x8x8x32xf32, #tpu.memory_space<vmem>>, %arg2: memref<2x1x64xf32, #tpu.memory_space<vmem>>, %arg3: memref<1x32xf32, #tpu.memory_space<vmem>>, %arg4: memref<1x32xf32, #tpu.memory_space<vmem>>, %arg5: memref<32x32xf32, #tpu.memory_space<vmem>>, %arg6: memref<288x64xbf16, #tpu.memory_space<vmem>>, %arg7: memref<1x64xf32, #tpu.memory_space<vmem>>, %arg8: memref<1x64xf32, #tpu.memory_space<vmem>>, %arg9: memref<64x64xf32, #tpu.memory_space<vmem>>, %arg10: memref<576x64xbf16, #tpu.memory_space<vmem>>, %arg11: memref<32x64xbf16, #tpu.memory_space<vmem>>, %arg12: memref<1x64xf32, #tpu.memory_space<vmem>>, %arg13: memref<128x64xf32, #tpu.memory_space<vmem>>, %arg14: memref<2x10x10x32xf32, #tpu.memory_space<vmem>>, %arg15: memref<2x10x10x64xf32, #tpu.memory_space<vmem>>) attributes {dimension_semantics = [#tpu.dimension_semantics<parallel>], iteration_bounds = array<i64: 1>, scalar_prefetch = 0 : i64, scratch_operands = 2 : i64, tpu.core_type = #tpu.core_type<tc>, window_params = [{transform_indices = @transform_0, window_bounds = array<i64: 2, 8, 8, 32>}, {transform_indices = @transform_1, window_bounds = array<i64: 2, 1, 64>}, {pipeline_mode = #tpu.pipeline_mode<synchronous>, transform_indices = @transform_2, window_bounds = array<i64: 1, 32>}, {pipeline_mode = #tpu.pipeline_mode<synchronous>, transform_indices = @transform_3, window_bounds = array<i64: 1, 32>}, {pipeline_mode = #tpu.pipeline_mode<synchronous>, transform_indices = @transform_4, window_bounds = array<i64: 32, 32>}, {pipeline_mode = #tpu.pipeline_mode<synchronous>, transform_indices = @transform_5, window_bounds = array<i64: 288, 64>}, {pipeline_mode = #tpu.pipeline_mode<synchronous>, transform_indices = @transform_6, window_bounds = array<i64: 1, 64>}, {pipeline_mode = #tpu.pipeline_mode<synchronous>, transform_indices = @transform_7, window_bounds = array<i64: 1, 64>}, {pipeline_mode = #tpu.pipeline_mode<synchronous>, transform_indices = @transform_8, window_bounds = array<i64: 64, 64>}, {pipeline_mode = #tpu.pipeline_mode<synchronous>, transform_indices = @transform_9, window_bounds = array<i64: 576, 64>}, {pipeline_mode = #tpu.pipeline_mode<synchronous>, transform_indices = @transform_10, window_bounds = array<i64: 32, 64>}, {pipeline_mode = #tpu.pipeline_mode<synchronous>, transform_indices = @transform_11, window_bounds = array<i64: 1, 64>}, {transform_indices = @transform_12, window_bounds = array<i64: 128, 64>}]} {
    %c0 = arith.constant 0 : index
    %c0_0 = arith.constant 0 : index
    %c0_1 = arith.constant 0 : index
    %c0_2 = arith.constant 0 : index
    %0 = vector.load %arg1[%c0, %c0_0, %c0_1, %c0_2] : memref<2x8x8x32xf32, #tpu.memory_space<vmem>>, vector<2x8x8x32xf32>
    %cst = arith.constant dense<0.000000e+00> : vector<2x32xf32>
    %1 = vector.multi_reduction <add>, %0, %cst [1, 2] : vector<2x8x8x32xf32> to vector<2x32xf32>
    %2 = arith.mulf %0, %0 : vector<2x8x8x32xf32>
    %cst_3 = arith.constant dense<0.000000e+00> : vector<2x32xf32>
    %3 = vector.multi_reduction <add>, %2, %cst_3 [1, 2] : vector<2x8x8x32xf32> to vector<2x32xf32>
    %4 = tpu.concatenate %1, %3 in 0 : vector<2x32xf32>, vector<2x32xf32> -> vector<4x32xf32>
    %c0_4 = arith.constant 0 : index
    %c0_5 = arith.constant 0 : index
    %5 = vector.load %arg5[%c0_4, %c0_5] : memref<32x32xf32, #tpu.memory_space<vmem>>, vector<32x32xf32>
    %cst_6 = arith.constant dense<0.000000e+00> : vector<4x32xf32>
    %6 = tpu.matmul %4, %5, %cst_6 {dimension_numbers = #tpu.dot_dimension_numbers<[1], [0], [0], [1], [0, 0, 1, 1], [], []>} : vector<4x32xf32>, vector<32x32xf32>, vector<4x32xf32> -> vector<4x32xf32>
    %7 = vector.extract_strided_slice %6 {offsets = [0, 0], sizes = [2, 32], strides = [1, 1]} : vector<4x32xf32> to vector<2x32xf32>
    %cst_7 = arith.constant 6.400000e+01 : f32
    %8 = vector.broadcast %cst_7 : f32 to vector<2x32xf32>
    %9 = arith.divf %7, %8 : vector<2x32xf32>
    %10 = vector.extract_strided_slice %6 {offsets = [2, 0], sizes = [2, 32], strides = [1, 1]} : vector<4x32xf32> to vector<2x32xf32>
    %cst_8 = arith.constant 6.400000e+01 : f32
    %11 = vector.broadcast %cst_8 : f32 to vector<2x32xf32>
    %12 = arith.divf %10, %11 : vector<2x32xf32>
    %13 = arith.mulf %9, %9 : vector<2x32xf32>
    %14 = arith.subf %12, %13 : vector<2x32xf32>
    %cst_9 = arith.constant 9.99999974E-6 : f32
    %15 = vector.broadcast %cst_9 : f32 to vector<2x32xf32>
    %16 = arith.addf %14, %15 : vector<2x32xf32>
    %17 = math.rsqrt %16 : vector<2x32xf32>
    %18 = vector.shape_cast %9 : vector<2x32xf32> to vector<2x1x1x32xf32>
    %19 = vector.broadcast %18 : vector<2x1x1x32xf32> to vector<2x8x8x32xf32>
    %20 = arith.subf %0, %19 : vector<2x8x8x32xf32>
    %21 = vector.shape_cast %17 : vector<2x32xf32> to vector<2x1x1x32xf32>
    %22 = vector.broadcast %21 : vector<2x1x1x32xf32> to vector<2x8x8x32xf32>
    %23 = arith.mulf %20, %22 : vector<2x8x8x32xf32>
    %c0_10 = arith.constant 0 : index
    %c0_11 = arith.constant 0 : index
    %24 = vector.load %arg3[%c0_10, %c0_11] : memref<1x32xf32, #tpu.memory_space<vmem>>, vector<1x32xf32>
    %25 = vector.shape_cast %24 : vector<1x32xf32> to vector<32xf32>
    %26 = vector.shape_cast %25 : vector<32xf32> to vector<1x1x1x32xf32>
    %27 = vector.broadcast %26 : vector<1x1x1x32xf32> to vector<2x8x8x32xf32>
    %28 = arith.mulf %23, %27 : vector<2x8x8x32xf32>
    %c0_12 = arith.constant 0 : index
    %c0_13 = arith.constant 0 : index
    %29 = vector.load %arg4[%c0_12, %c0_13] : memref<1x32xf32, #tpu.memory_space<vmem>>, vector<1x32xf32>
    %30 = vector.shape_cast %29 : vector<1x32xf32> to vector<32xf32>
    %31 = vector.shape_cast %30 : vector<32xf32> to vector<1x1x1x32xf32>
    %32 = vector.broadcast %31 : vector<1x1x1x32xf32> to vector<2x8x8x32xf32>
    %33 = arith.addf %28, %32 : vector<2x8x8x32xf32>
    %34 = arith.negf %33 : vector<2x8x8x32xf32>
    %35 = math.exp %34 : vector<2x8x8x32xf32>
    %cst_14 = arith.constant 1.000000e+00 : f32
    %36 = vector.broadcast %cst_14 : f32 to vector<2x8x8x32xf32>
    %37 = arith.addf %36, %35 : vector<2x8x8x32xf32>
    %38 = arith.divf %36, %37 : vector<2x8x8x32xf32>
    %39 = arith.mulf %33, %38 : vector<2x8x8x32xf32>
    %cst_15 = arith.constant 0.000000e+00 : f32
    %40 = vector.broadcast %cst_15 : f32 to vector<2x1x10x32xf32>
    %cst_16 = arith.constant 0.000000e+00 : f32
    %41 = vector.broadcast %cst_16 : f32 to vector<2x10x1x32xf32>
    %c0_17 = arith.constant 0 : index
    %c0_18 = arith.constant 0 : index
    %c0_19 = arith.constant 0 : index
    %c0_20 = arith.constant 0 : index
    %42 = vector.load %arg14[%c0_17, %c0_18, %c0_19, %c0_20] : memref<2x10x10x32xf32, #tpu.memory_space<vmem>>, vector<2x1x10x32xf32>
    tpu.vector_store %arg14[%c0_17, %c0_18, %c0_19, %c0_20], %40 {strides = array<i32>} : memref<2x10x10x32xf32, #tpu.memory_space<vmem>>, vector<2x1x10x32xf32>,
    %c0_21 = arith.constant 0 : index
    %c9 = arith.constant 9 : index
    %c0_22 = arith.constant 0 : index
    %c0_23 = arith.constant 0 : index
    %43 = vector.load %arg14[%c0_21, %c9, %c0_22, %c0_23] : memref<2x10x10x32xf32, #tpu.memory_space<vmem>>, vector<2x1x10x32xf32>
    tpu.vector_store %arg14[%c0_21, %c9, %c0_22, %c0_23], %40 {strides = array<i32>} : memref<2x10x10x32xf32, #tpu.memory_space<vmem>>, vector<2x1x10x32xf32>,
    %c0_24 = arith.constant 0 : index
    %c0_25 = arith.constant 0 : index
    %c0_26 = arith.constant 0 : index
    %c0_27 = arith.constant 0 : index
    %44 = vector.load %arg14[%c0_24, %c0_25, %c0_26, %c0_27] : memref<2x10x10x32xf32, #tpu.memory_space<vmem>>, vector<2x10x1x32xf32>
    tpu.vector_store %arg14[%c0_24, %c0_25, %c0_26, %c0_27], %41 {strides = array<i32>} : memref<2x10x10x32xf32, #tpu.memory_space<vmem>>, vector<2x10x1x32xf32>,
    %c0_28 = arith.constant 0 : index
    %c0_29 = arith.constant 0 : index
    %c9_30 = arith.constant 9 : index
    %c0_31 = arith.constant 0 : index
    %45 = vector.load %arg14[%c0_28, %c0_29, %c9_30, %c0_31] : memref<2x10x10x32xf32, #tpu.memory_space<vmem>>, vector<2x10x1x32xf32>
    tpu.vector_store %arg14[%c0_28, %c0_29, %c9_30, %c0_31], %41 {strides = array<i32>} : memref<2x10x10x32xf32, #tpu.memory_space<vmem>>, vector<2x10x1x32xf32>,
    %c0_32 = arith.constant 0 : index
    %c1 = arith.constant 1 : index
    %c1_33 = arith.constant 1 : index
    %c0_34 = arith.constant 0 : index
    %46 = vector.load %arg14[%c0_32, %c1, %c1_33, %c0_34] : memref<2x10x10x32xf32, #tpu.memory_space<vmem>>, vector<2x8x8x32xf32>
    tpu.vector_store %arg14[%c0_32, %c1, %c1_33, %c0_34], %39 {strides = array<i32>} : memref<2x10x10x32xf32, #tpu.memory_space<vmem>>, vector<2x8x8x32xf32>,
    %c0_35 = arith.constant 0 : index
    %c0_36 = arith.constant 0 : index
    %c0_37 = arith.constant 0 : index
    %c0_38 = arith.constant 0 : index
    %47 = vector.load %arg14[%c0_35, %c0_36, %c0_37, %c0_38] : memref<2x10x10x32xf32, #tpu.memory_space<vmem>>, vector<2x10x10x32xf32>
    %48 = arith.truncf %47 : vector<2x10x10x32xf32> to vector<2x10x10x32xbf16>
    %49 = vector.extract_strided_slice %48 {offsets = [0, 0, 0, 0], sizes = [2, 8, 8, 32], strides = [1, 1, 1, 1]} : vector<2x10x10x32xbf16> to vector<2x8x8x32xbf16>
    %50 = vector.extract_strided_slice %48 {offsets = [0, 0, 1, 0], sizes = [2, 8, 8, 32], strides = [1, 1, 1, 1]} : vector<2x10x10x32xbf16> to vector<2x8x8x32xbf16>
    %51 = vector.extract_strided_slice %48 {offsets = [0, 0, 2, 0], sizes = [2, 8, 8, 32], strides = [1, 1, 1, 1]} : vector<2x10x10x32xbf16> to vector<2x8x8x32xbf16>
    %52 = vector.extract_strided_slice %48 {offsets = [0, 1, 0, 0], sizes = [2, 8, 8, 32], strides = [1, 1, 1, 1]} : vector<2x10x10x32xbf16> to vector<2x8x8x32xbf16>
    %53 = vector.extract_strided_slice %48 {offsets = [0, 1, 1, 0], sizes = [2, 8, 8, 32], strides = [1, 1, 1, 1]} : vector<2x10x10x32xbf16> to vector<2x8x8x32xbf16>
    %54 = vector.extract_strided_slice %48 {offsets = [0, 1, 2, 0], sizes = [2, 8, 8, 32], strides = [1, 1, 1, 1]} : vector<2x10x10x32xbf16> to vector<2x8x8x32xbf16>
    %55 = vector.extract_strided_slice %48 {offsets = [0, 2, 0, 0], sizes = [2, 8, 8, 32], strides = [1, 1, 1, 1]} : vector<2x10x10x32xbf16> to vector<2x8x8x32xbf16>
    %56 = vector.extract_strided_slice %48 {offsets = [0, 2, 1, 0], sizes = [2, 8, 8, 32], strides = [1, 1, 1, 1]} : vector<2x10x10x32xbf16> to vector<2x8x8x32xbf16>
    %57 = vector.extract_strided_slice %48 {offsets = [0, 2, 2, 0], sizes = [2, 8, 8, 32], strides = [1, 1, 1, 1]} : vector<2x10x10x32xbf16> to vector<2x8x8x32xbf16>
    %58 = tpu.concatenate %49, %50, %51, %52, %53, %54, %55, %56, %57 in 3 : vector<2x8x8x32xbf16>, vector<2x8x8x32xbf16>, vector<2x8x8x32xbf16>, vector<2x8x8x32xbf16>, vector<2x8x8x32xbf16>, vector<2x8x8x32xbf16>, vector<2x8x8x32xbf16>, vector<2x8x8x32xbf16>, vector<2x8x8x32xbf16> -> vector<2x8x8x288xbf16>
    %59 = vector.shape_cast %58 : vector<2x8x8x288xbf16> to vector<128x288xbf16>
    %c0_39 = arith.constant 0 : index
    %c0_40 = arith.constant 0 : index
    %60 = vector.load %arg6[%c0_39, %c0_40] : memref<288x64xbf16, #tpu.memory_space<vmem>>, vector<288x64xbf16>
    %cst_41 = arith.constant dense<0.000000e+00> : vector<128x64xf32>
    %61 = tpu.matmul %59, %60, %cst_41 {dimension_numbers = #tpu.dot_dimension_numbers<[1], [0], [0], [1], [0, 0, 1, 1], [], []>} : vector<128x288xbf16>, vector<288x64xbf16>, vector<128x64xf32> -> vector<128x64xf32>
    %62 = vector.shape_cast %61 : vector<128x64xf32> to vector<2x8x8x64xf32>
    %c0_42 = arith.constant 0 : index
    %c0_43 = arith.constant 0 : index
    %c0_44 = arith.constant 0 : index
    %63 = vector.load %arg2[%c0_42, %c0_43, %c0_44] : memref<2x1x64xf32, #tpu.memory_space<vmem>>, vector<2x1x64xf32>
    %64 = vector.shape_cast %63 : vector<2x1x64xf32> to vector<2x1x1x64xf32>
    %65 = vector.broadcast %64 : vector<2x1x1x64xf32> to vector<2x8x8x64xf32>
    %66 = arith.addf %62, %65 : vector<2x8x8x64xf32>
    %cst_45 = arith.constant dense<0.000000e+00> : vector<2x64xf32>
    %67 = vector.multi_reduction <add>, %66, %cst_45 [1, 2] : vector<2x8x8x64xf32> to vector<2x64xf32>
    %68 = arith.mulf %66, %66 : vector<2x8x8x64xf32>
    %cst_46 = arith.constant dense<0.000000e+00> : vector<2x64xf32>
    %69 = vector.multi_reduction <add>, %68, %cst_46 [1, 2] : vector<2x8x8x64xf32> to vector<2x64xf32>
    %70 = tpu.concatenate %67, %69 in 0 : vector<2x64xf32>, vector<2x64xf32> -> vector<4x64xf32>
    %c0_47 = arith.constant 0 : index
    %c0_48 = arith.constant 0 : index
    %71 = vector.load %arg9[%c0_47, %c0_48] : memref<64x64xf32, #tpu.memory_space<vmem>>, vector<64x64xf32>
    %cst_49 = arith.constant dense<0.000000e+00> : vector<4x64xf32>
    %72 = tpu.matmul %70, %71, %cst_49 {dimension_numbers = #tpu.dot_dimension_numbers<[1], [0], [0], [1], [0, 0, 1, 1], [], []>} : vector<4x64xf32>, vector<64x64xf32>, vector<4x64xf32> -> vector<4x64xf32>
    %73 = vector.extract_strided_slice %72 {offsets = [0, 0], sizes = [2, 64], strides = [1, 1]} : vector<4x64xf32> to vector<2x64xf32>
    %cst_50 = arith.constant 1.280000e+02 : f32
    %74 = vector.broadcast %cst_50 : f32 to vector<2x64xf32>
    %75 = arith.divf %73, %74 : vector<2x64xf32>
    %76 = vector.extract_strided_slice %72 {offsets = [2, 0], sizes = [2, 64], strides = [1, 1]} : vector<4x64xf32> to vector<2x64xf32>
    %cst_51 = arith.constant 1.280000e+02 : f32
    %77 = vector.broadcast %cst_51 : f32 to vector<2x64xf32>
    %78 = arith.divf %76, %77 : vector<2x64xf32>
    %79 = arith.mulf %75, %75 : vector<2x64xf32>
    %80 = arith.subf %78, %79 : vector<2x64xf32>
    %cst_52 = arith.constant 9.99999974E-6 : f32
    %81 = vector.broadcast %cst_52 : f32 to vector<2x64xf32>
    %82 = arith.addf %80, %81 : vector<2x64xf32>
    %83 = math.rsqrt %82 : vector<2x64xf32>
    %84 = vector.shape_cast %75 : vector<2x64xf32> to vector<2x1x1x64xf32>
    %85 = vector.broadcast %84 : vector<2x1x1x64xf32> to vector<2x8x8x64xf32>
    %86 = arith.subf %66, %85 : vector<2x8x8x64xf32>
    %87 = vector.shape_cast %83 : vector<2x64xf32> to vector<2x1x1x64xf32>
    %88 = vector.broadcast %87 : vector<2x1x1x64xf32> to vector<2x8x8x64xf32>
    %89 = arith.mulf %86, %88 : vector<2x8x8x64xf32>
    %c0_53 = arith.constant 0 : index
    %c0_54 = arith.constant 0 : index
    %90 = vector.load %arg7[%c0_53, %c0_54] : memref<1x64xf32, #tpu.memory_space<vmem>>, vector<1x64xf32>
    %91 = vector.shape_cast %90 : vector<1x64xf32> to vector<64xf32>
    %92 = vector.shape_cast %91 : vector<64xf32> to vector<1x1x1x64xf32>
    %93 = vector.broadcast %92 : vector<1x1x1x64xf32> to vector<2x8x8x64xf32>
    %94 = arith.mulf %89, %93 : vector<2x8x8x64xf32>
    %c0_55 = arith.constant 0 : index
    %c0_56 = arith.constant 0 : index
    %95 = vector.load %arg8[%c0_55, %c0_56] : memref<1x64xf32, #tpu.memory_space<vmem>>, vector<1x64xf32>
    %96 = vector.shape_cast %95 : vector<1x64xf32> to vector<64xf32>
    %97 = vector.shape_cast %96 : vector<64xf32> to vector<1x1x1x64xf32>
    %98 = vector.broadcast %97 : vector<1x1x1x64xf32> to vector<2x8x8x64xf32>
    %99 = arith.addf %94, %98 : vector<2x8x8x64xf32>
    %100 = arith.negf %99 : vector<2x8x8x64xf32>
    %101 = math.exp %100 : vector<2x8x8x64xf32>
    %cst_57 = arith.constant 1.000000e+00 : f32
    %102 = vector.broadcast %cst_57 : f32 to vector<2x8x8x64xf32>
    %103 = arith.addf %102, %101 : vector<2x8x8x64xf32>
    %104 = arith.divf %102, %103 : vector<2x8x8x64xf32>
    %105 = arith.mulf %99, %104 : vector<2x8x8x64xf32>
    %cst_58 = arith.constant 0.000000e+00 : f32
    %106 = vector.broadcast %cst_58 : f32 to vector<2x1x10x64xf32>
    %cst_59 = arith.constant 0.000000e+00 : f32
    %107 = vector.broadcast %cst_59 : f32 to vector<2x10x1x64xf32>
    %c0_60 = arith.constant 0 : index
    %c0_61 = arith.constant 0 : index
    %c0_62 = arith.constant 0 : index
    %c0_63 = arith.constant 0 : index
    %108 = vector.load %arg15[%c0_60, %c0_61, %c0_62, %c0_63] : memref<2x10x10x64xf32, #tpu.memory_space<vmem>>, vector<2x1x10x64xf32>
    tpu.vector_store %arg15[%c0_60, %c0_61, %c0_62, %c0_63], %106 {strides = array<i32>} : memref<2x10x10x64xf32, #tpu.memory_space<vmem>>, vector<2x1x10x64xf32>,
    %c0_64 = arith.constant 0 : index
    %c9_65 = arith.constant 9 : index
    %c0_66 = arith.constant 0 : index
    %c0_67 = arith.constant 0 : index
    %109 = vector.load %arg15[%c0_64, %c9_65, %c0_66, %c0_67] : memref<2x10x10x64xf32, #tpu.memory_space<vmem>>, vector<2x1x10x64xf32>
    tpu.vector_store %arg15[%c0_64, %c9_65, %c0_66, %c0_67], %106 {strides = array<i32>} : memref<2x10x10x64xf32, #tpu.memory_space<vmem>>, vector<2x1x10x64xf32>,
    %c0_68 = arith.constant 0 : index
    %c0_69 = arith.constant 0 : index
    %c0_70 = arith.constant 0 : index
    %c0_71 = arith.constant 0 : index
    %110 = vector.load %arg15[%c0_68, %c0_69, %c0_70, %c0_71] : memref<2x10x10x64xf32, #tpu.memory_space<vmem>>, vector<2x10x1x64xf32>
    tpu.vector_store %arg15[%c0_68, %c0_69, %c0_70, %c0_71], %107 {strides = array<i32>} : memref<2x10x10x64xf32, #tpu.memory_space<vmem>>, vector<2x10x1x64xf32>,
    %c0_72 = arith.constant 0 : index
    %c0_73 = arith.constant 0 : index
    %c9_74 = arith.constant 9 : index
    %c0_75 = arith.constant 0 : index
    %111 = vector.load %arg15[%c0_72, %c0_73, %c9_74, %c0_75] : memref<2x10x10x64xf32, #tpu.memory_space<vmem>>, vector<2x10x1x64xf32>
    tpu.vector_store %arg15[%c0_72, %c0_73, %c9_74, %c0_75], %107 {strides = array<i32>} : memref<2x10x10x64xf32, #tpu.memory_space<vmem>>, vector<2x10x1x64xf32>,
    %c0_76 = arith.constant 0 : index
    %c1_77 = arith.constant 1 : index
    %c1_78 = arith.constant 1 : index
    %c0_79 = arith.constant 0 : index
    %112 = vector.load %arg15[%c0_76, %c1_77, %c1_78, %c0_79] : memref<2x10x10x64xf32, #tpu.memory_space<vmem>>, vector<2x8x8x64xf32>
    tpu.vector_store %arg15[%c0_76, %c1_77, %c1_78, %c0_79], %105 {strides = array<i32>} : memref<2x10x10x64xf32, #tpu.memory_space<vmem>>, vector<2x8x8x64xf32>,
    %c0_80 = arith.constant 0 : index
    %c0_81 = arith.constant 0 : index
    %c0_82 = arith.constant 0 : index
    %c0_83 = arith.constant 0 : index
    %113 = vector.load %arg15[%c0_80, %c0_81, %c0_82, %c0_83] : memref<2x10x10x64xf32, #tpu.memory_space<vmem>>, vector<2x10x10x64xf32>
    %114 = arith.truncf %113 : vector<2x10x10x64xf32> to vector<2x10x10x64xbf16>
    %115 = vector.extract_strided_slice %114 {offsets = [0, 0, 0, 0], sizes = [2, 8, 8, 64], strides = [1, 1, 1, 1]} : vector<2x10x10x64xbf16> to vector<2x8x8x64xbf16>
    %116 = vector.extract_strided_slice %114 {offsets = [0, 0, 1, 0], sizes = [2, 8, 8, 64], strides = [1, 1, 1, 1]} : vector<2x10x10x64xbf16> to vector<2x8x8x64xbf16>
    %117 = vector.extract_strided_slice %114 {offsets = [0, 0, 2, 0], sizes = [2, 8, 8, 64], strides = [1, 1, 1, 1]} : vector<2x10x10x64xbf16> to vector<2x8x8x64xbf16>
    %118 = vector.extract_strided_slice %114 {offsets = [0, 1, 0, 0], sizes = [2, 8, 8, 64], strides = [1, 1, 1, 1]} : vector<2x10x10x64xbf16> to vector<2x8x8x64xbf16>
    %119 = vector.extract_strided_slice %114 {offsets = [0, 1, 1, 0], sizes = [2, 8, 8, 64], strides = [1, 1, 1, 1]} : vector<2x10x10x64xbf16> to vector<2x8x8x64xbf16>
    %120 = vector.extract_strided_slice %114 {offsets = [0, 1, 2, 0], sizes = [2, 8, 8, 64], strides = [1, 1, 1, 1]} : vector<2x10x10x64xbf16> to vector<2x8x8x64xbf16>
    %121 = vector.extract_strided_slice %114 {offsets = [0, 2, 0, 0], sizes = [2, 8, 8, 64], strides = [1, 1, 1, 1]} : vector<2x10x10x64xbf16> to vector<2x8x8x64xbf16>
    %122 = vector.extract_strided_slice %114 {offsets = [0, 2, 1, 0], sizes = [2, 8, 8, 64], strides = [1, 1, 1, 1]} : vector<2x10x10x64xbf16> to vector<2x8x8x64xbf16>
    %123 = vector.extract_strided_slice %114 {offsets = [0, 2, 2, 0], sizes = [2, 8, 8, 64], strides = [1, 1, 1, 1]} : vector<2x10x10x64xbf16> to vector<2x8x8x64xbf16>
    %124 = tpu.concatenate %115, %116, %117, %118, %119, %120, %121, %122, %123 in 3 : vector<2x8x8x64xbf16>, vector<2x8x8x64xbf16>, vector<2x8x8x64xbf16>, vector<2x8x8x64xbf16>, vector<2x8x8x64xbf16>, vector<2x8x8x64xbf16>, vector<2x8x8x64xbf16>, vector<2x8x8x64xbf16>, vector<2x8x8x64xbf16> -> vector<2x8x8x576xbf16>
    %125 = vector.shape_cast %124 : vector<2x8x8x576xbf16> to vector<128x576xbf16>
    %c0_84 = arith.constant 0 : index
    %c0_85 = arith.constant 0 : index
    %126 = vector.load %arg10[%c0_84, %c0_85] : memref<576x64xbf16, #tpu.memory_space<vmem>>, vector<576x64xbf16>
    %cst_86 = arith.constant dense<0.000000e+00> : vector<128x64xf32>
    %127 = tpu.matmul %125, %126, %cst_86 {dimension_numbers = #tpu.dot_dimension_numbers<[1], [0], [0], [1], [0, 0, 1, 1], [], []>} : vector<128x576xbf16>, vector<576x64xbf16>, vector<128x64xf32> -> vector<128x64xf32>
    %128 = vector.shape_cast %0 : vector<2x8x8x32xf32> to vector<128x32xf32>
    %129 = arith.truncf %128 : vector<128x32xf32> to vector<128x32xbf16>
    %c0_87 = arith.constant 0 : index
    %c0_88 = arith.constant 0 : index
    %130 = vector.load %arg11[%c0_87, %c0_88] : memref<32x64xbf16, #tpu.memory_space<vmem>>, vector<32x64xbf16>
    %cst_89 = arith.constant dense<0.000000e+00> : vector<128x64xf32>
    %131 = tpu.matmul %129, %130, %cst_89 {dimension_numbers = #tpu.dot_dimension_numbers<[1], [0], [0], [1], [0, 0, 1, 1], [], []>} : vector<128x32xbf16>, vector<32x64xbf16>, vector<128x64xf32> -> vector<128x64xf32>
    %132 = arith.addf %127, %131 : vector<128x64xf32>
    %c0_90 = arith.constant 0 : index
    %c0_91 = arith.constant 0 : index
    %133 = vector.load %arg12[%c0_90, %c0_91] : memref<1x64xf32, #tpu.memory_space<vmem>>, vector<1x64xf32>
    %134 = vector.broadcast %133 : vector<1x64xf32> to vector<128x64xf32>
    %135 = arith.addf %132, %134 : vector<128x64xf32>
    %c0_92 = arith.constant 0 : index
    %c0_93 = arith.constant 0 : index
    %136 = vector.load %arg13[%c0_92, %c0_93] : memref<128x64xf32, #tpu.memory_space<vmem>>, vector<128x64xf32>
    tpu.vector_store %arg13[%c0_92, %c0_93], %135 {strides = array<i32>} : memref<128x64xf32, #tpu.memory_space<vmem>>, vector<128x64xf32>,
    return
  }
  func.func @transform_0(%arg0: i32) -> (i32, i32, i32, i32) {
    %c0_i32 = arith.constant 0 : i32
    %c0_i32_0 = arith.constant 0 : i32
    %c0_i32_1 = arith.constant 0 : i32
    %c0_i32_2 = arith.constant 0 : i32
    return %arg0, %c0_i32, %c0_i32_0, %c0_i32_1 : i32, i32, i32, i32
  }
  func.func @transform_1(%arg0: i32) -> (i32, i32, i32) {
    %c0_i32 = arith.constant 0 : i32
    %c0_i32_0 = arith.constant 0 : i32
    %c0_i32_1 = arith.constant 0 : i32
    return %arg0, %c0_i32, %c0_i32_0 : i32, i32, i32
  }
  func.func @transform_2(%arg0: i32) -> (i32, i32) {
    %c0_i32 = arith.constant 0 : i32
    %c0_i32_0 = arith.constant 0 : i32
    %c0_i32_1 = arith.constant 0 : i32
    return %c0_i32, %c0_i32_0 : i32, i32
  }
  func.func @transform_3(%arg0: i32) -> (i32, i32) {
    %c0_i32 = arith.constant 0 : i32
    %c0_i32_0 = arith.constant 0 : i32
    %c0_i32_1 = arith.constant 0 : i32
    return %c0_i32, %c0_i32_0 : i32, i32
  }
  func.func @transform_4(%arg0: i32) -> (i32, i32) {
    %c0_i32 = arith.constant 0 : i32
    %c0_i32_0 = arith.constant 0 : i32
    %c0_i32_1 = arith.constant 0 : i32
    return %c0_i32, %c0_i32_0 : i32, i32
  }
  func.func @transform_5(%arg0: i32) -> (i32, i32) {
    %c0_i32 = arith.constant 0 : i32
    %c0_i32_0 = arith.constant 0 : i32
    %c0_i32_1 = arith.constant 0 : i32
    return %c0_i32, %c0_i32_0 : i32, i32
  }
  func.func @transform_6(%arg0: i32) -> (i32, i32) {
    %c0_i32 = arith.constant 0 : i32
    %c0_i32_0 = arith.constant 0 : i32
    %c0_i32_1 = arith.constant 0 : i32
    return %c0_i32, %c0_i32_0 : i32, i32
  }
  func.func @transform_7(%arg0: i32) -> (i32, i32) {
    %c0_i32 = arith.constant 0 : i32
    %c0_i32_0 = arith.constant 0 : i32
    %c0_i32_1 = arith.constant 0 : i32
    return %c0_i32, %c0_i32_0 : i32, i32
  }
  func.func @transform_8(%arg0: i32) -> (i32, i32) {
    %c0_i32 = arith.constant 0 : i32
    %c0_i32_0 = arith.constant 0 : i32
    %c0_i32_1 = arith.constant 0 : i32
    return %c0_i32, %c0_i32_0 : i32, i32
  }
  func.func @transform_9(%arg0: i32) -> (i32, i32) {
    %c0_i32 = arith.constant 0 : i32
    %c0_i32_0 = arith.constant 0 : i32
    %c0_i32_1 = arith.constant 0 : i32
    return %c0_i32, %c0_i32_0 : i32, i32
  }
  func.func @transform_10(%arg0: i32) -> (i32, i32) {
    %c0_i32 = arith.constant 0 : i32
    %c0_i32_0 = arith.constant 0 : i32
    %c0_i32_1 = arith.constant 0 : i32
    return %c0_i32, %c0_i32_0 : i32, i32
  }
  func.func @transform_11(%arg0: i32) -> (i32, i32) {
    %c0_i32 = arith.constant 0 : i32
    %c0_i32_0 = arith.constant 0 : i32
    %c0_i32_1 = arith.constant 0 : i32
    return %c0_i32, %c0_i32_0 : i32, i32
  }
  func.func @transform_12(%arg0: i32) -> (i32, i32) {
    %c0_i32 = arith.constant 0 : i32
    %c0_i32_0 = arith.constant 0 : i32
    return %arg0, %c0_i32 : i32, i32
  }
}

</mosaic_0001>

<bundles_post_ra>
// kernel: tpu_custom_call.1
= control target key start
LH: loop header
LB: loop body
LE: loop exit
PB: predicated region body
PF: predicated region fallthrough
CT: control target
= control target key end

     0   :  { %vm7853_vm0 = vcmask 261120   ;;  %vm7852_vm1 = vcmask 1041409   ;;  %vm7851_vm2 = vcmask 1043459   ;;  %vm7850_vm3 = vcmask 1041408   ;;  %s4579_s30 = smov 32   ;;  %s4580_s13 = smov 96   ;;  %s7837_s4 = inlined_call_operand.vmem [shape: f32[32,32], index: 4, kind: input, shape index: {}]   ;;  %s7838_s0 = inlined_call_operand.vmem [shape: f32[2,8,8,32], index: 0, kind: input, shape index: {}]   ;;  %s7839_s2 = inlined_call_operand.vmem [shape: f32[1,32], index: 2, kind: input, shape index: {}]   ;;  %s7840_s3 = inlined_call_operand.vmem [shape: f32[1,32], index: 3, kind: input, shape index: {}]   ;;  %s7841_s5 = inlined_call_operand.vmem [shape: bf16[288,64], index: 5, kind: input, shape index: {}]   ;;  %s7842_s1 = inlined_call_operand.vmem [shape: f32[2,1,64], index: 1, kind: input, shape index: {}]   ;;  %s7843_s6 = inlined_call_operand.vmem [shape: f32[1,64], index: 6, kind: input, shape index: {}]   ;;  %s7844_s7 = inlined_call_operand.vmem [shape: f32[1,64], index: 7, kind: input, shape index: {}]   ;;  %s7845_s8 = inlined_call_operand.vmem [shape: f32[64,64], index: 8, kind: input, shape index: {}]   ;;  %s7846_s9 = inlined_call_operand.vmem [shape: bf16[576,64], index: 9, kind: input, shape index: {}]   ;;  %s7847_s10 = inlined_call_operand.vmem [shape: bf16[32,64], index: 10, kind: input, shape index: {}]   ;;  %s7848_s11 = inlined_call_operand.vmem [shape: f32[1,64], index: 11, kind: input, shape index: {}]   ;;  %s7849_s12 = inlined_call_operand.vmem [shape: f32[128,64], index: 12, kind: output, shape index: {}]  }
   0x1   :  { %v174_v0 = vld [vmem:[%s7837_s4 + $0x18] sm:$0xff]  ;;  %v173_v1 = vld [vmem:[%s7837_s4 + $0x10] sm:$0xff]  ;;  %v4656_v2 = vld [vmem:[%s7838_s0] sm:$0xff]  ;;  %vm631_vm8 = vcmask 254976   ;;  %vm640_vm9 = vcmask 253952  }
   0x2   :  { %190 = vmatpush.msra.mxu0 %v174_v0  ;;  %v4661_v3 = vld [vmem:[%s7838_s0 + $0x8] sm:$0xff]  ;;  %v4669_v5 = vld [vmem:[%s7838_s0 + $0x10] sm:$0xff]  ;;  %v59_v6 = vsel %vm7853_vm0, %v4656_v2, 0.0  ;;  %v171_v8 = vld [vmem:[%s7837_s4] sm:$0xff]  ;;  %v101_v27 = vmul.f32 %v4656_v2, %v4656_v2 }
   0x3   :  { %v172_v4 = vld [vmem:[%s7837_s4 + $0x8] sm:$0xff]  ;;  %v60_v7 = vsel %vm7853_vm0, %v4661_v3, 0.0  ;;  %v4681_v9 = vld [vmem:[%s7838_s0 + $0x18] sm:$0xff]  ;;  %v62_v11 = vsel %vm7853_vm0, %v4669_v5, 0.0  ;;  %v4688_v12 = vld [vmem:[%s7838_s0 + $0x40] sm:$0xff]  ;;  %v102_v31 = vmul.f32 %v4661_v3, %v4661_v3  ;;  %v103_v38 = vmul.f32 %v4669_v5, %v4669_v5 }
   0x4   :  { %191 = vmatpush.msra.mxu0 %v173_v1  ;;  %v61_v10 = vadd.f32 %v60_v7, %v59_v6  ;;  %v4693_v13 = vld [vmem:[%s7838_s0 + $0x48] sm:$0xff]  ;;  %v4698_v14 = vld [vmem:[%s7838_s0 + $0x50] sm:$0xff]  ;;  %v64_v15 = vsel %vm7853_vm0, %v4681_v9, 0.0  ;;  %v4705_v16 = vld [vmem:[%s7838_s0 + $0x20] sm:$0xff]  ;;  %v80_v19 = vsel %vm7853_vm0, %v4688_v12, 0.0  ;;  %v104_v46 = vmul.f32 %v4681_v9, %v4681_v9 }
   0x5   :  { %v4710_v17 = vld [vmem:[%s7838_s0 + $0x28] sm:$0xff]  ;;  %v81_v20 = vsel %vm7853_vm0, %v4693_v13, 0.0  ;;  %v83_v21 = vsel %vm7853_vm0, %v4698_v14, 0.0  ;;  %v4721_v22 = vld [vmem:[%s7838_s0 + $0x30] sm:$0xff]  ;;  %v4726_v23 = vld [vmem:[%s7838_s0 + $0x38] sm:$0xff]  ;;  %v66_v25 = vsel %vm7853_vm0, %v4705_v16, 0.0  ;;  %v105_v47 = vmul.f32 %v4705_v16, %v4705_v16 }
   0x6   :  { %192 = vmatpush.msra.mxu0 %v172_v4  ;;  %v63_v18 = vadd.f32 %v62_v11, %v61_v10  ;;  %v4731_v24 = vld [vmem:[%s7838_s0 + $0x58] sm:$0xff]  ;;  %v82_v26 = vadd.f32 %v81_v20, %v80_v19  ;;  %v68_v29 = vsel %vm7853_vm0, %v4710_v17, 0.0  ;;  %v4746_v32 = vld [vmem:[%s7838_s0 + $0x60] sm:$0xff]  ;;  %v4751_v33 = vld [vmem:[%s7838_s0 + $0x68] sm:$0xff]  ;;  %v70_v35 = vsel %vm7853_vm0, %v4721_v22, 0.0 }
   0x7   :  { %v85_v30 = vsel %vm7853_vm0, %v4731_v24, 0.0  ;;  %v4756_v34 = vld [vmem:[%s7838_s0 + $0x70] sm:$0xff]  ;;  %v72_v36 = vsel %vm7853_vm0, %v4726_v23, 0.0  ;;  %v4767_v39 = vld [vmem:[%s7838_s0 + $0x78] sm:$0xff]  ;;  %v87_v41 = vsel %vm7853_vm0, %v4746_v32, 0.0  ;;  %v89_v42 = vsel %vm7853_vm0, %v4751_v33, 0.0 }
   0x8   :  { %193 = vmatpush.msra.mxu0 %v171_v8  ;;  %v65_v28 = vadd.f32 %v64_v15, %v63_v18  ;;  %v84_v37 = vadd.f32 %v83_v21, %v82_v26  ;;  %v91_v43 = vsel %vm7853_vm0, %v4756_v34, 0.0  ;;  %v93_v45 = vsel %vm7853_vm0, %v4767_v39, 0.0 }
   0x9   :  { %v109_v49 = vmul.f32 %v4688_v12, %v4688_v12  ;;  %v110_v50 = vmul.f32 %v4693_v13, %v4693_v13  ;;  %v111_v51 = vmul.f32 %v4698_v14, %v4698_v14  ;;  %v117_v53 = vsel %vm7853_vm0, %v101_v27, 0.0 }
   0xa   :  { %v67_v40 = vadd.f32 %v66_v25, %v65_v28  ;;  %v86_v44 = vadd.f32 %v85_v30, %v84_v37  ;;  %v118_v54 = vsel %vm7853_vm0, %v102_v31, 0.0  ;;  %v120_v55 = vsel %vm7853_vm0, %v103_v38, 0.0 }
   0xb   :  { %v106_v57 = vmul.f32 %v4710_v17, %v4710_v17  ;;  %v112_v58 = vmul.f32 %v4731_v24, %v4731_v24  ;;  %v119_v59 = vadd.f32 %v118_v54, %v117_v53  ;;  %v107_v61 = vmul.f32 %v4721_v22, %v4721_v22 }
   0xc   :  { %v69_v48 = vadd.f32 %v68_v29, %v67_v40  ;;  %v88_v52 = vadd.f32 %v87_v41, %v86_v44  ;;  %v113_v62 = vmul.f32 %v4746_v32, %v4746_v32  ;;  %v122_v63 = vsel %vm7853_vm0, %v104_v46, 0.0 }
   0xd   :  { %v121_v1 = vadd.f32 %v120_v55, %v119_v59  ;;  %v138_v4 = vsel %vm7853_vm0, %v109_v49, 0.0  ;;  %v139_v6 = vsel %vm7853_vm0, %v110_v50, 0.0  ;;  %v124_v8 = vsel %vm7853_vm0, %v105_v47, 0.0 }
   0xe   :  { %v71_v56 = vadd.f32 %v70_v35, %v69_v48  ;;  %v90_v60 = vadd.f32 %v89_v42, %v88_v52  ;;  %v140_v10 = vadd.f32 %v139_v6, %v138_v4  ;;  %v141_v11 = vsel %vm7853_vm0, %v111_v51, 0.0 }
   0xf   :  { %v114_v18 = vmul.f32 %v4751_v33, %v4751_v33  ;;  %v123_v19 = vadd.f32 %v122_v63, %v121_v1  ;;  %v143_v20 = vsel %vm7853_vm0, %v112_v58, 0.0  ;;  %v108_v25 = vmul.f32 %v4726_v23, %v4726_v23 }
  0x10   :  { %v73_v0 = vadd.f32 %v72_v36, %v71_v56  ;;  %v92_v7 = vadd.f32 %v91_v43, %v90_v60  ;;  %v126_v26 = vsel %vm7853_vm0, %v106_v57, 0.0  ;;  %v142_v27 = vadd.f32 %v141_v11, %v140_v10 }
  0x11   :  { %v115_v28 = vmul.f32 %v4756_v34, %v4756_v34  ;;  %v125_v29 = vadd.f32 %v124_v8, %v123_v19  ;;  %v145_v30 = vsel %vm7853_vm0, %v113_v62, 0.0  ;;  %v128_v36 = vsel %vm7853_vm0, %v107_v61, 0.0 }
  0x12   :  { %v74_v15 = vrot.slane %v73_v0, 4  ;;  %v94_v21 = vadd.f32 %v93_v45, %v92_v7  ;;  %v144_v37 = vadd.f32 %v143_v20, %v142_v27  ;;  %v116_v38 = vmul.f32 %v4767_v39, %v4767_v39 }
  0x13   :  { %v127_v40 = vadd.f32 %v126_v26, %v125_v29  ;;  %v147_v41 = vsel %vm7853_vm0, %v114_v18, 0.0  ;;  %v130_v43 = vsel %vm7853_vm0, %v108_v25, 0.0  ;;  %v149_v46 = vsel %vm7853_vm0, %v115_v28, 0.0 }
  0x14   :  { %v75_v31 = vadd.f32 %v74_v15, %v73_v0  ;;  %v95_v35 = vrot.slane %v94_v21, 4  ;;  %v146_v44 = vadd.f32 %v145_v30, %v144_v37  ;;  %v151_v51 = vsel %vm7853_vm0, %v116_v38, 0.0 }
  0x15   :  { %v129_v45 = vadd.f32 %v128_v36, %v127_v40  ;;  %v4576_v20 = vmov 64.0  }
  0x16   :  { %v96_v42 = vadd.f32 %v95_v35, %v94_v21  ;;  %v76_v47 = vrot.slane %v75_v31, 2  ;;  %v148_v49 = vadd.f32 %v147_v41, %v146_v44  ;;  %4424 = vrcp.f32 %v4576_v20 }
  0x17   :  { %v131_v50 = vadd.f32 %v130_v43, %v129_v45 }
  0x18   :  { %v97_v48 = vrot.slane %v96_v42, 2  ;;  %v150_v52 = vadd.f32 %v149_v46, %v148_v49  ;;  %v77_v54 = vadd.f32 %v76_v47, %v75_v31 }
  0x19   :  { %v132_v53 = vrot.slane %v131_v50, 4 }
  0x1a   :  { %v98_v55 = vadd.f32 %v97_v48, %v96_v42  ;;  %v152_v56 = vadd.f32 %v151_v51, %v150_v52  ;;  %v78_v60 = vrot.slane %v77_v54, 1  ;;  %v7854_v48 = vmov 0.0  }
  0x1b   :  { %v133_v57 = vadd.f32 %v132_v53, %v131_v50  ;;  %636 = vst.msk [vmem:[#allocation2 + $0x90] sm:$0xff] %vm7853_vm0, %v7854_v48 }
  0x1c   :  { %v153_v58 = vrot.slane %v152_v56, 4  ;;  %v99_v61 = vrot.slane %v98_v55, 1  ;;  %v79_v4 = vadd.f32 %v78_v60, %v77_v54  ;;  %v4425_v21 = vpop.eup %4424  ;;  %637 = vst.msk [vmem:[#allocation2 + $0x98] sm:$0x3] %vm631_vm8, %v7854_v48 }
  0x1d   :  { %v134_v59 = vrot.slane %v133_v57, 2  ;;  %v199_v25 = vmul.f32 64.0, %v4425_v21  ;;  %vm203_vm4 = vweird.f32 %v4425_v21  ;;  %650 = vst.msk [vmem:[#allocation2 + $0x90] sm:$0x1] %vm640_vm9, %v7854_v48 }
  0x1e   :  { %v154_v62 = vadd.f32 %v153_v58, %v152_v56  ;;  %v100_v6 = vadd.f32 %v99_v61, %v98_v55  ;;  %670 = vst.msk [vmem:[#allocation2 + $0x99] sm:$0x1] %vm640_vm9, %v7854_v48 }
  0x1f   :  { %v135_v63 = vadd.f32 %v134_v59, %v133_v57  ;;  %v200_v26 = vsub.f32 1.0, %v199_v25  ;;  %630 = vst.msk [vmem:[#allocation2] sm:$0xff] %vm7853_vm0, %v7854_v48 }
  0x20   :  { %v155_v0 = vrot.slane %v154_v62, 2  ;;  %v162_v15 = vsel %vm7852_vm1, %v100_v6, %v79_v4  ;;  %632 = vst.msk [vmem:[#allocation2 + $0x8] sm:$0x3] %vm631_vm8, %v7854_v48 }
  0x21   :  { %v136_v1 = vrot.slane %v135_v63, 1  ;;  %v201_v27 = vmul.f32 %v4425_v21, %v200_v26  ;;  %633 = vst.msk [vmem:[#allocation2 + $0xa0] sm:$0xff] %vm7853_vm0, %v7854_v48 }
  0x22   :  { %v156_v7 = vadd.f32 %v155_v0, %v154_v62  ;;  %634 = vst.msk [vmem:[#allocation2 + $0xa8] sm:$0x3] %vm631_vm8, %v7854_v48 }
  0x23   :  { %v137_v8 = vadd.f32 %v136_v1, %v135_v63  ;;  %v202_v28 = vadd.f32 %v4425_v21, %v201_v27  ;;  %638 = vst.msk [vmem:[#allocation2 + $0x130] sm:$0xff] %vm7853_vm0, %v7854_v48 }
  0x24   :  { %v157_v10 = vrot.slane %v156_v7, 1  ;;  %639 = vst.msk [vmem:[#allocation2 + $0x138] sm:$0x3] %vm631_vm8, %v7854_v48 }
  0x25   :  { %v204_v29 = vsel %vm203_vm4, %v4425_v21, %v202_v28  ;;  %642 = vst.msk [vmem:[#allocation2 + $0x10] sm:$0x1] %vm640_vm9, %v7854_v48 }
  0x26   :  { %v158_v11 = vadd.f32 %v157_v10, %v156_v7  ;;  %643 = vst.msk [vmem:[#allocation2 + $0x20] sm:$0x1] %vm640_vm9, %v7854_v48  ;;  %v4898_v7 = vld [vmem:[%s7840_s3] ss:$0 sm:$0xff]  ;;  %s4578_s3 = smov 64  }
  0x27   :  { %644 = vst.msk [vmem:[#allocation2 + $0x30] sm:$0x1] %vm640_vm9, %v7854_v48 }
  0x28   :  { %v167_v18 = vsel %vm7851_vm2, %v158_v11, %v137_v8  ;;  %v716_v11 = vld [vmem:[#allocation2 + $0x90] sm:$0xff]  ;;  %645 = vst.msk [vmem:[#allocation2 + $0x40] sm:$0x1] %vm640_vm9, %v7854_v48 }
  0x29   :  { %v170_v19 = vsel %vm7850_vm3, %v162_v15, %v167_v18  ;;  %646 = vst.msk [vmem:[#allocation2 + $0x50] sm:$0x1] %vm640_vm9, %v7854_v48 }
  0x2a   :  { %4063 = vmatmul.msk.f32.vlgmr.msra.gmra.mxu0 %vm7853_vm0, %v170_v19  ;;  %647 = vst.msk [vmem:[#allocation2 + $0x60] sm:$0x1] %vm640_vm9, %v7854_v48 }
  0x2b   :  { %648 = vst.msk [vmem:[#allocation2 + $0x70] sm:$0x1] %vm640_vm9, %v7854_v48 }
  0x2c   :  { %649 = vst.msk [vmem:[#allocation2 + $0x80] sm:$0x1] %vm640_vm9, %v7854_v48 }
  0x2d   :  { %652 = vst.msk [vmem:[#allocation2 + $0xb0] sm:$0x1] %vm640_vm9, %v7854_v48 }
  0x2e   :  { %653 = vst.msk [vmem:[#allocation2 + $0xc0] sm:$0x1] %vm640_vm9, %v7854_v48 }
  0x2f   :  { %654 = vst.msk [vmem:[#allocation2 + $0xd0] sm:$0x1] %vm640_vm9, %v7854_v48 }
  0x30   :  { %655 = vst.msk [vmem:[#allocation2 + $0xe0] sm:$0x1] %vm640_vm9, %v7854_v48 }
  0x31   :  { %656 = vst.msk [vmem:[#allocation2 + $0xf0] sm:$0x1] %vm640_vm9, %v7854_v48 }
  0x32   :  { %657 = vst.msk [vmem:[#allocation2 + $0x100] sm:$0x1] %vm640_vm9, %v7854_v48 }
  0x33   :  { %658 = vst.msk [vmem:[#allocation2 + $0x110] sm:$0x1] %vm640_vm9, %v7854_v48 }
  0x34   :  { %659 = vst.msk [vmem:[#allocation2 + $0x120] sm:$0x1] %vm640_vm9, %v7854_v48 }
  0x35   :  { %662 = vst.msk [vmem:[#allocation2 + $0x19] sm:$0x1] %vm640_vm9, %v7854_v48 }
  0x36   :  { %663 = vst.msk [vmem:[#allocation2 + $0x29] sm:$0x1] %vm640_vm9, %v7854_v48 }
  0x37   :  { %664 = vst.msk [vmem:[#allocation2 + $0x39] sm:$0x1] %vm640_vm9, %v7854_v48 }
  0x38   :  { %665 = vst.msk [vmem:[#allocation2 + $0x49] sm:$0x1] %vm640_vm9, %v7854_v48 }
  0x39   :  { %666 = vst.msk [vmem:[#allocation2 + $0x59] sm:$0x1] %vm640_vm9, %v7854_v48 }
  0x3a   :  { %667 = vst.msk [vmem:[#allocation2 + $0x69] sm:$0x1] %vm640_vm9, %v7854_v48 }
  0x3b   :  { %668 = vst.msk [vmem:[#allocation2 + $0x79] sm:$0x1] %vm640_vm9, %v7854_v48 }
  0x3c   :  { %669 = vst.msk [vmem:[#allocation2 + $0x89] sm:$0x1] %vm640_vm9, %v7854_v48 }
  0x3d   :  { %672 = vst.msk [vmem:[#allocation2 + $0xb9] sm:$0x1] %vm640_vm9, %v7854_v48 }
  0x3e   :  { %673 = vst.msk [vmem:[#allocation2 + $0xc9] sm:$0x1] %vm640_vm9, %v7854_v48 }
  0x3f   :  { %674 = vst.msk [vmem:[#allocation2 + $0xd9] sm:$0x1] %vm640_vm9, %v7854_v48 }
  0x40   :  { %675 = vst.msk [vmem:[#allocation2 + $0xe9] sm:$0x1] %vm640_vm9, %v7854_v48 }
  0x41   :  { %676 = vst.msk [vmem:[#allocation2 + $0xf9] sm:$0x1] %vm640_vm9, %v7854_v48 }
  0x42   :  { %677 = vst.msk [vmem:[#allocation2 + $0x109] sm:$0x1] %vm640_vm9, %v7854_v48 }
  0x43   :  { %678 = vst.msk [vmem:[#allocation2 + $0x119] sm:$0x1] %vm640_vm9, %v7854_v48 }
  0x44   :  { %679 = vst.msk [vmem:[#allocation2 + $0x129] sm:$0x1] %vm640_vm9, %v7854_v48 }
  0x45   :  { %641 = vst.msk [vmem:[#allocation2] sm:$0x1] %vm640_vm9, %v7854_v48 }
  0x46   :  { %661 = vst.msk [vmem:[#allocation2 + $0x9] sm:$0x1] %vm640_vm9, %v7854_v48 }
  0x47   :  { %651 = vst.msk [vmem:[#allocation2 + $0xa0] sm:$0x1] %vm640_vm9, %v7854_v48 }
  0x48   :  { %660 = vst.msk [vmem:[#allocation2 + $0x130] sm:$0x1] %vm640_vm9, %v7854_v48 }
  0x49   :  { %671 = vst.msk [vmem:[#allocation2 + $0xa9] sm:$0x1] %vm640_vm9, %v7854_v48 }
  0x4a   :  { %680 = vst.msk [vmem:[#allocation2 + $0x139] sm:$0x1] %vm640_vm9, %v7854_v48 }
  0xa7   :  { %v195_v30 = vpop.f32.mrf.mxu0 }
  0xa8   :  { %v205_v31 = vmul.f32 %v204_v29, %v195_v30  ;;  %v756_v30 = vpack.c.bf16 %v716_v11, %v716_v11 }
  0xaa   :  { %v206_v35 = vmul.f32 %v205_v31, %v205_v31  ;;  %v223_v47 = vrot.slane %v205_v31, 1  ;;  %v4827_v49 = vperm.slane %v205_v31, 0 }
  0xac   :  { %v208_v36 = vrot.slane %v206_v35, 6  ;;  %v4831_v50 = vperm.slane %v223_v47, 0  ;;  %v230_v53 = vsub.f32 %v4669_v5, %v4827_v49  ;;  %v229_v56 = vsub.f32 %v4661_v3, %v4827_v49 }
  0xad   :  { %v235_v57 = vsub.f32 %v4726_v23, %v4827_v49  ;;  %v4865_v23 = vld [vmem:[%s7839_s2] ss:$0 sm:$0xff]  ;;  %v232_v61 = vsub.f32 %v4705_v16, %v4827_v49  ;;  %v234_v16 = vsub.f32 %v4721_v22, %v4827_v49 }
  0xae   :  { %v210_v37 = vsub.f32 %v205_v31, %v208_v36  ;;  %v236_v58 = vsub.f32 %v4688_v12, %v4831_v50  ;;  %v237_v5 = vsub.f32 %v4693_v13, %v4831_v50  ;;  %v239_v59 = vsub.f32 %v4731_v24, %v4831_v50 }
  0xaf   :  { %v240_v60 = vsub.f32 %v4746_v32, %v4831_v50  ;;  %v241_v12 = vsub.f32 %v4751_v33, %v4831_v50  ;;  %v242_v13 = vsub.f32 %v4756_v34, %v4831_v50  ;;  %v243_v24 = vsub.f32 %v4767_v39, %v4831_v50 }
  0xb0   :  { %v211_v38 = vadd.f32 1e-05, %v210_v37 }
  0xb2   :  { %4426 = vrsqrt.f32 %v211_v38  ;;  %vm218_vm6 = vweird.f32 %v211_v38 }
  0xb8   :  { %v4427_v40 = vpop.eup %4426 }
  0xb9   :  { %v213_v41 = vmul.f32 %v4427_v40, %v211_v38  ;;  %vm219_vm5 = vweird.f32 %v4427_v40 }
  0xba   :  { %vm220_vm7 = vmor %vm218_vm6, %vm219_vm5 }
  0xbb   :  { %v214_v42 = vmul.f32 %v4427_v40, %v213_v41  ;;  %v4949_v41 = vunpack.c.l.b16 %v756_v30 }
  0xbd   :  { %v215_v43 = vmul.f32 0.5, %v214_v42  ;;  %v231_v42 = vsub.f32 %v4681_v9, %v4827_v49  ;;  %v1160_v47 = vpack.c.b16 %v4949_v41, %v4949_v41 }
  0xbf   :  { %v216_v44 = vsub.f32 1.5, %v215_v43  ;;  %1176 = vrot.lane.b32.xlu0 %v1160_v47, %s4578_s3 }
  0xc1   :  { %v217_v45 = vmul.f32 %v4427_v40, %v216_v44 }
  0xc3   :  { %v221_v46 = vsel %vm220_vm7, %v4427_v40, %v217_v45 }
  0xc4   :  { %245 = vst [vmem:[#allocation1] sm:$0xff] %v221_v46 }
  0xcb   :  { %v247_v51 = vld [vmem:[#allocation1 + $0x2] ss:$9 sm:$0xff] }
  0xcc   :  { %v249_v52 = vld [vmem:[#allocation1 + $0x3] ss:$9 sm:$0xff]  ;;  %v4841_v54 = vperm.slane %v247_v51, 0 }
  0xcd   :  { %v4843_v55 = vperm.slane %v249_v52, 0 }
  0xce   :  { %v256_v3 = vmul.f32 %v4841_v54, %v230_v53  ;;  %v261_v32 = vmul.f32 %v4841_v54, %v235_v57  ;;  %v258_v4 = vmul.f32 %v4841_v54, %v232_v61  ;;  %v255_v8 = vmul.f32 %v4841_v54, %v229_v56  ;;  %v717_v56 = vld [vmem:[#allocation2 + $0x98] sm:$0x3] }
  0xcf   :  { %v262_v62 = vmul.f32 %v4843_v55, %v236_v58  ;;  %v263_v63 = vmul.f32 %v4843_v55, %v237_v5  ;;  %v265_v33 = vmul.f32 %v4843_v55, %v239_v59  ;;  %v266_v34 = vmul.f32 %v4843_v55, %v240_v60 }
  0xd0   :  { %v267_v39 = vmul.f32 %v4843_v55, %v241_v12  ;;  %v268_v0 = vmul.f32 %v4843_v55, %v242_v13  ;;  %v269_v1 = vmul.f32 %v4843_v55, %v243_v24  ;;  %v276_v6 = vmul.f32 %v4865_v23, %v256_v3 }
  0xd1   :  { %v4904_v10 = vmul.f32 %v4865_v23, %v261_v32  ;;  %v260_v22 = vmul.f32 %v4841_v54, %v234_v16  ;;  %v4910_v15 = vmul.f32 %v4865_v23, %v262_v62  ;;  %v4913_v18 = vmul.f32 %v4865_v23, %v263_v63 }
  0xd2   :  { %v285_v19 = vmul.f32 %v4865_v23, %v265_v33  ;;  %v286_v20 = vmul.f32 %v4865_v23, %v266_v34  ;;  %v287_v21 = vmul.f32 %v4865_v23, %v267_v39  ;;  %v288_v25 = vmul.f32 %v4865_v23, %v268_v0 }
  0xd3   :  { %v289_v26 = vmul.f32 %v4865_v23, %v269_v1  ;;  %v278_v27 = vmul.f32 %v4865_v23, %v258_v4  ;;  %v4926_v28 = vadd.f32 %v4898_v7, %v276_v6  ;;  %v275_v43 = vmul.f32 %v4865_v23, %v255_v8 }
  0xd4   :  { %v4929_v29 = vadd.f32 %v4898_v7, %v285_v19  ;;  %v4934_v31 = vadd.f32 %v4898_v7, %v286_v20  ;;  %v4937_v35 = vadd.f32 %v4898_v7, %v287_v21  ;;  %v4940_v36 = vadd.f32 %v4898_v7, %v288_v25 }
  0xd5   :  { %v4943_v37 = vadd.f32 %v4898_v7, %v289_v26  ;;  %v4066_v38 = vmul.f32 -1.442695, %v4926_v28  ;;  %v4964_v51 = vadd.f32 %v4898_v7, %v278_v27  ;;  %v257_v9 = vmul.f32 %v4841_v54, %v231_v42 }
  0xd6   :  { %v4075_v40 = vmul.f32 -1.442695, %v4929_v29  ;;  %v4076_v44 = vmul.f32 -1.442695, %v4934_v31  ;;  %v4077_v45 = vmul.f32 -1.442695, %v4937_v35  ;;  %v280_v52 = vmul.f32 %v4865_v23, %v260_v22 }
  0xd7   :  { %4428 = vpow2.f32 %v4066_v38  ;;  %v4078_v46 = vmul.f32 -1.442695, %v4940_v36  ;;  %v4079_v53 = vmul.f32 -1.442695, %v4943_v37  ;;  %v4977_v57 = vadd.f32 %v4898_v7, %v275_v43 }
  0xd8   :  { %4430 = vpow2.f32 %v4075_v40  ;;  %v757_v58 = vpack.c.bf16 %v717_v56, %v717_v56  ;;  %v4068_v5 = vmul.f32 -1.442695, %v4964_v51  ;;  %v277_v59 = vmul.f32 %v4865_v23, %v257_v9 }
  0xd9   :  { %4432 = vpow2.f32 %v4076_v44  ;;  %v4986_v60 = vadd.f32 %v4898_v7, %v280_v52  ;;  %v238_v12 = vsub.f32 %v4698_v14, %v4831_v50  ;;  %v228_v24 = vsub.f32 %v4656_v2, %v4827_v49 }
  0xda   :  { %4434 = vpow2.f32 %v4077_v45  ;;  %v233_v32 = vsub.f32 %v4710_v17, %v4827_v49  ;;  %v4065_v62 = vmul.f32 -1.442695, %v4977_v57  ;;  %v1196_v33 = vunpack.c.l.b16 %v757_v58 }
  0xdb   :  { %4436 = vpow2.f32 %v4078_v46  ;;  %v264_v14 = vmul.f32 %v4843_v55, %v238_v12  ;;  %v4070_v17 = vmul.f32 -1.442695, %v4986_v60  ;;  %v5013_v49 = vadd.f32 %v4898_v7, %v277_v59 }
  0xdc   :  { %4438 = vpow2.f32 %v4079_v53  ;;  %v5021_v1 = vmul.f32 %v4841_v54, %v228_v24  ;;  %v5024_v16 = vmul.f32 %v4841_v54, %v233_v32  ;;  %v5038_v54 = vpack.c.b16 %v1196_v33, %v4949_v41  ;;  %v4362_v41 = vld [vmem:[%s7841_s5 + $0x88] sm:$0xff] }
  0xdd   :  { %v4429_v3 = vpop.eup %4428  ;;  %4440 = vpow2.f32 %v4068_v5  ;;  %v5029_v6 = vmul.f32 %v4865_v23, %v264_v14  ;;  %v5041_v19 = vmul.f32 -1.442695, %v5013_v49  ;;  %1866 = vmatpush.bf16.msra.mxu3 %v4362_v41 }
  0xde   :  { %v4431_v13 = vpop.eup %4430  ;;  %v4996_v61 = vadd.f32 1.0, %v4429_v3 }
  0xdf   :  { %v4433_v63 = vpop.eup %4432  ;;  %v5002_v50 = vadd.f32 1.0, %v4431_v13 }
  0xe0   :  { %v4435_v2 = vpop.eup %4434  ;;  %v5006_v34 = vadd.f32 1.0, %v4433_v63  ;;  %4442 = vrcp.f32 %v4996_v61  ;;  %v413_v8 = vand.u32 2147483647, %v4996_v61  ;;  %v415_v11 = vand.u32 2147483648, %v4996_v61 }
  0xe1   :  { %v4437_v55 = vpop.eup %4436  ;;  %v5015_v39 = vadd.f32 1.0, %v4435_v2  ;;  %4444 = vrcp.f32 %v5002_v50  ;;  %v548_v22 = vand.u32 2147483647, %v5002_v50  ;;  %vm409_vm10 = vweird.f32 %v4996_v61 }
  0xe2   :  { %v4439_v0 = vpop.eup %4438  ;;  %v5026_v4 = vadd.f32 1.0, %v4437_v55  ;;  %4446 = vpow2.f32 %v4065_v62  ;;  %v550_v25 = vand.u32 2147483648, %v5002_v50  ;;  %vm544_vm11 = vweird.f32 %v5002_v50 }
  0xe3   :  { %4448 = vrcp.f32 %v5006_v34  ;;  %v5043_v20 = vpop.eup %4440  ;;  %v5045_v21 = vadd.f32 1.0, %v4439_v0  ;;  %v563_v27 = vand.u32 2147483647, %v5006_v34  ;;  %v565_v30 = vand.u32 2147483648, %v5006_v34 }
  0xe4   :  { %4450 = vpow2.f32 %v4070_v17  ;;  %vm5064_vm12 = vcmp.eq.f32.partialorder %v413_v8, 8.507059e+37  ;;  %v416_v42 = vor.u32 1.1754944e-38, %v415_v11  ;;  %v580_v43 = vand.u32 2147483648, %v5015_v39 }
  0xe5   :  { %4452 = vrcp.f32 %v5015_v39  ;;  %vm5075_vm13 = vcmp.eq.f32.partialorder %v548_v22, 8.507059e+37  ;;  %vm559_vm14 = vweird.f32 %v5006_v34  ;;  %v578_v47 = vand.u32 2147483647, %v5015_v39 }
  0xe6   :  { %v5052_v26 = vpop.eup %4442  ;;  %4454 = vrcp.f32 %v5026_v4  ;;  %v551_v53 = vor.u32 1.1754944e-38, %v550_v25  ;;  %v593_v56 = vand.u32 2147483647, %v5026_v4  ;;  %vm5094_vm4 = vcmp.eq.f32.partialorder %v563_v27, 8.507059e+37 }
  0xe7   :  { %v5060_v38 = vpop.eup %4444  ;;  %v405_v40 = vmul.f32 %v5052_v26, %v4996_v61  ;;  %4456 = vrcp.f32 %v5045_v21  ;;  %vm410_vm15 = vweird.f32 %v5052_v26  ;;  %v566_v12 = vor.u32 1.1754944e-38, %v565_v30 }
  0xe8   :  { %v5071_v44 = vpop.eup %4446  ;;  %v540_v45 = vmul.f32 %v5060_v38, %v5002_v50  ;;  %vm574_vm5 = vweird.f32 %v5015_v39  ;;  %vm545_vm6 = vweird.f32 %v5060_v38  ;;  %v581_v32 = vor.u32 1.1754944e-38, %v580_v43  ;;  %vm5135_vm1 = vmor %vm409_vm10, %vm410_vm15 }
  0xe9   :  { %v5083_v9 = vpop.eup %4448  ;;  %v406_v52 = vsub.f32 1.0, %v405_v40  ;;  %vm589_vm7 = vweird.f32 %v5026_v4  ;;  %v595_v62 = vand.u32 2147483648, %v5026_v4  ;;  %vm5114_vm8 = vcmp.eq.f32.partialorder %v578_v47, 8.507059e+37  ;;  %vm546_vm10 = vmor %vm544_vm11, %vm545_vm6 }
  0xea   :  { %v5089_v58 = vpop.eup %4450  ;;  %v541_v5 = vsub.f32 1.0, %v540_v45  ;;  %v555_v59 = vmul.f32 %v5083_v9, %v5006_v34  ;;  %v608_v55 = vand.u32 2147483647, %v5045_v21  ;;  %vm560_vm3 = vweird.f32 %v5083_v9 }
  0xeb   :  { %v5101_v13 = vpop.eup %4452  ;;  %v407_v24 = vmul.f32 %v5052_v26, %v406_v52  ;;  %vm5125_vm2 = vcmp.eq.f32.partialorder %v593_v56, 8.507059e+37  ;;  %v610_v40 = vand.u32 2147483648, %v5045_v21  ;;  %vm604_vm0 = vweird.f32 %v5045_v21 }
  0xec   :  { %v5109_v63 = vpop.eup %4454  ;;  %v542_v14 = vmul.f32 %v5060_v38, %v541_v5  ;;  %v556_v33 = vsub.f32 1.0, %v555_v59  ;;  %v570_v2 = vmul.f32 %v5101_v13, %v5015_v39  ;;  %vm575_vm15 = vweird.f32 %v5101_v13 }
  0xed   :  { %v408_v0 = vadd.f32 %v5052_v26, %v407_v24  ;;  %v585_v8 = vmul.f32 %v5109_v63, %v5026_v4  ;;  %v5144_v43 = vpop.eup %4456  ;;  %v5158_v47 = vadd.f32 1.0, %v5043_v20  ;;  %vm590_vm11 = vweird.f32 %v5109_v63 }
  0xee   :  { %v543_v25 = vadd.f32 %v5060_v38, %v542_v14  ;;  %v557_v27 = vmul.f32 %v5083_v9, %v556_v33  ;;  %v571_v30 = vsub.f32 1.0, %v570_v2  ;;  %v1203_v39 = vshll.u32 %v5038_v54, 16  ;;  %v698_v2 = vld [vmem:[#allocation2] sm:$0xff] }
  0xef   :  { %v412_v61 = vsel %vm5135_vm1, %v5052_v26, %v408_v0  ;;  %v586_v45 = vsub.f32 1.0, %v585_v8  ;;  %vm561_vm1 = vmor %vm559_vm14, %vm560_vm3  ;;  %4458 = vrcp.f32 %v5158_v47  ;;  %vm605_vm14 = vweird.f32 %v5144_v43 }
  0xf0   :  { %v417_v52 = vsel %vm5064_vm12, %v416_v42, %v412_v61  ;;  %v547_v26 = vsel %vm546_vm10, %v5060_v38, %v543_v25  ;;  %v558_v56 = vadd.f32 %v5083_v9, %v557_v27  ;;  %v572_v50 = vmul.f32 %v5101_v13, %v571_v30  ;;  %vm576_vm3 = vmor %vm574_vm5, %vm575_vm15  ;;  %v718_v25 = vld [vmem:[#allocation2 + $0xa0] sm:$0xff] }
  0xf1   :  { %v552_v5 = vsel %vm5075_vm13, %v551_v53, %v547_v26  ;;  %v587_v20 = vmul.f32 %v5109_v63, %v586_v45  ;;  %v600_v38 = vmul.f32 %v5144_v43, %v5045_v21  ;;  %v616_v34 = vmul.f32 %v417_v52, %v4926_v28  ;;  %vm591_vm12 = vmor %vm589_vm7, %vm590_vm11 }
  0xf2   :  { %v562_v42 = vsel %vm561_vm1, %v5083_v9, %v558_v56  ;;  %v573_v46 = vadd.f32 %v5101_v13, %v572_v50  ;;  %v625_v53 = vmul.f32 %v552_v5, %v4929_v29  ;;  %v596_v9 = vor.u32 1.1754944e-38, %v595_v62 }
  0xf3   :  { %v567_v59 = vsel %vm5094_vm4, %v566_v12, %v562_v42  ;;  %v588_v24 = vadd.f32 %v5109_v63, %v587_v20  ;;  %v601_v14 = vsub.f32 1.0, %v600_v38  ;;  %vm7895_vm13 = vcmask 261120  }
  0xf4   :  { %v577_v28 = vsel %vm576_vm3, %v5101_v13, %v573_v46  ;;  %v626_v29 = vmul.f32 %v567_v59, %v4934_v31  ;;  %684 = vst.msk [vmem:[#allocation2 + $0x31] sm:$0xff] %vm7895_vm13, %v616_v34  ;;  %vm7896_vm4 = vmmov %vm7895_vm13  ;;  %vm5214_vm5 = vcmp.eq.f32.partialorder %v608_v55, 8.507059e+37  ;;  %v611_v62 = vor.u32 1.1754944e-38, %v610_v40 }
  0xf5   :  { %v582_v3 = vsel %vm5114_vm8, %v581_v32, %v577_v28  ;;  %v592_v12 = vsel %vm591_vm12, %v5109_v63, %v588_v24  ;;  %v602_v13 = vmul.f32 %v5144_v43, %v601_v14  ;;  %693 = vst.msk [vmem:[#allocation2 + $0xe1] sm:$0xff] %vm7896_vm4, %v625_v53  ;;  %vm7899_vm6 = vmmov %vm7896_vm4  ;;  %v1201_v17 = vshrl.u32 %v5038_v54, 16  ;;  %v4459_v27 = vpop.eup %4458 }
  0xf6   :  { %v597_v31 = vsel %vm5125_vm2, %v596_v9, %v592_v12  ;;  %v627_v33 = vmul.f32 %v582_v3, %v4937_v35  ;;  %694 = vst.msk [vmem:[#allocation2 + $0xf1] sm:$0xff] %vm7899_vm6, %v626_v29  ;;  %v5226_v55 = vadd.f32 1.0, %v5071_v44  ;;  %vm606_vm2 = vmor %vm604_vm0, %vm605_vm14  ;;  %v699_v35 = vld [vmem:[#allocation2 + $0x8] sm:$0x3]  ;;  %v5231_v0 = vpack.c.bf16 %v698_v2, %v698_v2 }
  0xf7   :  { %v603_v32 = vadd.f32 %v5144_v43, %v602_v13  ;;  %v628_v63 = vmul.f32 %v597_v31, %v4940_v36  ;;  %vm7900_vm7 = vmmov %vm7896_vm4  ;;  %v1205_v8 = vrot.slane %v1203_v39, 1  ;;  %v443_v36 = vand.u32 2147483647, %v5158_v47 }
  0xf8   :  { %695 = vst.msk [vmem:[#allocation2 + $0x101] sm:$0xff] %vm7900_vm7, %v627_v33  ;;  %v5236_v11 = vadd.f32 %v4898_v7, %v5029_v6  ;;  %vm7901_vm8 = vmmov %vm7896_vm4  ;;  %v739_v44 = vpack.c.bf16 %v699_v35, %v699_v35  ;;  %4460 = vrcp.f32 %v5226_v55  ;;  %v5242_v21 = vadd.f32 1.0, %v5089_v58 }
  0xf9   :  { %v607_v22 = vsel %vm606_vm2, %v5144_v43, %v603_v32  ;;  %696 = vst.msk [vmem:[#allocation2 + $0x111] sm:$0xff] %vm7901_vm8, %v628_v63  ;;  %v810_v40 = vunpack.c.l.b16 %v5231_v0  ;;  %v5249_v6 = vpack.c.bf16 %v718_v25, %v718_v25  ;;  %v4361_v43 = vld [vmem:[%s7841_s5 + $0x80] sm:$0xff]  ;;  %4462 = vpow2.f32 %v5041_v19  ;;  %vm7902_vm0 = vmmov %vm7896_vm4 }
  0xfa   :  { %v612_v30 = vsel %vm5214_vm5, %v611_v62, %v607_v22  ;;  %v811_v61 = vunpack.c.l.b16 %v739_v44  ;;  %v435_v45 = vmul.f32 %v4459_v27, %v5158_v47  ;;  %v5259_v52 = vmul.f32 %v4865_v23, %v5021_v1  ;;  %1867 = vmatpush.bf16.msra.mxu3 %v4361_v43  ;;  %v719_v1 = vld [vmem:[#allocation2 + $0xa8] sm:$0x3]  ;;  %vm7907_vm14 = vmmov %vm7902_vm0 }
  0xfb   :  { %v629_v58 = vmul.f32 %v612_v30, %v4943_v37  ;;  %v5263_v26 = vmul.f32 %v4865_v23, %v5024_v16  ;;  %v445_v56 = vand.u32 2147483648, %v5158_v47  ;;  %v4074_v50 = vmul.f32 -1.442695, %v5236_v11  ;;  %v704_v53 = vld [vmem:[#allocation2 + $0x30] sm:$0xff]  ;;  %v705_v31 = vld [vmem:[#allocation2 + $0x38] sm:$0x3]  ;;  %vm7908_vm2 = vmmov %vm7902_vm0 }
  0xfc   :  { %v842_v19 = vpack.c.b16 %v811_v61, %v810_v40  ;;  %v436_v37 = vsub.f32 1.0, %v435_v45  ;;  %v398_v5 = vand.u32 2147483647, %v5226_v55  ;;  %4464 = vrcp.f32 %v5242_v21  ;;  %vm7909_vm8 = vmmov %vm7902_vm0 }
  0xfd   :  { %697 = vst.msk [vmem:[#allocation2 + $0x121] sm:$0xff] %vm7902_vm0, %v629_v58  ;;  %v1206_v20 = vor.u32 %v1205_v8, %v1201_v17  ;;  %v826_v38 = vunpack.c.l.b16 %v5249_v6  ;;  %vm439_vm9 = vweird.f32 %v5158_v47  ;;  %vm5272_vm10 = vcmp.eq.f32.partialorder %v443_v36, 8.507059e+37 }
  0xfe   :  { %v4461_v16 = vpop.eup %4460  ;;  %v1002_v41 = vrot.slane %v842_v19, 1  ;;  %v859_v42 = vshrl.u32 %v842_v19, 16  ;;  %v861_v46 = vshll.u32 %v842_v19, 16  ;;  %v759_v34 = vpack.c.bf16 %v719_v1, %v719_v1 }
  0xff   :  { %v4463_v59 = vpop.eup %4462  ;;  %v437_v24 = vmul.f32 %v4459_v27, %v436_v37  ;;  %vm440_vm15 = vweird.f32 %v4459_v27  ;;  %v446_v9 = vor.u32 1.1754944e-38, %v445_v56  ;;  %v390_v14 = vmul.f32 %v4461_v16, %v5226_v55 }
 0x100   :  { %1018 = vrot.lane.b32.xlu2 %v1002_v41, %s4578_s3  ;;  %v863_v28 = vrot.slane %v861_v46, 1  ;;  %v827_v29 = vunpack.c.l.b16 %v759_v34  ;;  %vm394_vm1 = vweird.f32 %v5226_v55  ;;  %vm5279_vm11 = vcmp.eq.f32.partialorder %v398_v5, 8.507059e+37  ;;  %vm441_vm3 = vmor %vm439_vm9, %vm440_vm15 }
 0x101   :  { %v438_v3 = vadd.f32 %v4459_v27, %v437_v24  ;;  %v391_v12 = vsub.f32 1.0, %v390_v14  ;;  %v400_v13 = vand.u32 2147483648, %v5226_v55  ;;  %v5284_v4 = vpack.c.bf16 %v704_v53, %v704_v53 }
 0x102   :  { %v4465_v62 = vpop.eup %4464  ;;  %v864_v33 = vor.u32 %v863_v28, %v859_v42  ;;  %v5286_v32 = vpack.c.b16 %v827_v29, %v826_v38  ;;  %v5291_v63 = vadd.f32 1.0, %v4463_v59  ;;  %4466 = vpow2.f32 %v4074_v50 }
 0x103   :  { %v442_v2 = vsel %vm441_vm3, %v4459_v27, %v438_v3  ;;  %v392_v17 = vmul.f32 %v4461_v16, %v391_v12  ;;  %vm395_vm12 = vweird.f32 %v4461_v16  ;;  %v465_v35 = vmul.f32 %v4465_v62, %v5242_v21  ;;  %vm7913_vm3 = vmmov %vm7908_vm2 }
 0x104   :  { %970 = vrot.lane.b32.xlu0 %v864_v33, %s4579_s30  ;;  %v915_v8 = vshrl.u32 %v5286_v32, 16  ;;  %v917_v36 = vshll.u32 %v5286_v32, 16  ;;  %v447_v22 = vsel %vm5272_vm10, %v446_v9, %v442_v2  ;;  %v745_v47 = vpack.c.bf16 %v705_v31, %v705_v31  ;;  %vm396_vm13 = vmor %vm394_vm1, %vm395_vm12 }
 0x105   :  { %v618_v44 = vmul.f32 %v447_v22, %v4964_v51  ;;  %v393_v25 = vadd.f32 %v4461_v16, %v392_v17  ;;  %v466_v30 = vsub.f32 1.0, %v465_v35  ;;  %v475_v27 = vand.u32 2147483648, %v5242_v21 }
 0x106   :  { %v919_v40 = vrot.slane %v917_v36, 1  ;;  %v401_v43 = vor.u32 1.1754944e-38, %v400_v13  ;;  %v5304_v58 = vunpack.c.l.b16 %v5284_v4  ;;  %4468 = vrcp.f32 %v5291_v63 }
 0x107   :  { %686 = vst.msk [vmem:[#allocation2 + $0x51] sm:$0xff] %vm7907_vm14, %v618_v44  ;;  %v397_v61 = vsel %vm396_vm13, %v4461_v16, %v393_v25  ;;  %v467_v45 = vmul.f32 %v4465_v62, %v466_v30  ;;  %vm470_vm4 = vweird.f32 %v4465_v62  ;;  %v473_v51 = vand.u32 2147483647, %v5242_v21  ;;  %vm7914_vm14 = vmmov %vm7908_vm2 }
 0x108   :  { %v4467_v56 = vpop.eup %4466  ;;  %1228 = vrot.lane.b32.xlu2 %v1206_v20, %s4580_s13  ;;  %v920_v50 = vor.u32 %v919_v40, %v915_v8  ;;  %v402_v55 = vsel %vm5279_vm11, %v401_v43, %v397_v61  ;;  %v817_v19 = vunpack.c.l.b16 %v745_v47  ;;  %v5314_v37 = vadd.f32 %v4898_v7, %v5259_v52 }
 0x109   :  { %v615_v5 = vmul.f32 %v402_v55, %v4977_v57  ;;  %v468_v1 = vadd.f32 %v4465_v62, %v467_v45  ;;  %vm469_vm5 = vweird.f32 %v5242_v21  ;;  %v476_v38 = vor.u32 1.1754944e-38, %v475_v27 }
 0x10a   :  { %vm471_vm6 = vmor %vm469_vm5, %vm470_vm4  ;;  %v5318_v23 = vadd.f32 1.0, %v4467_v56  ;;  %v4064_v20 = vmul.f32 -1.442695, %v5314_v37  ;;  %v5323_v16 = vadd.f32 %v4898_v7, %v5263_v26  ;;  %v5327_v41 = vadd.f32 %v4898_v7, %v4904_v10 }
 0x10b   :  { %683 = vst.msk [vmem:[#allocation2 + $0x21] sm:$0xff] %vm7908_vm2, %v615_v5  ;;  %v472_v57 = vsel %vm471_vm6, %v4465_v62, %v468_v1  ;;  %vm474_vm7 = vcmp.eq.f32.partialorder %v473_v51, 8.507059e+37  ;;  %v5332_v21 = vadd.f32 %v4898_v7, %v4910_v15  ;;  %v5336_v52 = vadd.f32 %v4898_v7, %v4913_v18  ;;  %vm7915_vm4 = vmmov %vm7908_vm2 }
 0x10c   :  { %v4469_v42 = vpop.eup %4468  ;;  %v1010_v26 = vrot.slane %v5286_v32, 1  ;;  %986 = vrot.lane.b32.xlu0 %v920_v50, %s4579_s30  ;;  %v5341_v10 = vpack.c.b16 %v817_v19, %v5304_v58  ;;  %v477_v46 = vsel %vm474_vm7, %v476_v38, %v472_v57  ;;  %4470 = vrcp.f32 %v5318_v23 }
 0x10d   :  { %v620_v34 = vmul.f32 %v477_v46, %v4986_v60  ;;  %v420_v15 = vmul.f32 %v4469_v42, %v5291_v63  ;;  %v428_v59 = vand.u32 2147483647, %v5291_v63  ;;  %4472 = vpow2.f32 %v4064_v20 }
 0x10e   :  { %v708_v53 = vld [vmem:[#allocation2 + $0x50] sm:$0xff]  ;;  %v4069_v7 = vmul.f32 -1.442695, %v5323_v16  ;;  %v709_v9 = vld [vmem:[#allocation2 + $0x58] sm:$0x3]  ;;  %v5353_v14 = vrot.slane %v5341_v10, 1  ;;  %vm424_vm0 = vweird.f32 %v5291_v63  ;;  %vm425_vm9 = vweird.f32 %v4469_v42 }
 0x10f   :  { %v5348_v18 = vpack.c.bf16 %v708_v53, %v708_v53  ;;  %688 = vst.msk [vmem:[#allocation2 + $0x71] sm:$0xff] %vm7909_vm8, %v620_v34  ;;  %v421_v24 = vsub.f32 1.0, %v420_v15  ;;  %v430_v60 = vand.u32 2147483648, %v5291_v63  ;;  %v4071_v39 = vmul.f32 -1.442695, %v5327_v41  ;;  %vm426_vm15 = vmor %vm424_vm0, %vm425_vm9 }
 0x110   :  { %1034 = vrot.lane.b32.xlu2 %v1010_v26, %s4578_s3  ;;  %vm5359_vm10 = vcmp.eq.f32.partialorder %v428_v59, 8.507059e+37  ;;  %4474 = vpow2.f32 %v4069_v7  ;;  %v4072_v62 = vmul.f32 -1.442695, %v5332_v21  ;;  %v749_v33 = vpack.c.bf16 %v709_v9, %v709_v9 }
 0x111   :  { %v820_v28 = vunpack.c.l.b16 %v5348_v18  ;;  %v422_v29 = vmul.f32 %v4469_v42, %v421_v24  ;;  %v431_v36 = vor.u32 1.1754944e-38, %v430_v60  ;;  %v533_v47 = vand.u32 2147483647, %v5318_v23 }
 0x112   :  { %v4471_v3 = vpop.eup %4470  ;;  %v702_v12 = vld [vmem:[#allocation2 + $0x20] sm:$0xff]  ;;  %v703_v13 = vld [vmem:[#allocation2 + $0x28] sm:$0x3]  ;;  %4476 = vpow2.f32 %v4071_v39  ;;  %v535_v61 = vand.u32 2147483648, %v5318_v23  ;;  %v821_v45 = vunpack.c.l.b16 %v749_v33  ;;  %v1511_v1 = vunpack.c.l.b16 %v5353_v14 }
 0x113   :  { %v5364_v32 = vpack.c.b16 %v820_v28, %v820_v28  ;;  %v5366_v2 = vpack.c.bf16 %v702_v12, %v702_v12  ;;  %v743_v17 = vpack.c.bf16 %v703_v13, %v703_v13  ;;  %v4473_v35 = vpop.eup %4472  ;;  %v423_v8 = vadd.f32 %v4469_v42, %v422_v29 }
 0x114   :  { %v525_v22 = vmul.f32 %v4471_v3, %v5318_v23  ;;  %v5376_v30 = vadd.f32 1.0, %v4473_v35  ;;  %4478 = vpow2.f32 %v4072_v62  ;;  %vm530_vm1 = vweird.f32 %v4471_v3 }
 0x115   :  { %1168 = vrot.lane.b32.xlu0 %v5364_v32, %s4578_s3  ;;  %v814_v44 = vunpack.c.l.b16 %v5366_v2  ;;  %v815_v25 = vunpack.c.l.b16 %v743_v17  ;;  %v427_v40 = vsel %vm426_vm15, %v4469_v42, %v423_v8  ;;  %vm529_vm11 = vweird.f32 %v5318_v23  ;;  %vm7921_vm15 = vmmov %vm7913_vm3 }
 0x116   :  { %v712_v27 = vld [vmem:[#allocation2 + $0x70] sm:$0xff]  ;;  %v526_v43 = vsub.f32 1.0, %v525_v22  ;;  %v4475_v55 = vpop.eup %4474  ;;  %v432_v63 = vsel %vm5359_vm10, %v431_v36, %v427_v40  ;;  %4480 = vrcp.f32 %v5376_v30  ;;  %v536_v42 = vor.u32 1.1754944e-38, %v535_v61  ;;  %vm531_vm12 = vmor %vm529_vm11, %vm530_vm1  ;;  %v5412_v60 = vld [vmem:[#allocation2 + $0x78] sm:$0x3] }
 0x117   :  { %v1055_v51 = vpack.c.b16 %v814_v44, %v814_v44  ;;  %v5379_v56 = vpack.c.b16 %v815_v25, %v814_v44  ;;  %v5381_v50 = vpack.c.bf16 %v712_v27, %v712_v27  ;;  %v617_v20 = vmul.f32 %v432_v63, %v5013_v49 }
 0x118   :  { %v527_v19 = vmul.f32 %v4471_v3, %v526_v43  ;;  %v4477_v26 = vpop.eup %4476  ;;  %v5404_v15 = vadd.f32 1.0, %v4475_v55  ;;  %v4073_v53 = vmul.f32 -1.442695, %v5336_v52  ;;  %v5407_v59 = vpack.c.b16 %v821_v45, %v820_v28 }
 0x119   :  { %7912 = vst [vmem:[#allocation4_spill] sm:$0xff] %v5381_v50  ;;  %1072 = vrot.lane.b32.xlu2 %v1055_v51, %s4580_s13  ;;  %1162 = vrot.lane.b32.xlu1 %v1055_v51, %s4578_s3  ;;  %v5389_v5 = vrot.slane %v5379_v56, 1  ;;  %v5393_v38 = vunpack.c.l.b16 %v5381_v50  ;;  %vm534_vm13 = vcmp.eq.f32.partialorder %v533_v47, 8.507059e+37  ;;  %v383_v39 = vand.u32 2147483647, %v5376_v30 }
 0x11a   :  { %v528_v57 = vadd.f32 %v4471_v3, %v527_v19  ;;  %685 = vst.msk [vmem:[#allocation2 + $0x41] sm:$0xff] %vm7913_vm3, %v617_v20  ;;  %v4479_v49 = vpop.eup %4478  ;;  %4482 = vrcp.f32 %v5404_v15  ;;  %v5416_v12 = vadd.f32 1.0, %v4477_v26  ;;  %v5421_v28 = vpack.c.b16 %v5304_v58, %v5304_v58 }
 0x11b   :  { %v1508_v46 = vunpack.c.l.b16 %v5389_v5  ;;  %v5400_v34 = vpack.c.b16 %v5393_v38, %v5393_v38  ;;  %v5424_v13 = vadd.f32 1.0, %v4479_v49  ;;  %4484 = vpow2.f32 %v4073_v53 }
 0x11c   :  { %v532_v23 = vsel %vm531_vm12, %v4471_v3, %v528_v57  ;;  %v4481_v9 = vpop.eup %4480  ;;  %v385_v31 = vand.u32 2147483648, %v5376_v30  ;;  %4486 = vrcp.f32 %v5416_v12  ;;  %v753_v62 = vpack.c.bf16 %v5412_v60, %v5412_v60 }
 0x11d   :  { %v1592_v7 = vpack.c.b16 %v1511_v1, %v1508_v46  ;;  %1172 = vrot.lane.b32.xlu0 %v5400_v34, %s4578_s3  ;;  %v537_v24 = vsel %vm534_vm13, %v536_v42, %v532_v23  ;;  %v375_v3 = vmul.f32 %v4481_v9, %v5376_v30  ;;  %v458_v33 = vand.u32 2147483647, %v5404_v15  ;;  %vm7922_vm13 = vmmov %vm7915_vm4 }
 0x11e   :  { %v624_v29 = vmul.f32 %v537_v24, %v5236_v11  ;;  %v5429_v11 = vrot.slane %v5407_v59, 1  ;;  %vm379_vm5 = vweird.f32 %v5376_v30  ;;  %vm5438_vm6 = vcmp.eq.f32.partialorder %v383_v39, 8.507059e+37 }
 0x11f   :  { %4152 = vmatmul.msk.bf16.vlgmr.msra.gmra.mxu3 %vm7914_vm14, %v1592_v7  ;;  %v376_v58 = vsub.f32 1.0, %v375_v3  ;;  %v460_v36 = vand.u32 2147483648, %v5404_v15  ;;  %4488 = vrcp.f32 %v5424_v13  ;;  %vm380_vm2 = vweird.f32 %v4481_v9 }
 0x120   :  { %692 = vst.msk [vmem:[#allocation2 + $0xd1] sm:$0xff] %vm7915_vm4, %v624_v29  ;;  %v4483_v22 = vpop.eup %4482  ;;  %v386_v27 = vor.u32 1.1754944e-38, %v385_v31  ;;  %v1517_v40 = vunpack.c.l.b16 %v5429_v11  ;;  %vm454_vm7 = vweird.f32 %v5404_v15  ;;  %vm5450_vm8 = vcmp.eq.f32.partialorder %v458_v33, 8.507059e+37  ;;  %vm381_vm0 = vmor %vm379_vm5, %vm380_vm2 }
 0x121   :  { %1164 = vrot.lane.b32.xlu1 %v5421_v28, %s4578_s3  ;;  %v706_v17 = vld [vmem:[#allocation2 + $0x40] sm:$0xff]  ;;  %v707_v35 = vld [vmem:[#allocation2 + $0x48] sm:$0x3]  ;;  %v377_v25 = vmul.f32 %v4481_v9, %v376_v58  ;;  %v450_v43 = vmul.f32 %v4483_v22, %v5404_v15  ;;  %v4485_v61 = vpop.eup %4484  ;;  %v461_v20 = vor.u32 1.1754944e-38, %v460_v36  ;;  %vm484_vm9 = vweird.f32 %v5416_v12 }
 0x122   :  { %v5444_v47 = vpack.c.bf16 %v706_v17, %v706_v17  ;;  %v747_v44 = vpack.c.bf16 %v707_v35, %v707_v35  ;;  %v4487_v19 = vpop.eup %4486  ;;  %v488_v57 = vand.u32 2147483647, %v5416_v12  ;;  %vm455_vm10 = vweird.f32 %v4483_v22 }
 0x123   :  { %v378_v55 = vadd.f32 %v4481_v9, %v377_v25  ;;  %v451_v1 = vsub.f32 1.0, %v450_v43  ;;  %v480_v49 = vmul.f32 %v4487_v19, %v5416_v12  ;;  %v5470_v31 = vadd.f32 1.0, %v4485_v61  ;;  %vm456_vm1 = vmor %vm454_vm7, %vm455_vm10 }
 0x124   :  { %v818_v45 = vunpack.c.l.b16 %v5444_v47  ;;  %v819_v51 = vunpack.c.l.b16 %v747_v44  ;;  %v490_v33 = vand.u32 2147483648, %v5416_v12  ;;  %vm485_vm11 = vweird.f32 %v4487_v19  ;;  %vm7923_vm7 = vmmov %vm7915_vm4 }
 0x125   :  { %v382_v53 = vsel %vm381_vm0, %v4481_v9, %v378_v55  ;;  %v4489_v23 = vpop.eup %4488  ;;  %v452_v24 = vmul.f32 %v4483_v22, %v451_v1  ;;  %v481_v3 = vsub.f32 1.0, %v480_v49  ;;  %v503_v8 = vand.u32 2147483647, %v5424_v13  ;;  %vm486_vm3 = vmor %vm484_vm9, %vm485_vm11 }
 0x126   :  { %v5458_v42 = vpack.c.b16 %v819_v51, %v818_v45  ;;  %v1057_v26 = vpack.c.b16 %v818_v45, %v818_v45  ;;  %v387_v30 = vsel %vm5438_vm6, %v386_v27, %v382_v53  ;;  %v495_v17 = vmul.f32 %v4489_v23, %v5424_v13 }
 0x127   :  { %v724_v46 = vld [vmem:[#allocation2 + $0xd0] sm:$0xff]  ;;  %v614_v29 = vmul.f32 %v387_v30, %v5314_v37  ;;  %v453_v58 = vadd.f32 %v4483_v22, %v452_v24  ;;  %v482_v37 = vmul.f32 %v4487_v19, %v481_v3  ;;  %v505_v27 = vand.u32 2147483648, %v5424_v13 }
 0x128   :  { %v5461_v7 = vpack.c.bf16 %v724_v46, %v724_v46  ;;  %1166 = vrot.lane.b32.xlu2 %v1057_v26, %s4578_s3  ;;  %v5468_v39 = vrot.slane %v5458_v42, 1  ;;  %v496_v25 = vsub.f32 1.0, %v495_v17  ;;  %4490 = vrcp.f32 %v5470_v31 }
 0x129   :  { %682 = vst.msk [vmem:[#allocation2 + $0x11] sm:$0xff] %vm7921_vm15, %v614_v29  ;;  %v457_v44 = vsel %vm456_vm1, %v4483_v22, %v453_v58  ;;  %v483_v45 = vadd.f32 %v4487_v19, %v482_v37  ;;  %v491_v51 = vor.u32 1.1754944e-38, %v490_v33  ;;  %vm500_vm12 = vweird.f32 %v4489_v23  ;;  %vm7926_vm1 = vmmov %vm7915_vm4 }
 0x12a   :  { %7920 = vst [vmem:[#allocation5_spill] sm:$0xff] %v5461_v7  ;;  %v5473_v9 = vunpack.c.l.b16 %v5461_v7  ;;  %v1514_v35 = vunpack.c.l.b16 %v5468_v39  ;;  %v462_v61 = vsel %vm5450_vm8, %v461_v20, %v457_v44  ;;  %v497_v22 = vmul.f32 %v4489_v23, %v496_v25  ;;  %vm7924_vm8 = vmmov %vm7915_vm4 }
 0x12b   :  { %v619_v15 = vmul.f32 %v462_v61, %v5323_v16  ;;  %vm489_vm14 = vcmp.eq.f32.partialorder %v488_v57, 8.507059e+37  ;;  %vm499_vm5 = vweird.f32 %v5424_v13  ;;  %v825_v16 = vunpack.c.l.b16 %v753_v62  ;;  %vm7927_vm11 = vmmov %vm7926_vm1 }
 0x12c   :  { %v5484_v36 = vpack.c.b16 %v5473_v9, %v5473_v9  ;;  %v1595_v43 = vpack.c.b16 %v1517_v40, %v1514_v35  ;;  %v487_v40 = vsel %vm486_vm3, %v4487_v19, %v483_v45  ;;  %v498_v63 = vadd.f32 %v4489_v23, %v497_v22  ;;  %vm501_vm6 = vmor %vm499_vm5, %vm500_vm12 }
 0x12d   :  { %687 = vst.msk [vmem:[#allocation2 + $0x61] sm:$0xff] %vm7915_vm4, %v619_v15  ;;  %v492_v55 = vsel %vm489_vm14, %v491_v51, %v487_v40  ;;  %v506_v1 = vor.u32 1.1754944e-38, %v505_v27  ;;  %vm504_vm2 = vcmp.eq.f32.partialorder %v503_v8, 8.507059e+37  ;;  %v518_v33 = vand.u32 2147483647, %v5470_v31  ;;  %vm7930_vm3 = vmmov %vm7926_vm1 }
 0x12e   :  { %1180 = vrot.lane.b32.xlu0 %v5484_v36, %s4578_s3  ;;  %v621_v12 = vmul.f32 %v492_v55, %v5327_v41  ;;  %v502_v19 = vsel %vm501_vm6, %v4489_v23, %v498_v63  ;;  %v4491_v57 = vpop.eup %4490  ;;  %vm514_vm9 = vweird.f32 %v5470_v31  ;;  %vm7933_vm12 = vmmov %vm7926_vm1  ;;  %vm1296_vm5 = vcmask 523264  }
 0x12f   :  { %4153 = vmatmul.msk.bf16.gmra.mxu3 %vm7922_vm13, %v1595_v43  ;;  %v507_v13 = vsel %vm504_vm2, %v506_v1, %v502_v19  ;;  %v510_v62 = vmul.f32 %v4491_v57, %v5470_v31  ;;  %vm515_vm0 = vweird.f32 %v4491_v57  ;;  %vm519_vm15 = vcmp.eq.f32.partialorder %v518_v33, 8.507059e+37  ;;  %vm7936_vm13 = vmmov %vm7926_vm1 }
 0x130   :  { %1076 = vrot.lane.b32.xlu2 %v1057_v26, %s4580_s13  ;;  %v700_v20 = vld [vmem:[#allocation2 + $0x10] sm:$0xff]  ;;  %v701_v46 = vld [vmem:[#allocation2 + $0x18] sm:$0x3]  ;;  %689 = vst.msk [vmem:[#allocation2 + $0x81] sm:$0xff] %vm7923_vm7, %v621_v12  ;;  %v622_v60 = vmul.f32 %v507_v13, %v5332_v21  ;;  %v5509_v26 = vpack.c.b16 %v825_v16, %v5393_v38  ;;  %v520_v21 = vand.u32 2147483648, %v5470_v31  ;;  %vm516_vm10 = vmor %vm514_vm9, %vm515_vm0  ;;  %vm1329_vm7 = vcmask 785408  }
 0x131   :  { %v5503_v53 = vpack.c.bf16 %v700_v20, %v700_v20  ;;  %v741_v49 = vpack.c.bf16 %v701_v46, %v701_v46  ;;  %v511_v23 = vsub.f32 1.0, %v510_v62  ;;  %vm7937_vm14 = vmmov %vm7926_vm1 }
 0x132   :  { %690 = vst.msk [vmem:[#allocation2 + $0xb1] sm:$0xff] %vm7924_vm8, %v622_v60  ;;  %v5522_v8 = vrot.slane %v5509_v26, 1  ;;  %v521_v45 = vor.u32 1.1754944e-38, %v520_v21  ;;  %vm7938_vm4 = vmmov %vm7926_vm1 }
 0x133   :  { %v812_v41 = vunpack.c.l.b16 %v5503_v53  ;;  %v813_v30 = vunpack.c.l.b16 %v741_v49  ;;  %v512_v38 = vmul.f32 %v4491_v57, %v511_v23  ;;  %vm7940_vm6 = vmmov %vm7926_vm1 }
 0x134   :  { %v710_v3 = vld [vmem:[#allocation2 + $0x60] sm:$0xff]  ;;  %v711_v58 = vld [vmem:[#allocation2 + $0x68] sm:$0x3]  ;;  %v1523_v40 = vunpack.c.l.b16 %v5522_v8  ;;  %vm7942_vm2 = vmmov %vm7926_vm1 }
 0x135   :  { %v1054_v24 = vpack.c.b16 %v812_v41, %v812_v41  ;;  %v5513_v29 = vpack.c.b16 %v813_v30, %v812_v41  ;;  %v5517_v17 = vpack.c.bf16 %v710_v3, %v710_v3  ;;  %v751_v35 = vpack.c.bf16 %v711_v58, %v711_v58  ;;  %vm7945_vm8 = vmmov %vm7926_vm1 }
 0x136   :  { %v513_v27 = vadd.f32 %v4491_v57, %v512_v38  ;;  %vm7948_vm0 = vmmov %vm7926_vm1 }
 0x137   :  { %7925 = vst [vmem:[#allocation6_spill] sm:$0xff] %v5517_v17  ;;  %1070 = vrot.lane.b32.xlu1 %v1054_v24, %s4580_s13  ;;  %v1003_v37 = vrot.slane %v5513_v29, 1  ;;  %v822_v44 = vunpack.c.l.b16 %v5517_v17  ;;  %v823_v25 = vunpack.c.l.b16 %v751_v35  ;;  %v714_v43 = vld [vmem:[#allocation2 + $0x80] sm:$0xff]  ;;  %v715_v61 = vld [vmem:[#allocation2 + $0x88] sm:$0x3]  ;;  %vm7951_vm9 = vmmov %vm7948_vm0 }
 0x138   :  { %v517_v22 = vsel %vm516_vm10, %v4491_v57, %v513_v27  ;;  %v754_v31 = vpack.c.bf16 %v714_v43, %v714_v43  ;;  %v755_v16 = vpack.c.bf16 %v715_v61, %v715_v61  ;;  %v726_v61 = vld [vmem:[#allocation2 + $0xe0] sm:$0xff]  ;;  %vm7952_vm10 = vmmov %vm7948_vm0 }
 0x139   :  { %1124 = vrot.lane.b32.xlu0 %v1003_v37, %s4579_s30  ;;  %v5527_v15 = vpack.c.b16 %v823_v25, %v822_v44  ;;  %v1059_v51 = vpack.c.b16 %v822_v44, %v822_v44  ;;  %v522_v55 = vsel %vm519_vm15, %v521_v45, %v517_v22  ;;  %v720_v41 = vld [vmem:[#allocation2 + $0xb0] sm:$0xff]  ;;  %v727_v25 = vld [vmem:[#allocation2 + $0xe8] sm:$0x3]  ;;  %vm7953_vm15 = vmmov %vm7948_vm0 }
 0x13a   :  { %v623_v12 = vmul.f32 %v522_v55, %v5336_v52  ;;  %v1052_v46 = vunpack.c.l.b16 %v754_v31  ;;  %v1104_v19 = vunpack.c.l.b16 %v755_v16  ;;  %v725_v52 = vld [vmem:[#allocation2 + $0xd8] sm:$0x3]  ;;  %v5555_v58 = vpack.c.bf16 %v720_v41, %v720_v41  ;;  %v728_v45 = vld [vmem:[#allocation2 + $0xf0] sm:$0xff] }
 0x13b   :  { %1170 = vrot.lane.b32.xlu2 %v1059_v51, %s4578_s3  ;;  %v5532_v63 = vrot.slane %v5527_v15, 1  ;;  %v765_v30 = vpack.c.bf16 %v725_v52, %v725_v52  ;;  %v767_v55 = vpack.c.bf16 %v727_v25, %v727_v25  ;;  %v5587_v31 = vpack.c.bf16 %v728_v45, %v728_v45  ;;  %v5635_v45 = vpop.permute.xlu0 %1176 }
 0x13c   :  { %691 = vst.msk [vmem:[#allocation2 + $0xc1] sm:$0xff] %vm7926_vm1, %v623_v12  ;;  %v5543_v57 = vpack.c.b16 %v1104_v19, %v1052_v46  ;;  %v1061_v62 = vpack.c.b16 %v1052_v46, %v1052_v46  ;;  %v5561_v38 = vunpack.c.l.b16 %v5555_v58  ;;  %vm7955_vm1 = vmmov %vm7948_vm0 }
 0x13d   :  { %v1520_v1 = vunpack.c.l.b16 %v5532_v63  ;;  %7929 = vst [vmem:[#allocation8_spill] sm:$0xff] %v5555_v58  ;;  %v5598_v46 = vunpack.c.l.b16 %v5587_v31 }
 0x13e   :  { %v1122_v49 = vrot.slane %v5543_v57, 1  ;;  %7932 = vst [vmem:[#allocation10_spill] sm:$0xff] %v5587_v31  ;;  %v866_v31 = vshrl.u32 %v5513_v29, 16 }
 0x13f   :  { %1074 = vrot.lane.b32.xlu1 %v5421_v28, %s4580_s13  ;;  %v1598_v20 = vpack.c.b16 %v1523_v40, %v1520_v1  ;;  %v1246_v28 = vrot.slane %v5038_v54, 1  ;;  %v833_v54 = vunpack.c.l.b16 %v765_v30  ;;  %v5585_v40 = vpack.c.bf16 %v726_v61, %v726_v61  ;;  %v730_v30 = vld [vmem:[#allocation2 + $0x100] sm:$0xff] }
 0x140   :  { %v1526_v23 = vunpack.c.l.b16 %v1122_v49 }
 0x141   :  { %1126 = vrot.lane.b32.xlu0 %v5389_v5, %s4579_s30  ;;  %4154 = vmatmul.msk.bf16.gmra.mxu3 %vm7927_vm11, %v1598_v20  ;;  %v1529_v24 = vunpack.c.l.b16 %v1246_v28  ;;  %7931 = vst [vmem:[#allocation9_spill] sm:$0xff] %v5585_v40  ;;  %v835_v20 = vunpack.c.l.b16 %v767_v55  ;;  %vm7956_vm11 = vmmov %vm7948_vm0 }
 0x143   :  { %1080 = vrot.lane.b32.xlu2 %v1059_v51, %s4580_s13  ;;  %v722_v13 = vld [vmem:[#allocation2 + $0xc0] sm:$0xff]  ;;  %v723_v60 = vld [vmem:[#allocation2 + $0xc8] sm:$0x3]  ;;  %v1601_v33 = vpack.c.b16 %v1529_v24, %v1526_v23  ;;  %v732_v24 = vld [vmem:[#allocation2 + $0x110] sm:$0xff] }
 0x144   :  { %v5553_v3 = vpack.c.bf16 %v722_v13, %v722_v13  ;;  %v731_v23 = vld [vmem:[#allocation2 + $0x108] sm:$0x3] }
 0x146   :  { %7928 = vst [vmem:[#allocation7_spill] sm:$0xff] %v5553_v3  ;;  %v830_v21 = vunpack.c.l.b16 %v5553_v3 }
 0x147   :  { %1078 = vrot.lane.b32.xlu1 %v5364_v32, %s4580_s13  ;;  %v763_v32 = vpack.c.bf16 %v723_v60, %v723_v60 }
 0x148   :  { %v1063_v51 = vpack.c.b16 %v830_v21, %v830_v21 }
 0x149   :  { %1020 = vrot.lane.b32.xlu0 %v1003_v37, %s4578_s3  ;;  %v831_v35 = vunpack.c.l.b16 %v763_v32  ;;  %v5567_v37 = vpack.c.b16 %v833_v54, %v5473_v9  ;;  %v729_v9 = vld [vmem:[#allocation2 + $0xf8] sm:$0x3] }
 0x14a   :  { %v769_v16 = vpack.c.bf16 %v729_v9, %v729_v9  ;;  %v733_v32 = vld [vmem:[#allocation2 + $0x118] sm:$0x3] }
 0x14b   :  { %1174 = vrot.lane.b32.xlu2 %v1061_v62, %s4578_s3  ;;  %v5570_v44 = vpack.c.b16 %v831_v35, %v830_v21  ;;  %v5579_v43 = vrot.slane %v5567_v37, 1  ;;  %v5626_v21 = vpack.c.bf16 %v730_v30, %v730_v30  ;;  %v771_v35 = vpack.c.bf16 %v731_v23, %v731_v23  ;;  %v721_v9 = vld [vmem:[#allocation2 + $0xb8] sm:$0x3]  ;;  %v734_v23 = vld [vmem:[#allocation2 + $0x120] sm:$0xff] }
 0x14c   :  { %v837_v19 = vunpack.c.l.b16 %v769_v16  ;;  %v773_v25 = vpack.c.bf16 %v733_v32, %v733_v32  ;;  %v736_v32 = vld [vmem:[#allocation2 + $0x130] sm:$0xff] }
 0x14d   :  { %v5576_v27 = vrot.slane %v5570_v44, 1  ;;  %v1535_v1 = vunpack.c.l.b16 %v5579_v43  ;;  %7934 = vst [vmem:[#allocation11_spill] sm:$0xff] %v5626_v21 }
 0x14e   :  { %v5607_v13 = vpack.c.b16 %v837_v19, %v5598_v46  ;;  %v841_v16 = vunpack.c.l.b16 %v773_v25  ;;  %v774_v25 = vpack.c.bf16 %v734_v23, %v734_v23 }
 0x14f   :  { %1082 = vrot.lane.b32.xlu1 %v5400_v34, %s4580_s13  ;;  %v1062_v34 = vpack.c.b16 %v5561_v38, %v5561_v38  ;;  %v1532_v12 = vunpack.c.l.b16 %v5576_v27 }
 0x150   :  { %v5618_v41 = vrot.slane %v5607_v13, 1  ;;  %v5679_v23 = vunpack.c.l.b16 %v774_v25  ;;  %v950_v58 = vshrl.u32 %v5607_v13, 16 }
 0x151   :  { %1128 = vrot.lane.b32.xlu0 %v5353_v14, %s4579_s30  ;;  %4155 = vmatmul.msk.bf16.gmra.mxu3 %vm7930_vm3, %v1601_v33  ;;  %v1604_v52 = vpack.c.b16 %v1535_v1, %v1532_v12  ;;  %v761_v12 = vpack.c.bf16 %v721_v9, %v721_v9  ;;  %vm7957_vm3 = vmmov %vm7948_vm0 }
 0x152   :  { %v1541_v33 = vunpack.c.l.b16 %v5618_v41 }
 0x153   :  { %1084 = vrot.lane.b32.xlu2 %v1061_v62, %s4580_s13 }
 0x157   :  { %1086 = vrot.lane.b32.xlu1 %v1062_v34, %s4580_s13  ;;  %v5628_v34 = vpack.c.bf16 %v732_v24, %v732_v24 }
 0x159   :  { %1024 = vrot.lane.b32.xlu0 %v5353_v14, %s4578_s3  ;;  %v5595_v14 = vunpack.c.l.b16 %v5585_v40  ;;  %7935 = vst [vmem:[#allocation12_spill] sm:$0xff] %v5628_v34  ;;  %v5641_v55 = vunpack.c.l.b16 %v5628_v34 }
 0x15a   :  { %v5583_v22 = vpop.permute.xlu2 %1018 }
 0x15b   :  { %1178 = vrot.lane.b32.xlu2 %v1063_v51, %s4578_s3  ;;  %v5604_v28 = vpack.c.b16 %v835_v20, %v5595_v14  ;;  %v5652_v1 = vpack.c.b16 %v841_v16, %v5641_v55  ;;  %v829_v20 = vunpack.c.l.b16 %v761_v12  ;;  %v776_v16 = vpack.c.bf16 %v736_v32, %v736_v32 }
 0x15d   :  { %v5615_v62 = vrot.slane %v5604_v28, 1  ;;  %v5662_v30 = vrot.slane %v5652_v1, 1  ;;  %v964_v50 = vshrl.u32 %v5652_v1, 16 }
 0x15f   :  { %1130 = vrot.lane.b32.xlu1 %v5468_v39, %s4579_s30  ;;  %v1538_v54 = vunpack.c.l.b16 %v5615_v62 }
 0x161   :  { %1132 = vrot.lane.b32.xlu0 %v5429_v11, %s4579_s30  ;;  %4156 = vmatmul.msk.bf16.gmra.mxu3 %vm7933_vm12, %v1604_v52  ;;  %vm7958_vm12 = vmmov %vm7948_vm0 }
 0x162   :  { %v5610_v60 = vpop.permute.xlu2 %1228 }
 0x163   :  { %1088 = vrot.lane.b32.xlu2 %v1063_v51, %s4580_s13  ;;  %v5638_v51 = vunpack.c.l.b16 %v5626_v21  ;;  %v5681_v21 = vunpack.c.l.b16 %v776_v16  ;;  %v889_v16 = vshll.u32 %v5458_v42, 16 }
 0x167   :  { %1134 = vrot.lane.b32.xlu1 %v5532_v63, %s4579_s30 }
 0x169   :  { %1028 = vrot.lane.b32.xlu0 %v5429_v11, %s4578_s3  ;;  %v1607_v11 = vpack.c.b16 %v1541_v33, %v1538_v54  ;;  %v737_v54 = vld [vmem:[#allocation2 + $0x138] sm:$0x3]  ;;  %v875_v33 = vshll.u32 %v5379_v56, 16 }
 0x16a   :  { %v5630_v61 = vpop.permute.xlu2 %1034  ;;  %v777_v12 = vpack.c.bf16 %v737_v54, %v737_v54 }
 0x16b   :  { %1022 = vrot.lane.b32.xlu2 %v5389_v5, %s4578_s3  ;;  %v839_v5 = vunpack.c.l.b16 %v771_v35  ;;  %v5668_v35 = vpack.c.b16 %v829_v20, %v5561_v38  ;;  %v877_v48 = vrot.slane %v875_v33, 1  ;;  %v873_v38 = vshrl.u32 %v5379_v56, 16 }
 0x16c   :  { %v1197_v34 = vunpack.c.l.b16 %v777_v12  ;;  %v882_v56 = vshll.u32 %v5341_v10, 16 }
 0x16d   :  { %v1011_v20 = vrot.slane %v5668_v35, 1  ;;  %v5684_v54 = vor.u32 %v877_v48, %v873_v38 }
 0x16e   :  { %v884_v12 = vrot.slane %v882_v56, 1  ;;  %v1065_v56 = vpack.c.b16 %v5595_v14, %v5595_v14 }
 0x16f   :  { %1138 = vrot.lane.b32.xlu1 %v1122_v49, %s4579_s30  ;;  %v5649_v49 = vpack.c.b16 %v839_v5, %v5638_v51  ;;  %v1547_v5 = vunpack.c.l.b16 %v5662_v30 }
 0x171   :  { %1136 = vrot.lane.b32.xlu0 %v5522_v8, %s4579_s30  ;;  %4157 = vmatmul.msk.bf16.gmra.mxu3 %vm7936_vm13, %v1607_v11  ;;  %v5659_v52 = vrot.slane %v5649_v49, 1  ;;  %vm7959_vm13 = vmmov %vm7948_vm0 }
 0x173   :  { %1026 = vrot.lane.b32.xlu2 %v5468_v39, %s4578_s3  ;;  %v5656_v19 = vpop.permute.xlu2 %1072  ;;  %v735_v39 = vld [vmem:[#allocation2 + $0x128] sm:$0x3]  ;;  %v1544_v9 = vunpack.c.l.b16 %v5659_v52 }
 0x174   :  { %v775_v11 = vpack.c.bf16 %v735_v39, %v735_v39 }
 0x175   :  { %v1610_v39 = vpack.c.b16 %v1547_v5, %v1544_v9  ;;  %v5697_v9 = vpack.c.b16 %v1197_v34, %v5681_v21  ;;  %v7939_v34 = vmov 0.0  }
 0x176   :  { %v971_v24 = vpop.permute.xlu0 %970  ;;  %2505 = vst.msk [vmem:[#allocation3] sm:$0xff] %vm1296_vm5, %v7939_v34 }
 0x177   :  { %1142 = vrot.lane.b32.xlu1 %v5576_v27, %s4579_s30  ;;  %v1250_v5 = vsel %vm7938_vm4, %v5231_v0, %v971_v24  ;;  %v1247_v38 = vrot.slane %v5697_v9, 1  ;;  %v891_v0 = vrot.slane %v889_v16, 1  ;;  %2508 = vst.msk [vmem:[#allocation3 + $0xa0] sm:$0xff] %vm1296_vm5, %v7939_v34  ;;  %vm7961_vm4 = vmmov %vm7948_vm0 }
 0x178   :  { %2511 = vst.msk [vmem:[#allocation3 + $0x90] sm:$0xff] %vm1296_vm5, %v7939_v34 }
 0x179   :  { %1032 = vrot.lane.b32.xlu0 %v5522_v8, %s4578_s3  ;;  %v868_v8 = vshll.u32 %v5513_v29, 16  ;;  %v880_v29 = vshrl.u32 %v5341_v10, 16  ;;  %v887_v10 = vshrl.u32 %v5458_v42, 16  ;;  %2513 = vst.msk [vmem:[#allocation3 + $0x130] sm:$0xff] %vm1296_vm5, %v7939_v34 }
 0x17b   :  { %1030 = vrot.lane.b32.xlu2 %v5532_v63, %s4578_s3  ;;  %v1105_v63 = vunpack.c.l.b16 %v775_v11  ;;  %v870_v32 = vrot.slane %v868_v8, 1  ;;  %v5716_v24 = vor.u32 %v884_v12, %v880_v29  ;;  %v903_v12 = vshll.u32 %v5527_v15, 16 }
 0x17d   :  { %v5694_v11 = vpack.c.b16 %v1105_v63, %v5679_v23  ;;  %v5699_v48 = vor.u32 %v870_v32, %v866_v31  ;;  %v1298_v31 = vsel %vm1296_vm5, %v1250_v5, %v5583_v22  ;;  %v5729_v63 = vor.u32 %v891_v0, %v887_v10 }
 0x17e   :  { %v987_v25 = vpop.permute.xlu0 %986  ;;  %v896_v5 = vshll.u32 %v5407_v59, 16  ;;  %v894_v10 = vshrl.u32 %v5407_v59, 16  ;;  %v905_v14 = vrot.slane %v903_v12, 1  ;;  %v1066_v59 = vpack.c.b16 %v5598_v46, %v5598_v46 }
 0x17f   :  { %1146 = vrot.lane.b32.xlu1 %v5615_v62, %s4579_s30  ;;  %v7859_v8 = vrot.slane %v5694_v11, 1 }
 0x181   :  { %1140 = vrot.lane.b32.xlu0 %v1011_v20, %s4579_s30  ;;  %4158 = vmatmul.msk.bf16.gmra.mxu3 %vm7937_vm14, %v1610_v39  ;;  %v1553_v39 = vunpack.c.l.b16 %v1247_v38  ;;  %v898_v38 = vrot.slane %v896_v5, 1  ;;  %vm7960_vm14 = vmmov %vm7948_vm0 }
 0x182   :  { %v5686_v33 = vpop.permute.xlu2 %1166 }
 0x183   :  { %1214 = vrot.lane.b32.xlu2 %v5684_v54, %s4580_s13 }
 0x187   :  { %972 = vrot.lane.b32.xlu1 %v5699_v48, %s4579_s30  ;;  %v5731_v32 = vpop.permute.xlu0 %1168 }
 0x189   :  { %1036 = vrot.lane.b32.xlu0 %v1011_v20, %s4578_s3  ;;  %v1550_v20 = vunpack.c.l.b16 %v7859_v8 }
 0x18a   :  { %v5725_v22 = vpop.permute.xlu2 %1076 }
 0x18b   :  { %1216 = vrot.lane.b32.xlu2 %v5716_v24, %s4580_s13  ;;  %v1613_v42 = vpack.c.b16 %v1553_v39, %v1550_v20  ;;  %v1163_v16 = vpop.permute.xlu1 %1162  ;;  %v5752_v20 = vor.u32 %v898_v38, %v894_v10  ;;  %v901_v39 = vshrl.u32 %v5527_v15, 16  ;;  %v910_v15 = vshll.u32 %v5509_v26, 16 }
 0x18c   :  { %v1274_v38 = vsel %vm7942_vm2, %v5249_v6, %v987_v25  ;;  %vm7963_vm2 = vmmov %vm7948_vm0 }
 0x18d   :  { %v1314_v46 = vsel %vm1296_vm5, %v1274_v38, %v5630_v61  ;;  %v1109_v38 = vshrl.u32 %v5543_v57, 16 }
 0x18f   :  { %1218 = vrot.lane.b32.xlu1 %v5729_v63, %s4580_s13  ;;  %v5747_v0 = vpop.permute.xlu0 %1172 }
 0x191   :  { %1144 = vrot.lane.b32.xlu0 %v5579_v43, %s4579_s30  ;;  %4159 = vmatmul.msk.bf16.gmra.mxu3 %vm7940_vm6, %v1613_v42  ;;  %v5757_v42 = vor.u32 %v905_v14, %v901_v39  ;;  %v912_v14 = vrot.slane %v910_v15, 1  ;;  %v908_v39 = vshrl.u32 %v5509_v26, 16  ;;  %v4360_v26 = vld [vmem:[%s7841_s5 + $0x78] sm:$0xff]  ;;  %vm7962_vm6 = vmmov %vm7948_vm0 }
 0x192   :  { %1811 = vmatpush.bf16.msra.mxu2 %v4360_v26 }
 0x193   :  { %1182 = vrot.lane.b32.xlu2 %v1065_v56, %s4578_s3  ;;  %v5763_v8 = vpop.permute.xlu1 %1164 }
 0x195   :  { %v5743_v29 = vpop.permute.xlu2 %1170 }
 0x197   :  { %976 = vrot.lane.b32.xlu1 %v5716_v24, %s4579_s30 }
 0x199   :  { %974 = vrot.lane.b32.xlu0 %v5684_v54, %s4579_s30 }
 0x19b   :  { %1220 = vrot.lane.b32.xlu2 %v5752_v20, %s4580_s13 }
 0x19d   :  { %v5759_v5 = vpop.permute.xlu2 %1080 }
 0x19f   :  { %1222 = vrot.lane.b32.xlu1 %v5757_v42, %s4580_s13 }
 0x1a0   :  { %v5768_v12 = vpop.permute.xlu0 %1180 }
 0x1a1   :  { %1184 = vrot.lane.b32.xlu0 %v1066_v59, %s4578_s3  ;;  %7941 = vst [vmem:[#allocation13_spill] sm:$0xff] %v5768_v12 }
 0x1a3   :  { %1038 = vrot.lane.b32.xlu2 %v5576_v27, %s4578_s3  ;;  %v5787_v27 = vor.u32 %v912_v14, %v908_v39 }
 0x1a5   :  { %v5775_v10 = vpop.permute.xlu2 %1174 }
 0x1a7   :  { %1090 = vrot.lane.b32.xlu1 %v5484_v36, %s4580_s13  ;;  %v1111_v36 = vshll.u32 %v5543_v57, 16  ;;  %v1067_v57 = vpack.c.b16 %v5638_v51, %v5638_v51  ;;  %v4356_v51 = vld [vmem:[%s7841_s5 + $0x58] sm:$0xff] }
 0x1a9   :  { %v1071_v34 = vpop.permute.xlu1 %1070  ;;  %978 = vrot.lane.b32.xlu0 %v5729_v63, %s4579_s30 }
 0x1aa   :  { %v5785_v6 = vsel %vm1329_vm7, %v1298_v31, %v1071_v34  ;;  %v1113_v31 = vrot.slane %v1111_v36, 1  ;;  %v4359_v34 = vld [vmem:[%s7841_s5 + $0x70] sm:$0xff] }
 0x1ab   :  { %v1125_v25 = vpop.permute.xlu0 %1124  ;;  %1224 = vrot.lane.b32.xlu2 %v5787_v27, %s4580_s13  ;;  %1812 = vmatpush.bf16.msra.mxu2 %v4359_v34 }
 0x1ac   :  { %v5808_v39 = vor.u32 %v1113_v31, %v1109_v38  ;;  %v1364_v26 = vsel %vm7945_vm8, %v5699_v48, %v1125_v25  ;;  %v938_v48 = vshll.u32 %v5567_v37, 16  ;;  %vm7964_vm8 = vmmov %vm7948_vm0 }
 0x1ad   :  { %v5792_v15 = vpop.permute.xlu2 %1084  ;;  %v5834_v38 = vsel %vm1296_vm5, %v1364_v26, %v1163_v16  ;;  %v4352_v16 = vld [vmem:[%s7841_s5 + $0x38] sm:$0xff] }
 0x1ae   :  { %7943 = vst [vmem:[#allocation14_spill] sm:$0xff] %v5792_v15  ;;  %1762 = vmatpush.bf16.msra.mxu1 %v4352_v16  ;;  %v940_v3 = vrot.slane %v938_v48, 1  ;;  %v4350_v48 = vld [vmem:[%s7841_s5 + $0x28] sm:$0xff] }
 0x1af   :  { %980 = vrot.lane.b32.xlu1 %v5752_v20, %s4579_s30 }
 0x1b1   :  { %v5799_v61 = vpop.permute.xlu1 %1074  ;;  %1040 = vrot.lane.b32.xlu0 %v5579_v43, %s4578_s3  ;;  %v4358_v43 = vld [vmem:[%s7841_s5 + $0x68] sm:$0xff] }
 0x1b2   :  { %1813 = vmatpush.bf16.msra.mxu2 %v4358_v43 }
 0x1b3   :  { %v1127_v14 = vpop.permute.xlu0 %1126  ;;  %1092 = vrot.lane.b32.xlu2 %v1065_v56, %s4580_s13  ;;  %v4357_v56 = vld [vmem:[%s7841_s5 + $0x60] sm:$0xff] }
 0x1b4   :  { %v1367_v26 = vsel %vm7948_vm0, %v5684_v54, %v1127_v14  ;;  %v4354_v54 = vld [vmem:[%s7841_s5 + $0x48] sm:$0xff]  ;;  %v936_v14 = vshrl.u32 %v5567_v37, 16 }
 0x1b5   :  { %v5810_v40 = vpop.permute.xlu2 %1178 }
 0x1b6   :  { %7944 = vst [vmem:[#allocation15_spill] sm:$0xff] %v5810_v40  ;;  %1814 = vmatpush.bf16.msra.mxu2 %v4357_v56  ;;  %v4355_v56 = vld [vmem:[%s7841_s5 + $0x50] sm:$0xff]  ;;  %v945_v40 = vshll.u32 %v5604_v28, 16 }
 0x1b7   :  { %1226 = vrot.lane.b32.xlu1 %v5808_v39, %s4580_s13 }
 0x1b9   :  { %v5817_v36 = vpop.permute.xlu1 %1078  ;;  %982 = vrot.lane.b32.xlu0 %v5757_v42, %s4579_s30 }
 0x1ba   :  { %1815 = vmatpush.bf16.msra.mxu2 %v4356_v51  ;;  %v4351_v51 = vld [vmem:[%s7841_s5 + $0x30] sm:$0xff] }
 0x1bb   :  { %v5828_v31 = vpop.permute.xlu0 %1020  ;;  %1186 = vrot.lane.b32.xlu2 %v1067_v57, %s4578_s3  ;;  %1763 = vmatpush.bf16.msra.mxu1 %v4351_v51 }
 0x1bd   :  { %v5831_v34 = vpop.permute.xlu2 %1088 }
 0x1be   :  { %7946 = vst [vmem:[#allocation16_spill] sm:$0xff] %v5831_v34  ;;  %1816 = vmatpush.bf16.msra.mxu2 %v4355_v56  ;;  %v5866_v34 = vpack.c.b16 %v5641_v55, %v5641_v55  ;;  %v5881_v55 = vor.u32 %v940_v3, %v936_v14  ;;  %v931_v56 = vshll.u32 %v5570_v44, 16  ;;  %v4349_v3 = vld [vmem:[%s7841_s5 + $0x20] sm:$0xff]  ;;  %v4348_v14 = vld [vmem:[%s7841_s5 + $0x18] sm:$0xff] }
 0x1bf   :  { %1150 = vrot.lane.b32.xlu1 %v5659_v52, %s4579_s30  ;;  %1764 = vmatpush.bf16.msra.mxu1 %v4350_v48 }
 0x1c0   :  { %v933_v51 = vrot.slane %v931_v56, 1 }
 0x1c1   :  { %v5841_v43 = vpop.permute.xlu1 %1082  ;;  %1148 = vrot.lane.b32.xlu0 %v5618_v41, %s4579_s30 }
 0x1c2   :  { %7947 = vst [vmem:[#allocation17_spill] sm:$0xff] %v5841_v43  ;;  %1817 = vmatpush.bf16.msra.mxu2 %v4354_v54  ;;  %v952_v54 = vshll.u32 %v5607_v13, 16 }
 0x1c3   :  { %v5846_v25 = vpop.permute.xlu0 %1128  ;;  %1042 = vrot.lane.b32.xlu2 %v5615_v62, %s4578_s3  ;;  %v5873_v62 = vsel %vm1296_vm5, %v1367_v26, %v5763_v8  ;;  %v4353_v8 = vld [vmem:[%s7841_s5 + $0x40] sm:$0xff]  ;;  %1765 = vmatpush.bf16.msra.mxu1 %v4349_v3 }
 0x1c4   :  { %v954_v3 = vrot.slane %v952_v54, 1  ;;  %v4346_v54 = vld [vmem:[%s7841_s5 + $0x8] sm:$0xff] }
 0x1c5   :  { %v5861_v7 = vpop.permute.xlu2 %1022 }
 0x1c6   :  { %1818 = vmatpush.bf16.msra.mxu2 %v4353_v8 }
 0x1c7   :  { %1094 = vrot.lane.b32.xlu1 %v1066_v59, %s4580_s13  ;;  %1766 = vmatpush.bf16.msra.mxu1 %v4348_v14  ;;  %v922_v14 = vshrl.u32 %v5668_v35, 16 }
 0x1c9   :  { %v1087_v16 = vpop.permute.xlu1 %1086  ;;  %1188 = vrot.lane.b32.xlu0 %v5866_v34, %s4578_s3 }
 0x1ca   :  { %v5879_v59 = vsel %vm1329_vm7, %v1314_v46, %v1087_v16  ;;  %v929_v16 = vshrl.u32 %v5570_v44, 16 }
 0x1cb   :  { %7949 = vst [vmem:[#allocation18_spill] sm:$0xff] %v5879_v59  ;;  %v5889_v37 = vpop.permute.xlu0 %1024  ;;  %1232 = vrot.lane.b32.xlu2 %v5881_v55, %s4580_s13  ;;  %v924_v59 = vshll.u32 %v5668_v35, 16 }
 0x1cc   :  { %v934_v8 = vor.u32 %v933_v51, %v929_v16  ;;  %v5924_v51 = vor.u32 %v954_v3, %v950_v58  ;;  %v4345_v58 = vld [vmem:[%s7841_s5] sm:$0xff] }
 0x1cd   :  { %v5897_v46 = vpop.permute.xlu2 %1026 }
 0x1cf   :  { %984 = vrot.lane.b32.xlu1 %v5787_v27, %s4579_s30 }
 0x1d1   :  { %v5901_v26 = vpop.permute.xlu1 %1130  ;;  %1044 = vrot.lane.b32.xlu0 %v5618_v41, %s4578_s3  ;;  %v4347_v41 = vld [vmem:[%s7841_s5 + $0x10] sm:$0xff] }
 0x1d2   :  { %1767 = vmatpush.bf16.msra.mxu1 %v4347_v41  ;;  %v947_v41 = vrot.slane %v945_v40, 1 }
 0x1d3   :  { %v5910_v48 = vpop.permute.xlu0 %1132  ;;  %1096 = vrot.lane.b32.xlu2 %v1067_v57, %s4580_s13  ;;  %v926_v57 = vrot.slane %v924_v59, 1 }
 0x1d5   :  { %v5917_v56 = vpop.permute.xlu2 %1030  ;;  %v927_v13 = vor.u32 %v926_v57, %v922_v14  ;;  %v5947_v57 = vpack.c.b16 %v5679_v23, %v5679_v23  ;;  %v966_v14 = vshll.u32 %v5652_v1, 16 }
 0x1d6   :  { %7950 = vst [vmem:[#allocation19_spill] sm:$0xff] %v5917_v56  ;;  %1768 = vmatpush.bf16.msra.mxu1 %v4346_v54  ;;  %v943_v54 = vshrl.u32 %v5604_v28, 16  ;;  %v1210_v56 = vshll.u32 %v5697_v9, 16 }
 0x1d7   :  { %1230 = vrot.lane.b32.xlu1 %v934_v8, %s4580_s13  ;;  %v968_v15 = vrot.slane %v966_v14, 1  ;;  %v7954_v14 = vrot.slane %v5694_v11, 1 }
 0x1d8   :  { %v1212_v1 = vrot.slane %v1210_v56, 1 }
 0x1d9   :  { %v5921_v44 = vpop.permute.xlu1 %1134  ;;  %990 = vrot.lane.b32.xlu0 %v934_v8, %s4579_s30 }
 0x1da   :  { %1769 = vmatpush.bf16.msra.mxu1 %v4345_v58  ;;  %v948_v58 = vor.u32 %v947_v41, %v943_v54  ;;  %v1161_v41 = vpack.c.b16 %v5681_v21, %v5681_v21  ;;  %v957_v54 = vshrl.u32 %v5649_v49, 16 }
 0x1db   :  { %v5927_v16 = vpop.permute.xlu0 %1028  ;;  %1236 = vrot.lane.b32.xlu2 %v5924_v51, %s4580_s13 }
 0x1dd   :  { %v1215_v59 = vpop.permute.xlu2 %1214 }
 0x1df   :  { %988 = vrot.lane.b32.xlu1 %v927_v13, %s4579_s30 }
 0x1e1   :  { %v1139_v35 = vpop.permute.xlu1 %1138  ;;  %1152 = vrot.lane.b32.xlu0 %v5662_v30, %s4579_s30 }
 0x1e2   :  { %v5943_v3 = vsel %vm7951_vm9, %v5808_v39, %v1139_v35  ;;  %v1443_v39 = vsel %vm1329_vm7, %v5834_v38, %v1215_v59  ;;  %vm7965_vm9 = vmmov %vm7948_vm0 }
 0x1e3   :  { %v1137_v12 = vpop.permute.xlu0 %1136  ;;  %1190 = vrot.lane.b32.xlu2 %v5947_v57, %s4578_s3  ;;  %v1507_v28 = vunpack.c.l.b16 %v1443_v39 }
 0x1e4   :  { %v5955_v40 = vsel %vm7952_vm10, %v5787_v27, %v1137_v12  ;;  %v5968_v27 = vor.u32 %v968_v15, %v964_v50  ;;  %v959_v50 = vshll.u32 %v5649_v49, 16  ;;  %v1373_v49 = vsel %vm7958_vm12, %v5729_v63, %v5901_v26  ;;  %vm7967_vm10 = vmmov %vm7948_vm0 }
 0x1e5   :  { %v1217_v35 = vpop.permute.xlu2 %1216  ;;  %vm7983_vm12 = vmmov %vm7948_vm0 }
 0x1e6   :  { %v1445_v23 = vsel %vm1329_vm7, %v5873_v62, %v1217_v35  ;;  %v1208_v62 = vshrl.u32 %v5697_v9, 16  ;;  %v961_v56 = vrot.slane %v959_v50, 1 }
 0x1e7   :  { %1234 = vrot.lane.b32.xlu1 %v948_v58, %s4580_s13  ;;  %v1510_v43 = vunpack.c.l.b16 %v1445_v23 }
 0x1e8   :  { %v1213_v15 = vor.u32 %v1212_v1, %v1208_v62  ;;  %v5994_v39 = vor.u32 %v961_v56, %v957_v54  ;;  %v1506_v62 = vunpack.c.l.b16 %v5785_v6 }
 0x1e9   :  { %v1143_v17 = vpop.permute.xlu1 %1142  ;;  %994 = vrot.lane.b32.xlu0 %v948_v58, %s4579_s30  ;;  %v1591_v38 = vpack.c.b16 %v1510_v43, %v1507_v28 }
 0x1ea   :  { %v5966_v12 = vsel %vm7953_vm15, %v934_v8, %v1143_v17  ;;  %vm7970_vm15 = vmmov %vm7948_vm0 }
 0x1eb   :  { %v5970_v59 = vpop.permute.xlu0 %1032  ;;  %1240 = vrot.lane.b32.xlu2 %v5968_v27, %s4580_s13  ;;  %1819 = vmatmul.bf16.vlgmr.msra.gmra.mxu2 %v1591_v38 }
 0x1ed   :  { %v5980_v17 = vpop.permute.xlu2 %1182 }
 0x1ef   :  { %1154 = vrot.lane.b32.xlu1 %v7954_v14, %s4579_s30 }
 0x1f1   :  { %v1147_v43 = vpop.permute.xlu1 %1146  ;;  %1192 = vrot.lane.b32.xlu0 %v1161_v41, %s4578_s3 }
 0x1f2   :  { %v5985_v8 = vsel %vm7955_vm1, %v948_v58, %v1147_v43  ;;  %vm7976_vm1 = vmmov %vm7948_vm0 }
 0x1f3   :  { %v1141_v9 = vpop.permute.xlu0 %1140  ;;  %1244 = vrot.lane.b32.xlu2 %v1213_v15, %s4580_s13 }
 0x1f4   :  { %v5989_v21 = vsel %vm7956_vm11, %v927_v13, %v1141_v9  ;;  %vm7980_vm11 = vmmov %vm7948_vm0 }
 0x1f5   :  { %v1221_v35 = vpop.permute.xlu2 %1220 }
 0x1f7   :  { %992 = vrot.lane.b32.xlu1 %v5881_v55, %s4579_s30 }
 0x1f9   :  { %v973_v23 = vpop.permute.xlu1 %972  ;;  %998 = vrot.lane.b32.xlu0 %v5994_v39, %s4579_s30 }
 0x1fa   :  { %v1253_v58 = vsel %vm7957_vm3, %v5503_v53, %v973_v23  ;;  %v1370_v53 = vsel %vm7959_vm13, %v5716_v24, %v5846_v25  ;;  %vm7982_vm3 = vmmov %vm7948_vm0 }
 0x1fb   :  { %v1300_v28 = vsel %vm1296_vm5, %v1253_v58, %v5828_v31  ;;  %v6002_v13 = vpop.permute.xlu0 %1036  ;;  %1046 = vrot.lane.b32.xlu2 %v5659_v52, %s4578_s3  ;;  %v1417_v31 = vsel %vm1296_vm5, %v1373_v49, %v5731_v32  ;;  %vm7984_vm13 = vmmov %vm7948_vm0 }
 0x1fc   :  { %v1333_v38 = vsel %vm1329_vm7, %v1300_v28, %v5656_v19  ;;  %v1449_v26 = vsel %vm1329_vm7, %v1417_v31, %v1221_v35  ;;  %v1415_v19 = vsel %vm1296_vm5, %v1370_v53, %v5686_v33  ;;  %v1118_v33 = vshll.u32 %v5694_v11, 16 }
 0x1fd   :  { %v1509_v1 = vunpack.c.l.b16 %v1333_v38  ;;  %v1516_v24 = vunpack.c.l.b16 %v1449_v26  ;;  %v6025_v25 = vpop.permute.xlu2 %1038 }
 0x1fe   :  { %v1120_v15 = vrot.slane %v1118_v33, 1 }
 0x1ff   :  { %1238 = vrot.lane.b32.xlu1 %v5994_v39, %s4580_s13  ;;  %v1590_v63 = vpack.c.b16 %v1509_v1, %v1506_v62 }
 0x201   :  { %1770 = vmatmul.bf16.vlgmr.msra.gmra.mxu1 %v1590_v63  ;;  %v1219_v52 = vpop.permute.xlu1 %1218  ;;  %1048 = vrot.lane.b32.xlu0 %v5662_v30, %s4578_s3 }
 0x202   :  { %v1447_v6 = vsel %vm1329_vm7, %v1415_v19, %v1219_v52 }
 0x203   :  { %v1513_v32 = vunpack.c.l.b16 %v1447_v6  ;;  %v1145_v41 = vpop.permute.xlu0 %1144  ;;  %1100 = vrot.lane.b32.xlu2 %v5947_v57, %s4580_s13  ;;  %v1116_v57 = vshrl.u32 %v5694_v11, 16  ;;  %v1376_v11 = vsel %vm7964_vm8, %v5752_v20, %v5910_v48  ;;  %vm7992_vm8 = vmmov %vm7948_vm0 }
 0x204   :  { %v1394_v14 = vsel %vm7960_vm14, %v5881_v55, %v1145_v41  ;;  %v1379_v55 = vsel %vm7962_vm6, %v5757_v42, %v5921_v44  ;;  %vm7986_vm14 = vmmov %vm7948_vm0 }
 0x205   :  { %v1594_v50 = vpack.c.b16 %v1516_v24, %v1513_v32  ;;  %v1225_v23 = vpop.permute.xlu2 %1224  ;;  %v6046_v58 = vor.u32 %v1120_v15, %v1116_v57  ;;  %v1421_v42 = vsel %vm1296_vm5, %v1379_v55, %v5747_v0  ;;  %v7969_v55 = vld [vmem:[#allocation4_spill] sm:$0xff]  ;;  %vm7989_vm6 = vmmov %vm7948_vm0 }
 0x206   :  { %v1453_v44 = vsel %vm1329_vm7, %v1421_v42, %v1225_v23 }
 0x207   :  { %996 = vrot.lane.b32.xlu1 %v5924_v51, %s4579_s30  ;;  %1824 = vmatmul.bf16.gmra.mxu2 %v1594_v50  ;;  %v1522_v48 = vunpack.c.l.b16 %v1453_v44  ;;  %v7973_v44 = vld [vmem:[#allocation13_spill] sm:$0xff] }
 0x209   :  { %v977_v30 = vpop.permute.xlu1 %976 }
 0x20a   :  { %v1259_v43 = vsel %vm7961_vm4, %v5284_v4, %v977_v30  ;;  %vm7988_vm4 = vmmov %vm7948_vm0 }
 0x20b   :  { %v1304_v9 = vsel %vm1296_vm5, %v1259_v43, %v5889_v37  ;;  %v975_v56 = vpop.permute.xlu0 %974 }
 0x20c   :  { %v1256_v54 = vsel %vm7963_vm2, %v5366_v2, %v975_v56  ;;  %v1337_v35 = vsel %vm1329_vm7, %v1304_v9, %v5725_v22  ;;  %vm7990_vm2 = vmmov %vm7948_vm0 }
 0x20d   :  { %v1302_v4 = vsel %vm1296_vm5, %v1256_v54, %v5861_v7  ;;  %v1515_v22 = vunpack.c.l.b16 %v1337_v35  ;;  %v1419_v7 = vsel %vm1296_vm5, %v1376_v11, %v5743_v29  ;;  %v6071_v29 = vsel %vm1296_vm5, %v1394_v14, %v5980_v17  ;;  %v6083_v52 = vpop.permute.xlu2 %1092  ;;  %v7971_v35 = vld [vmem:[#allocation17_spill] sm:$0xff]  ;;  %v7972_v11 = vld [vmem:[#allocation14_spill] sm:$0xff] }
 0x20e   :  { %v1335_v37 = vsel %vm1329_vm7, %v1302_v4, %v5799_v61 }
 0x20f   :  { %1242 = vrot.lane.b32.xlu1 %v6046_v58, %s4580_s13  ;;  %v1512_v2 = vunpack.c.l.b16 %v1335_v37 }
 0x211   :  { %v1223_v28 = vpop.permute.xlu1 %1222  ;;  %v1593_v49 = vpack.c.b16 %v1515_v22, %v1512_v2 }
 0x212   :  { %v1451_v20 = vsel %vm1329_vm7, %v1419_v7, %v1223_v28  ;;  %v1429_v7 = vsel %vm1296_vm5, %v5966_v12, %v7973_v44 }
 0x213   :  { %v1519_v38 = vunpack.c.l.b16 %v1451_v20  ;;  %v6063_v61 = vpop.permute.xlu0 %1184  ;;  %1775 = vmatmul.bf16.gmra.mxu1 %v1593_v49  ;;  %v7974_v20 = vld [vmem:[#allocation15_spill] sm:$0xff] }
 0x215   :  { %v1597_v0 = vpack.c.b16 %v1522_v48, %v1519_v38  ;;  %v6100_v50 = vpop.permute.xlu2 %1186  ;;  %v1427_v48 = vsel %vm1296_vm5, %v5989_v21, %v7974_v20  ;;  %v7978_v21 = vld [vmem:[#allocation18_spill] sm:$0xff]  ;;  %v7985_v20 = vld [vmem:[#allocation9_spill] sm:$0xff] }
 0x217   :  { %1000 = vrot.lane.b32.xlu1 %v5968_v27, %s4579_s30  ;;  %1829 = vmatmul.bf16.gmra.mxu2 %v1597_v0 }
 0x219   :  { %v6067_v62 = vpop.permute.xlu1 %1090 }
 0x21b   :  { %v979_v1 = vpop.permute.xlu0 %978 }
 0x21c   :  { %v1262_v53 = vsel %vm7948_vm0, %v5444_v47, %v979_v1 }
 0x21d   :  { %v1306_v31 = vsel %vm1296_vm5, %v1262_v53, %v5897_v46  ;;  %v6102_v30 = vpop.permute.xlu2 %1042 }
 0x21e   :  { %v1339_v63 = vsel %vm1329_vm7, %v1306_v31, %v5817_v36 }
 0x21f   :  { %1098 = vrot.lane.b32.xlu1 %v5866_v34, %s4580_s13  ;;  %v1518_v6 = vunpack.c.l.b16 %v1339_v63  ;;  %v1425_v34 = vsel %vm1296_vm5, %v5943_v3, %v5635_v45 }
 0x221   :  { %v981_v26 = vpop.permute.xlu1 %980 }
 0x222   :  { %v1265_v19 = vsel %vm7965_vm9, %v5348_v18, %v981_v26  ;;  %v1457_v18 = vsel %vm1329_vm7, %v1425_v34, %v5610_v60  ;;  %v7966_v60 = vld [vmem:[#allocation6_spill] sm:$0xff]  ;;  %v1530_v34 = vunpack.c.l.b16 %v7978_v21  ;;  %vm7995_vm9 = vcmask 1043459  }
 0x223   :  { %v1308_v17 = vsel %vm1296_vm5, %v1265_v19, %v5927_v16  ;;  %v6092_v36 = vpop.permute.xlu0 %1040  ;;  %v1423_v16 = vsel %vm1296_vm5, %v5955_v40, %v5775_v10  ;;  %v1528_v14 = vunpack.c.l.b16 %v1457_v18  ;;  %v7968_v10 = vld [vmem:[#allocation19_spill] sm:$0xff]  ;;  %v7975_v19 = vld [vmem:[#allocation8_spill] sm:$0xff]  ;;  %v1433_v18 = vsel %vm1296_vm5, %v5985_v8, %v6063_v61 }
 0x224   :  { %v1341_v47 = vsel %vm1329_vm7, %v1308_v17, %v5759_v5 }
 0x225   :  { %v1521_v46 = vunpack.c.l.b16 %v1341_v47  ;;  %v1233_v57 = vpop.permute.xlu2 %1232 }
 0x226   :  { %v1461_v49 = vsel %vm1329_vm7, %v1429_v7, %v1233_v57 }
 0x227   :  { %v1596_v24 = vpack.c.b16 %v1521_v46, %v1518_v6  ;;  %v1534_v0 = vunpack.c.l.b16 %v1461_v49  ;;  %v7977_v6 = vld [vmem:[#allocation16_spill] sm:$0xff] }
 0x229   :  { %1780 = vmatmul.bf16.gmra.mxu1 %v1596_v24  ;;  %v1227_v32 = vpop.permute.xlu1 %1226 }
 0x22a   :  { %v1455_v41 = vsel %vm1329_vm7, %v1423_v16, %v1227_v32 }
 0x22b   :  { %v1525_v5 = vunpack.c.l.b16 %v1455_v41  ;;  %v983_v33 = vpop.permute.xlu0 %982 }
 0x22c   :  { %v1268_v43 = vsel %vm7967_vm10, %v7966_v60, %v983_v33  ;;  %vm7996_vm10 = vcmask 1041408  }
 0x22d   :  { %v1600_v45 = vpack.c.b16 %v1528_v14, %v1525_v5  ;;  %v1310_v40 = vsel %vm1296_vm5, %v1268_v43, %v7968_v10  ;;  %v1097_v1 = vpop.permute.xlu2 %1096  ;;  %v7979_v10 = vld [vmem:[#allocation7_spill] sm:$0xff] }
 0x22e   :  { %v1343_v23 = vsel %vm1329_vm7, %v1310_v40, %v7971_v35 }
 0x22f   :  { %1834 = vmatmul.bf16.gmra.mxu2 %v1600_v45  ;;  %v1524_v42 = vunpack.c.l.b16 %v1343_v23 }
 0x231   :  { %v1151_v3 = vpop.permute.xlu1 %1150 }
 0x233   :  { %v1149_v9 = vpop.permute.xlu0 %1148 }
 0x235   :  { %v1237_v46 = vpop.permute.xlu2 %1236 }
 0x236   :  { %v1465_v32 = vsel %vm1329_vm7, %v1433_v18, %v1237_v46 }
 0x237   :  { %v1540_v14 = vunpack.c.l.b16 %v1465_v32  ;;  %v1869_v32 = vpop.f32.mrf.mxu3 }
 0x239   :  { %v6104_v15 = vpop.permute.xlu1 %1094 }
 0x23b   :  { %v1189_v22 = vpop.permute.xlu0 %1188 }
 0x23d   :  { %v1191_v43 = vpop.permute.xlu2 %1190 }
 0x241   :  { %v985_v56 = vpop.permute.xlu1 %984 }
 0x242   :  { %v1271_v54 = vsel %vm7970_vm15, %v7969_v55, %v985_v56  ;;  %v7981_v56 = vld [vmem:[#allocation5_spill] sm:$0xff] }
 0x243   :  { %v1312_v4 = vsel %vm1296_vm5, %v1271_v54, %v5970_v59  ;;  %v1045_v63 = vpop.permute.xlu0 %1044 }
 0x244   :  { %v1345_v37 = vsel %vm1329_vm7, %v1312_v4, %v7972_v11 }
 0x245   :  { %v1527_v2 = vunpack.c.l.b16 %v1345_v37  ;;  %v1241_v23 = vpop.permute.xlu2 %1240  ;;  %v1403_v37 = vsel %vm7983_vm12, %v5994_v39, %v1151_v3  ;;  %vm2506_vm12 = vcmask 517120  }
 0x247   :  { %v1599_v28 = vpack.c.b16 %v1527_v2, %v1524_v42  ;;  %v1437_v2 = vsel %vm1296_vm5, %v1403_v37, %v1189_v22 }
 0x249   :  { %1785 = vmatmul.bf16.gmra.mxu1 %v1599_v28  ;;  %v1231_v38 = vpop.permute.xlu1 %1230 }
 0x24a   :  { %v1459_v59 = vsel %vm1329_vm7, %v1427_v48, %v1231_v38  ;;  %v7987_v48 = vld [vmem:[#allocation10_spill] sm:$0xff] }
 0x24b   :  { %v1531_v53 = vunpack.c.l.b16 %v1459_v59  ;;  %v991_v5 = vpop.permute.xlu0 %990 }
 0x24c   :  { %v1280_v40 = vsel %vm7980_vm11, %v7979_v10, %v991_v5 }
 0x24d   :  { %v1603_v31 = vpack.c.b16 %v1534_v0, %v1531_v53  ;;  %v1318_v8 = vsel %vm1296_vm5, %v1280_v40, %v6025_v25  ;;  %v1400_v25 = vsel %vm7984_vm13, %v5924_v51, %v1149_v9  ;;  %v1245_v59 = vpop.permute.xlu2 %1244  ;;  %vm2515_vm13 = vcmask 516096  }
 0x24f   :  { %1839 = vmatmul.bf16.gmra.mxu2 %v1603_v31 }
 0x251   :  { %v989_v26 = vpop.permute.xlu1 %988 }
 0x252   :  { %v1277_v12 = vsel %vm7976_vm1, %v7975_v19, %v989_v26 }
 0x253   :  { %v1316_v17 = vsel %vm1296_vm5, %v1277_v12, %v6002_v13  ;;  %v1153_v57 = vpop.permute.xlu0 %1152 }
 0x254   :  { %v1349_v47 = vsel %vm1329_vm7, %v1316_v17, %v7977_v6  ;;  %v1406_v12 = vsel %vm7990_vm2, %v5968_v27, %v1153_v57 }
 0x255   :  { %v1533_v24 = vunpack.c.l.b16 %v1349_v47  ;;  %v1047_v18 = vpop.permute.xlu2 %1046 }
 0x257   :  { %v1602_v16 = vpack.c.b16 %v1533_v24, %v1530_v34 }
 0x259   :  { %1790 = vmatmul.bf16.gmra.mxu1 %v1602_v16  ;;  %v1235_v41 = vpop.permute.xlu1 %1234 }
 0x25a   :  { %v1463_v13 = vsel %vm1329_vm7, %v6071_v29, %v1235_v41  ;;  %v1351_v29 = vsel %vm1329_vm7, %v1318_v8, %v6067_v62  ;;  %v1469_v62 = vsel %vm1329_vm7, %v1437_v2, %v1241_v23 }
 0x25b   :  { %v1537_v45 = vunpack.c.l.b16 %v1463_v13  ;;  %v1536_v4 = vunpack.c.l.b16 %v1351_v29  ;;  %v995_v42 = vpop.permute.xlu0 %994  ;;  %v1546_v28 = vunpack.c.l.b16 %v1469_v62  ;;  %v7991_v13 = vld [vmem:[#allocation12_spill] sm:$0xff] }
 0x25c   :  { %v1286_v39 = vsel %vm7986_vm14, %v7985_v20, %v995_v42 }
 0x25d   :  { %v1606_v33 = vpack.c.b16 %v1540_v14, %v1537_v45  ;;  %v1322_v51 = vsel %vm1296_vm5, %v1286_v39, %v6102_v30  ;;  %v1101_v10 = vpop.permute.xlu2 %1100 }
 0x25f   :  { %1844 = vmatmul.bf16.gmra.mxu2 %v1606_v33 }
 0x261   :  { %v1155_v60 = vpop.permute.xlu1 %1154 }
 0x262   :  { %v1409_v53 = vsel %vm7989_vm6, %v6046_v58, %v1155_v60  ;;  %v7993_v60 = vld [vmem:[#allocation11_spill] sm:$0xff] }
 0x263   :  { %v1193_v9 = vpop.permute.xlu0 %1192 }
 0x264   :  { %v1441_v26 = vsel %vm1296_vm5, %v1409_v53, %v1193_v9 }
 0x265   :  { %v1473_v21 = vsel %vm1329_vm7, %v1441_v26, %v1245_v59 }
 0x266   :  { %v1552_v24 = vunpack.c.l.b16 %v1473_v21 }
 0x269   :  { %v993_v61 = vpop.permute.xlu1 %992 }
 0x26a   :  { %v1283_v55 = vsel %vm7982_vm3, %v7981_v56, %v993_v61  ;;  %v1871_v61 = vpop.f32.mrf.mxu3 }
 0x26b   :  { %v1320_v54 = vsel %vm1296_vm5, %v1283_v55, %v6092_v36  ;;  %v1435_v36 = vsel %vm1296_vm5, %v1400_v25, %v6100_v50  ;;  %v1355_v50 = vsel %vm1329_vm7, %v1322_v51, %v6104_v15  ;;  %v999_v34 = vpop.permute.xlu0 %998 }
 0x26c   :  { %v1353_v35 = vsel %vm1329_vm7, %v1320_v54, %v6083_v52  ;;  %v1542_v30 = vunpack.c.l.b16 %v1355_v50 }
 0x26d   :  { %v1539_v11 = vunpack.c.l.b16 %v1353_v35 }
 0x26e   :  { %v1820_v17 = vpop.f32.mrf.mxu2 }
 0x26f   :  { %v1605_v44 = vpack.c.b16 %v1539_v11, %v1536_v4 }
 0x271   :  { %1795 = vmatmul.bf16.gmra.mxu1 %v1605_v44  ;;  %v1239_v52 = vpop.permute.xlu1 %1238 }
 0x272   :  { %v1467_v7 = vsel %vm1329_vm7, %v1435_v36, %v1239_v52  ;;  %v1874_v11 = vpop.f32.mrf.mxu3 }
 0x273   :  { %v1543_v49 = vunpack.c.l.b16 %v1467_v7  ;;  %v1049_v45 = vpop.permute.xlu0 %1048 }
 0x275   :  { %v1609_v3 = vpack.c.b16 %v1546_v28, %v1543_v49 }
 0x276   :  { %v1822_v27 = vpop.f32.mrf.mxu2 }
 0x277   :  { %1849 = vmatmul.bf16.gmra.mxu2 %v1609_v3 }
 0x279   :  { %v997_v22 = vpop.permute.xlu1 %996 }
 0x27a   :  { %v1289_v38 = vsel %vm7988_vm4, %v7987_v48, %v997_v22  ;;  %v1876_v42 = vpop.f32.mrf.mxu3 }
 0x27b   :  { %v1324_v0 = vsel %vm1296_vm5, %v1289_v38, %v1045_v63  ;;  %v1439_v63 = vsel %vm1296_vm5, %v1406_v12, %v1191_v43  ;;  %v1292_v43 = vsel %vm7948_vm0, %v7993_v60, %v999_v34  ;;  %v4419_v34 = vld [vmem:[%s7842_s1] ss:$0 sm:$0xff] }
 0x27c   :  { %v1357_v31 = vsel %vm1329_vm7, %v1324_v0, %v1097_v1  ;;  %v1326_v56 = vsel %vm1296_vm5, %v1292_v43, %v1047_v18 }
 0x27d   :  { %v1545_v19 = vunpack.c.l.b16 %v1357_v31 }
 0x27e   :  { %v1771_v6 = vpop.f32.mrf.mxu1 }
 0x27f   :  { %v6175_v47 = vadd.f32 %v1820_v17, %v1771_v6  ;;  %v1608_v15 = vpack.c.b16 %v1545_v19, %v1542_v30 }
 0x281   :  { %1800 = vmatmul.bf16.gmra.mxu1 %v1608_v15  ;;  %v1243_v58 = vpop.permute.xlu1 %1242 }
 0x282   :  { %v1471_v1 = vsel %vm1329_vm7, %v1439_v63, %v1243_v58  ;;  %v1879_v36 = vpop.f32.mrf.mxu3  ;;  %v1870_v58 = vadd.f32 %v1869_v32, %v6175_v47 }
 0x283   :  { %v1549_v46 = vunpack.c.l.b16 %v1471_v1 }
 0x285   :  { %v1612_v16 = vpack.c.b16 %v1552_v24, %v1549_v46 }
 0x286   :  { %v1773_v41 = vpop.f32.mrf.mxu1 }
 0x287   :  { %1854 = vmatmul.bf16.gmra.mxu2 %v1612_v16  ;;  %v1823_v6 = vadd.f32 %v1822_v27, %v1773_v41 }
 0x289   :  { %v1001_v5 = vpop.permute.xlu1 %1000  ;;  %v1872_v21 = vadd.f32 %v1871_v61, %v1823_v6 }
 0x28a   :  { %v1295_v14 = vsel %vm7992_vm8, %v7991_v13, %v1001_v5  ;;  %v1825_v40 = vpop.f32.mrf.mxu2  ;;  %v1881_v52 = vpop.f32.mrf.mxu3  ;;  %v6200_v13 = vadd.f32 %v4419_v34, %v1870_v58 }
 0x28b   :  { %v1328_v33 = vsel %vm1296_vm5, %v1295_v14, %v1049_v45  ;;  %v6198_v18 = vadd.f32 %v4419_v34, %v1872_v21 }
 0x28c   :  { %v1361_v8 = vsel %vm1329_vm7, %v1328_v33, %v1101_v10  ;;  %v1975_v33 = vmul.f32 %v6200_v13, %v6200_v13 }
 0x28d   :  { %v1551_v23 = vunpack.c.l.b16 %v1361_v8  ;;  %v1976_v47 = vmul.f32 %v6198_v18, %v6198_v18  ;;  %v1934_v10 = vsel %vm1296_vm5, %v6198_v18, 0.0  ;;  %v1933_v8 = vsel %vm1296_vm5, %v6200_v13, 0.0 }
 0x28f   :  { %v1992_v61 = vsel %vm1296_vm5, %v1976_v47, 0.0 }
 0x290   :  { %v1776_v57 = vpop.f32.mrf.mxu1 }
 0x291   :  { %v1099_v55 = vpop.permute.xlu1 %1098  ;;  %v1826_v29 = vadd.f32 %v1825_v40, %v1776_v57 }
 0x292   :  { %v1359_v54 = vsel %vm1329_vm7, %v1326_v56, %v1099_v55  ;;  %v1827_v37 = vpop.f32.mrf.mxu2  ;;  %v1884_v49 = vpop.f32.mrf.mxu3  ;;  %vm7994_vm7 = vcmask 1041409  }
 0x293   :  { %v1548_v35 = vunpack.c.l.b16 %v1359_v54  ;;  %v1875_v46 = vadd.f32 %v1874_v11, %v1826_v29  ;;  %v1991_v11 = vsel %vm1296_vm5, %v1975_v33, 0.0 }
 0x295   :  { %v1611_v4 = vpack.c.b16 %v1551_v23, %v1548_v35  ;;  %v6202_v41 = vadd.f32 %v4419_v34, %v1875_v46 }
 0x297   :  { %1805 = vmatmul.bf16.gmra.mxu1 %v1611_v4  ;;  %v1977_v40 = vmul.f32 %v6202_v41, %v6202_v41  ;;  %v1936_v29 = vsel %vm1296_vm5, %v6202_v41, 0.0 }
 0x298   :  { %v1778_v25 = vpop.f32.mrf.mxu1 }
 0x299   :  { %v1828_v63 = vadd.f32 %v1827_v37, %v1778_v25  ;;  %v1935_v37 = vadd.f32 %v1934_v10, %v1933_v8 }
 0x29a   :  { %v1830_v2 = vpop.f32.mrf.mxu2  ;;  %v1886_v9 = vpop.f32.mrf.mxu3 }
 0x29b   :  { %v1877_v16 = vadd.f32 %v1876_v42, %v1828_v63 }
 0x29d   :  { %v6206_v32 = vadd.f32 %v4419_v34, %v1877_v16 }
 0x29f   :  { %v1978_v54 = vmul.f32 %v6206_v32, %v6206_v32 }
 0x2a2   :  { %v1832_v7 = vpop.f32.mrf.mxu2  ;;  %v1889_v38 = vpop.f32.mrf.mxu3 }
 0x2a6   :  { %v1781_v44 = vpop.f32.mrf.mxu1 }
 0x2a7   :  { %v1831_v62 = vadd.f32 %v1830_v2, %v1781_v44  ;;  %v2049_v2 = vld [vmem:[%s7845_s8 + $0x38] sm:$0xff]  ;;  %v2048_v44 = vld [vmem:[%s7845_s8 + $0x30] sm:$0xff] }
 0x2a8   :  { %2061 = vmatpush.msrb.mxu0 %v2049_v2  ;;  %v2042_v2 = vld [vmem:[%s7845_s8] sm:$0xff] }
 0x2a9   :  { %v1880_v14 = vadd.f32 %v1879_v36, %v1831_v62  ;;  %v1993_v62 = vadd.f32 %v1992_v61, %v1991_v11  ;;  %v1994_v36 = vsel %vm1296_vm5, %v1977_v40, 0.0 }
 0x2aa   :  { %v1891_v0 = vpop.f32.mrf.mxu3  ;;  %2062 = vmatpush.msrb.mxu0 %v2048_v44 }
 0x2ab   :  { %v6214_v57 = vadd.f32 %v4419_v34, %v1880_v14 }
 0x2ae   :  { %v1783_v28 = vpop.f32.mrf.mxu1 }
 0x2af   :  { %v1833_v5 = vadd.f32 %v1832_v7, %v1783_v28  ;;  %v1937_v28 = vadd.f32 %v1936_v29, %v1935_v37 }
 0x2b1   :  { %v1882_v45 = vadd.f32 %v1881_v52, %v1833_v5  ;;  %v1979_v52 = vmul.f32 %v6214_v57, %v6214_v57 }
 0x2b2   :  { %v1835_v20 = vpop.f32.mrf.mxu2  ;;  %v1894_v26 = vpop.f32.mrf.mxu3 }
 0x2b3   :  { %v6223_v35 = vadd.f32 %v4419_v34, %v1882_v45  ;;  %v2044_v45 = vld [vmem:[%s7845_s8 + $0x10] sm:$0xff] }
 0x2b5   :  { %v1942_v21 = vsel %vm1296_vm5, %v6223_v35, 0.0 }
 0x2ba   :  { %v1837_v22 = vpop.f32.mrf.mxu2  ;;  %v6190_v12 = vpop.f32.mrf.mxu3 }
 0x2c2   :  { %v6196_v24 = vpop.f32.mrf.mxu3 }
 0x2c6   :  { %v1786_v39 = vpop.f32.mrf.mxu1 }
 0x2c7   :  { %v1836_v3 = vadd.f32 %v1835_v20, %v1786_v39 }
 0x2c9   :  { %v6188_v51 = vadd.f32 %v1884_v49, %v1836_v3  ;;  %v1938_v49 = vsel %vm1296_vm5, %v6206_v32, 0.0  ;;  %v6243_v3 = vld [vmem:[%s7842_s1 + $0x1] ss:$0 sm:$0xff] }
 0x2ca   :  { %v1901_v4 = vpop.f32.mrf.mxu3 }
 0x2cb   :  { %v6238_v20 = vadd.f32 %v4419_v34, %v6188_v51  ;;  %v1995_v51 = vadd.f32 %v1994_v36, %v1993_v62 }
 0x2cd   :  { %v1981_v63 = vmul.f32 %v6238_v20, %v6238_v20  ;;  %v1944_v40 = vsel %vm1296_vm5, %v6238_v20, 0.0 }
 0x2ce   :  { %v1788_v48 = vpop.f32.mrf.mxu1 }
 0x2cf   :  { %v1838_v60 = vadd.f32 %v1837_v22, %v1788_v48  ;;  %v2047_v22 = vld [vmem:[%s7845_s8 + $0x28] sm:$0xff]  ;;  %v1996_v48 = vsel %vm1296_vm5, %v1978_v54, 0.0  ;;  %v2002_v8 = vsel %vm1296_vm5, %v1981_v63, 0.0 }
 0x2d0   :  { %2063 = vmatpush.msrb.mxu0 %v2047_v22 }
 0x2d1   :  { %v1887_v25 = vadd.f32 %v1886_v9, %v1838_v60 }
 0x2d2   :  { %v1840_v50 = vpop.f32.mrf.mxu2 }
 0x2d6   :  { %v1791_v59 = vpop.f32.mrf.mxu1 }
 0x2d7   :  { %v1841_v56 = vadd.f32 %v1840_v50, %v1791_v59  ;;  %v1980_v50 = vmul.f32 %v6223_v35, %v6223_v35 }
 0x2d9   :  { %v1890_v39 = vadd.f32 %v1889_v38, %v1841_v56  ;;  %v1940_v38 = vsel %vm1296_vm5, %v6214_v57, 0.0  ;;  %v2000_v46 = vsel %vm1296_vm5, %v1980_v50, 0.0 }
 0x2da   :  { %v1842_v53 = vpop.f32.mrf.mxu2 }
 0x2db   :  { %v6268_v58 = vadd.f32 %v6243_v3, %v1890_v39 }
 0x2dd   :  { %v1983_v61 = vmul.f32 %v6268_v58, %v6268_v58 }
 0x2de   :  { %v1793_v31 = vpop.f32.mrf.mxu1 }
 0x2df   :  { %v1843_v43 = vadd.f32 %v1842_v53, %v1793_v31  ;;  %v6253_v53 = vadd.f32 %v4419_v34, %v1887_v25  ;;  %v2045_v34 = vld [vmem:[%s7845_s8 + $0x18] sm:$0xff]  ;;  %v1954_v25 = vsel %vm1296_vm5, %v6268_v58, 0.0 }
 0x2e1   :  { %v1892_v42 = vadd.f32 %v1891_v0, %v1843_v43  ;;  %v1946_v11 = vsel %vm1296_vm5, %v6253_v53, 0.0 }
 0x2e2   :  { %v1845_v30 = vpop.f32.mrf.mxu2 }
 0x2e3   :  { %v6256_v31 = vadd.f32 %v6243_v3, %v1892_v42 }
 0x2e5   :  { %v1984_v14 = vmul.f32 %v6256_v31, %v6256_v31  ;;  %v1955_v29 = vsel %vm1296_vm5, %v6256_v31, 0.0 }
 0x2e6   :  { %v1956_v39 = vadd.f32 %v1955_v29, %v1954_v25 }
 0x2e7   :  { %v2013_v42 = vsel %vm1296_vm5, %v1984_v14, 0.0 }
 0x2ea   :  { %v1847_v17 = vpop.f32.mrf.mxu2 }
 0x2ee   :  { %v1796_v19 = vpop.f32.mrf.mxu1 }
 0x2ef   :  { %v1846_v23 = vadd.f32 %v1845_v30, %v1796_v19  ;;  %v2046_v30 = vld [vmem:[%s7845_s8 + $0x20] sm:$0xff]  ;;  %v1939_v19 = vadd.f32 %v1938_v49, %v1937_v28  ;;  %v2012_v49 = vsel %vm1296_vm5, %v1983_v61, 0.0 }
 0x2f0   :  { %2064 = vmatpush.msrb.mxu0 %v2046_v30 }
 0x2f1   :  { %v1895_v59 = vadd.f32 %v1894_v26, %v1846_v23 }
 0x2f2   :  { %2065 = vmatpush.msrb.mxu0 %v2045_v34 }
 0x2f4   :  { %2066 = vmatpush.msrb.mxu0 %v2044_v45 }
 0x2f6   :  { %v1798_v15 = vpop.f32.mrf.mxu1 }
 0x2f7   :  { %v1848_v7 = vadd.f32 %v1847_v17, %v1798_v15  ;;  %v1998_v17 = vsel %vm1296_vm5, %v1979_v52, 0.0  ;;  %v1997_v15 = vadd.f32 %v1996_v48, %v1995_v51  ;;  %v2014_v51 = vadd.f32 %v2013_v42, %v2012_v49 }
 0x2f9   :  { %v1897_v26 = vadd.f32 %v6190_v12, %v1848_v7  ;;  %v6275_v12 = vadd.f32 %v6243_v3, %v1895_v59  ;;  %v1999_v5 = vadd.f32 %v1998_v17, %v1997_v15 }
 0x2fa   :  { %v1850_v1 = vpop.f32.mrf.mxu2 }
 0x2fb   :  { %v6286_v60 = vadd.f32 %v6243_v3, %v1897_v26  ;;  %v2001_v10 = vadd.f32 %v2000_v46, %v1999_v5  ;;  %v1985_v54 = vmul.f32 %v6275_v12, %v6275_v12  ;;  %v1957_v44 = vsel %vm1296_vm5, %v6275_v12, 0.0 }
 0x2fd   :  { %v1986_v62 = vmul.f32 %v6286_v60, %v6286_v60  ;;  %v2003_v28 = vadd.f32 %v2002_v8, %v2001_v10  ;;  %v1959_v22 = vsel %vm1296_vm5, %v6286_v60, 0.0 }
 0x2fe   :  { %v1801_v27 = vpop.f32.mrf.mxu1 }
 0x2ff   :  { %v1851_v0 = vadd.f32 %v1850_v1, %v1801_v27  ;;  %v1941_v1 = vadd.f32 %v1940_v38, %v1939_v19  ;;  %v1982_v27 = vmul.f32 %v6253_v53, %v6253_v53  ;;  %v1958_v38 = vadd.f32 %v1957_v44, %v1956_v39 }
 0x300   :  { %v2017_v30 = vsel %vm1296_vm5, %v1986_v62, 0.0 }
 0x301   :  { %v1900_v16 = vadd.f32 %v6196_v24, %v1851_v0  ;;  %v1943_v33 = vadd.f32 %v1942_v21, %v1941_v1  ;;  %v1904_v24 = vpop.f32.mrf.mxu3  ;;  %v2004_v37 = vsel %vm1296_vm5, %v1982_v27, 0.0 }
 0x302   :  { %v1852_v55 = vpop.f32.mrf.mxu2  ;;  %v2005_v0 = vadd.f32 %v2004_v37, %v2003_v28 }
 0x303   :  { %v6301_v23 = vadd.f32 %v6243_v3, %v1900_v16  ;;  %v1945_v7 = vadd.f32 %v1944_v40, %v1943_v33 }
 0x304   :  { %v2006_v27 = vrot.slane %v2005_v0, 4 }
 0x305   :  { %v1987_v48 = vmul.f32 %v6301_v23, %v6301_v23  ;;  %v1947_v59 = vadd.f32 %v1946_v11, %v1945_v7  ;;  %v1961_v19 = vsel %vm1296_vm5, %v6301_v23, 0.0 }
 0x306   :  { %v1803_v9 = vpop.f32.mrf.mxu1  ;;  %v2007_v29 = vadd.f32 %v2006_v27, %v2005_v0 }
 0x307   :  { %v1853_v6 = vadd.f32 %v1852_v55, %v1803_v9  ;;  %v2043_v55 = vld [vmem:[%s7845_s8 + $0x8] sm:$0xff]  ;;  %v2015_v9 = vsel %vm1296_vm5, %v1985_v54, 0.0  ;;  %v2019_v63 = vsel %vm1296_vm5, %v1987_v48, 0.0  ;;  %v1948_v5 = vrot.slane %v1947_v59, 4 }
 0x308   :  { %2067 = vmatpush.msrb.mxu0 %v2043_v55  ;;  %v2016_v26 = vadd.f32 %v2015_v9, %v2014_v51  ;;  %v2008_v62 = vrot.slane %v2007_v29, 2 }
 0x309   :  { %v1902_v43 = vadd.f32 %v1901_v4, %v1853_v6  ;;  %v1960_v6 = vadd.f32 %v1959_v22, %v1958_v38  ;;  %v1906_v16 = vpop.f32.mrf.mxu3  ;;  %v1949_v61 = vadd.f32 %v1948_v5, %v1947_v59 }
 0x30a   :  { %v1855_v47 = vpop.f32.mrf.mxu2  ;;  %2068 = vmatpush.msrb.mxu0 %v2042_v2  ;;  %v2018_v14 = vadd.f32 %v2017_v30, %v2016_v26  ;;  %v2009_v39 = vadd.f32 %v2008_v62, %v2007_v29 }
 0x30b   :  { %v6317_v36 = vadd.f32 %v6243_v3, %v1902_v43  ;;  %v1950_v44 = vrot.slane %v1949_v61, 2 }
 0x30c   :  { %v2010_v0 = vrot.slane %v2009_v39, 1 }
 0x30d   :  { %v1988_v17 = vmul.f32 %v6317_v36, %v6317_v36  ;;  %v1963_v34 = vsel %vm1296_vm5, %v6317_v36, 0.0  ;;  %v1951_v49 = vadd.f32 %v1950_v44, %v1949_v61 }
 0x30f   :  { %v2021_v45 = vsel %vm1296_vm5, %v1988_v17, 0.0  ;;  %v1952_v48 = vrot.slane %v1951_v49, 1  ;;  %v2011_v17 = vadd.f32 %v2010_v0, %v2009_v39 }
 0x312   :  { %v1857_v15 = vpop.f32.mrf.mxu2 }
 0x314   :  { %v1806_v56 = vpop.f32.mrf.mxu1 }
 0x315   :  { %v1856_v4 = vadd.f32 %v1855_v47, %v1806_v56  ;;  %v1962_v47 = vadd.f32 %v1961_v19, %v1960_v6  ;;  %v1953_v19 = vadd.f32 %v1952_v48, %v1951_v49  ;;  %v6361_v49 = vld [vmem:[%s7843_s6] ss:$0 sm:$0xff] }
 0x317   :  { %v1905_v52 = vadd.f32 %v1904_v24, %v1856_v4  ;;  %v2020_v24 = vadd.f32 %v2019_v63, %v2018_v14  ;;  %v1964_v10 = vadd.f32 %v1963_v34, %v1962_v47  ;;  %v4581_v63 = vmov 128.0  }
 0x318   :  { %4492 = vrcp.f32 %v4581_v63 }
 0x319   :  { %v6326_v50 = vadd.f32 %v6243_v3, %v1905_v52  ;;  %v2022_v56 = vadd.f32 %v2021_v45, %v2020_v24 }
 0x31b   :  { %v1989_v1 = vmul.f32 %v6326_v50, %v6326_v50  ;;  %v1965_v33 = vsel %vm1296_vm5, %v6326_v50, 0.0 }
 0x31c   :  { %v1808_v21 = vpop.f32.mrf.mxu1  ;;  %v1966_v55 = vadd.f32 %v1965_v33, %v1964_v10 }
 0x31d   :  { %v1858_v46 = vadd.f32 %v1857_v15, %v1808_v21  ;;  %v2023_v40 = vsel %vm1296_vm5, %v1989_v1, 0.0 }
 0x31e   :  { %v2024_v11 = vadd.f32 %v2023_v40, %v2022_v56  ;;  %v4493_v34 = vpop.eup %4492 }
 0x31f   :  { %v1907_v43 = vadd.f32 %v1906_v16, %v1858_v46  ;;  %v2074_v1 = vmul.f32 128.0, %v4493_v34  ;;  %vm2078_vm15 = vweird.f32 %v4493_v34 }
 0x321   :  { %v6343_v8 = vadd.f32 %v6243_v3, %v1907_v43  ;;  %v2075_v46 = vsub.f32 1.0, %v2074_v1 }
 0x323   :  { %v1967_v54 = vsel %vm1296_vm5, %v6343_v8, 0.0  ;;  %v1990_v4 = vmul.f32 %v6343_v8, %v6343_v8  ;;  %v2076_v16 = vmul.f32 %v4493_v34, %v2075_v46 }
 0x324   :  { %v1968_v37 = vadd.f32 %v1967_v54, %v1966_v55 }
 0x325   :  { %v2025_v25 = vsel %vm1296_vm5, %v1990_v4, 0.0  ;;  %v2077_v5 = vadd.f32 %v4493_v34, %v2076_v16 }
 0x326   :  { %v1969_v42 = vrot.slane %v1968_v37, 4  ;;  %v2026_v2 = vadd.f32 %v2025_v25, %v2024_v11 }
 0x327   :  { %v2079_v27 = vsel %vm2078_vm15, %v4493_v34, %v2077_v5 }
 0x328   :  { %v1970_v3 = vadd.f32 %v1969_v42, %v1968_v37  ;;  %v2027_v52 = vrot.slane %v2026_v2, 4 }
 0x32a   :  { %v1971_v7 = vrot.slane %v1970_v3, 2  ;;  %v2028_v28 = vadd.f32 %v2027_v52, %v2026_v2 }
 0x32c   :  { %v1972_v9 = vadd.f32 %v1971_v7, %v1970_v3  ;;  %v2029_v22 = vrot.slane %v2028_v28, 2 }
 0x32e   :  { %v1973_v59 = vrot.slane %v1972_v9, 1  ;;  %v2030_v51 = vadd.f32 %v2029_v22, %v2028_v28 }
 0x330   :  { %v1974_v38 = vadd.f32 %v1973_v59, %v1972_v9  ;;  %v2031_v30 = vrot.slane %v2030_v51, 1 }
 0x332   :  { %v2032_v26 = vadd.f32 %v2031_v30, %v2030_v51  ;;  %v2035_v6 = vsel %vm7994_vm7, %v1974_v38, %v1953_v19 }
 0x334   :  { %v2039_v15 = vsel %vm7995_vm9, %v2032_v26, %v2011_v17 }
 0x335   :  { %v2041_v21 = vsel %vm7996_vm10, %v2035_v6, %v2039_v15 }
 0x336   :  { %4160 = vmatmul.msk.f32.vlgmr.msrb.gmra.mxu0 %vm1296_vm5, %v2041_v21 }
 0x3b3   :  { %v2070_v14 = vpop.f32.mrf.mxu0 }
 0x3b4   :  { %v2080_v47 = vmul.f32 %v2079_v27, %v2070_v14 }
 0x3b6   :  { %v2081_v45 = vmul.f32 %v2080_v47, %v2080_v47  ;;  %v2098_v4 = vrot.slane %v2080_v47, 1  ;;  %v2099_v11 = vperm.slane %v2080_v47, 0 }
 0x3b8   :  { %v2083_v33 = vrot.slane %v2081_v45, 6  ;;  %v2100_v37 = vperm.slane %v2098_v4, 0  ;;  %v2103_v2 = vsub.f32 %v6200_v13, %v2099_v11  ;;  %v2104_v62 = vsub.f32 %v6198_v18, %v2099_v11 }
 0x3b9   :  { %v2110_v3 = vsub.f32 %v6253_v53, %v2099_v11  ;;  %v2105_v7 = vsub.f32 %v6202_v41, %v2099_v11  ;;  %v2106_v39 = vsub.f32 %v6206_v32, %v2099_v11  ;;  %v2107_v48 = vsub.f32 %v6214_v57, %v2099_v11  ;;  %v6373_v32 = vld [vmem:[%s7844_s7] ss:$0 sm:$0xff] }
 0x3ba   :  { %v2085_v43 = vsub.f32 %v2080_v47, %v2083_v33  ;;  %v2118_v9 = vsub.f32 %v6343_v8, %v2100_v37  ;;  %v2108_v53 = vsub.f32 %v6223_v35, %v2099_v11  ;;  %v2109_v41 = vsub.f32 %v6238_v20, %v2099_v11 }
 0x3bb   :  { %v2111_v51 = vsub.f32 %v6268_v58, %v2100_v37  ;;  %v2112_v8 = vsub.f32 %v6256_v31, %v2100_v37  ;;  %v2113_v17 = vsub.f32 %v6275_v12, %v2100_v37  ;;  %v2114_v20 = vsub.f32 %v6286_v60, %v2100_v37 }
 0x3bc   :  { %v2086_v24 = vadd.f32 1e-05, %v2085_v43  ;;  %v2115_v6 = vsub.f32 %v6301_v23, %v2100_v37  ;;  %v2116_v15 = vsub.f32 %v6317_v36, %v2100_v37  ;;  %v2117_v12 = vsub.f32 %v6326_v50, %v2100_v37 }
 0x3be   :  { %4494 = vrsqrt.f32 %v2086_v24  ;;  %vm2093_vm11 = vweird.f32 %v2086_v24 }
 0x3c4   :  { %v4495_v10 = vpop.eup %4494 }
 0x3c5   :  { %v2088_v40 = vmul.f32 %v4495_v10, %v2086_v24  ;;  %vm2094_vm1 = vweird.f32 %v4495_v10 }
 0x3c6   :  { %vm2095_vm3 = vmor %vm2093_vm11, %vm2094_vm1 }
 0x3c7   :  { %v2089_v61 = vmul.f32 %v4495_v10, %v2088_v40 }
 0x3c9   :  { %v2090_v56 = vmul.f32 0.5, %v2089_v61 }
 0x3cb   :  { %v2091_v55 = vsub.f32 1.5, %v2090_v56 }
 0x3cd   :  { %v2092_v29 = vmul.f32 %v4495_v10, %v2091_v55 }
 0x3cf   :  { %v2096_v54 = vsel %vm2095_vm3, %v4495_v10, %v2092_v29 }
 0x3d0   :  { %2120 = vst [vmem:[#allocation1] sm:$0xff] %v2096_v54 }
 0x3d7   :  { %v2122_v25 = vld [vmem:[#allocation1 + $0x2] ss:$9 sm:$0xff] }
 0x3d8   :  { %v2124_v42 = vld [vmem:[#allocation1 + $0x3] ss:$9 sm:$0xff]  ;;  %v2125_v44 = vperm.slane %v2122_v25, 0 }
 0x3d9   :  { %v2126_v52 = vperm.slane %v2124_v42, 0 }
 0x3da   :  { %v2129_v28 = vmul.f32 %v2125_v44, %v2103_v2  ;;  %v2130_v22 = vmul.f32 %v2125_v44, %v2104_v62  ;;  %v2136_v13 = vmul.f32 %v2125_v44, %v2110_v3  ;;  %v2131_v18 = vmul.f32 %v2125_v44, %v2105_v7 }
 0x3db   :  { %v2132_v59 = vmul.f32 %v2125_v44, %v2106_v39  ;;  %v2144_v0 = vmul.f32 %v2126_v52, %v2118_v9  ;;  %v2133_v38 = vmul.f32 %v2125_v44, %v2107_v48  ;;  %v2134_v57 = vmul.f32 %v2125_v44, %v2108_v53 }
 0x3dc   :  { %v2149_v30 = vmul.f32 %v6361_v49, %v2129_v28  ;;  %v2150_v19 = vmul.f32 %v6361_v49, %v2130_v22  ;;  %v2156_v35 = vmul.f32 %v6361_v49, %v2136_v13  ;;  %v2135_v58 = vmul.f32 %v2125_v44, %v2109_v41 }
 0x3dd   :  { %v2151_v26 = vmul.f32 %v6361_v49, %v2131_v18  ;;  %v2152_v21 = vmul.f32 %v6361_v49, %v2132_v59  ;;  %v2164_v31 = vmul.f32 %v6361_v49, %v2144_v0  ;;  %v2137_v63 = vmul.f32 %v2126_v52, %v2111_v51 }
 0x3de   :  { %v2138_v34 = vmul.f32 %v2126_v52, %v2112_v8  ;;  %v2153_v1 = vmul.f32 %v6361_v49, %v2133_v38  ;;  %v6387_v46 = vadd.f32 %v6373_v32, %v2149_v30  ;;  %v2154_v60 = vmul.f32 %v6361_v49, %v2134_v57 }
 0x3df   :  { %v6392_v16 = vadd.f32 %v6373_v32, %v2150_v19  ;;  %v6395_v23 = vadd.f32 %v6373_v32, %v2156_v35  ;;  %v2139_v36 = vmul.f32 %v2126_v52, %v2113_v17  ;;  %v2140_v5 = vmul.f32 %v2126_v52, %v2114_v20 }
 0x3e0   :  { %v2155_v27 = vmul.f32 %v6361_v49, %v2135_v58  ;;  %v6399_v14 = vadd.f32 %v6373_v32, %v2151_v26  ;;  %v2141_v47 = vmul.f32 %v2126_v52, %v2115_v6  ;;  %v2142_v45 = vmul.f32 %v2126_v52, %v2116_v15 }
 0x3e1   :  { %v6402_v33 = vadd.f32 %v6373_v32, %v2152_v21  ;;  %v6405_v50 = vadd.f32 %v6373_v32, %v2164_v31  ;;  %v2157_v43 = vmul.f32 %v6361_v49, %v2137_v63  ;;  %v2158_v24 = vmul.f32 %v6361_v49, %v2138_v34 }
 0x3e2   :  { %v6410_v10 = vadd.f32 %v6373_v32, %v2153_v1  ;;  %v4161_v40 = vmul.f32 -1.442695, %v6387_v46  ;;  %v6414_v61 = vadd.f32 %v6373_v32, %v2154_v60  ;;  %v4162_v56 = vmul.f32 -1.442695, %v6392_v16 }
 0x3e3   :  { %v2143_v55 = vmul.f32 %v2126_v52, %v2117_v12  ;;  %v2159_v29 = vmul.f32 %v6361_v49, %v2139_v36  ;;  %v6419_v54 = vadd.f32 %v6373_v32, %v2155_v27  ;;  %v4163_v4 = vmul.f32 -1.442695, %v6399_v14  ;;  %v6437_v52 = vld [vmem:[%s7846_s9 + $0x38] sm:$0xff] }
 0x3e4   :  { %v2160_v11 = vmul.f32 %v6361_v49, %v2140_v5  ;;  %v2161_v37 = vmul.f32 %v6361_v49, %v2141_v47  ;;  %v2162_v25 = vmul.f32 %v6361_v49, %v2142_v45  ;;  %v4164_v42 = vmul.f32 -1.442695, %v6402_v33  ;;  %4403 = vmatpush.bf16.msrb.mxu3 %v6437_v52 }
 0x3e5   :  { %v6427_v2 = vadd.f32 %v6373_v32, %v2157_v43  ;;  %v6430_v44 = vadd.f32 %v6373_v32, %v2158_v24  ;;  %4496 = vpow2.f32 %v4161_v40  ;;  %v4165_v62 = vmul.f32 -1.442695, %v6410_v10 }
 0x3e6   :  { %4498 = vpow2.f32 %v4162_v56  ;;  %v4166_v3 = vmul.f32 -1.442695, %v6414_v61  ;;  %v2163_v7 = vmul.f32 %v6361_v49, %v2143_v55  ;;  %v6441_v28 = vadd.f32 %v6373_v32, %v2159_v29 }
 0x3e7   :  { %4500 = vpow2.f32 %v4163_v4  ;;  %v4167_v39 = vmul.f32 -1.442695, %v6419_v54  ;;  %v7997_v9 = vmov 0.0   ;;  %v6447_v22 = vadd.f32 %v6373_v32, %v2160_v11 }
 0x3e8   :  { %2509 = vst.msk [vmem:[#allocation3 + $0xa8] sm:$0x3] %vm2506_vm12, %v7997_v9  ;;  %4502 = vpow2.f32 %v4164_v42  ;;  %v4168_v13 = vmul.f32 -1.442695, %v6395_v23  ;;  %v6454_v49 = vadd.f32 %v6373_v32, %v2161_v37  ;;  %v4169_v48 = vmul.f32 -1.442695, %v6427_v2 }
 0x3e9   :  { %2526 = vst.msk [vmem:[#allocation3 + $0xa0] sm:$0x1] %vm2515_vm13, %v7997_v9  ;;  %4504 = vpow2.f32 %v4165_v62  ;;  %v6460_v18 = vadd.f32 %v6373_v32, %v2162_v25  ;;  %v4170_v53 = vmul.f32 -1.442695, %v6430_v44  ;;  %v6466_v0 = vadd.f32 %v6373_v32, %v2163_v7 }
 0x3ea   :  { %2546 = vst.msk [vmem:[#allocation3 + $0xa9] sm:$0x1] %vm2515_vm13, %v7997_v9  ;;  %4506 = vpow2.f32 %v4166_v3  ;;  %v4171_v41 = vmul.f32 -1.442695, %v6441_v28  ;;  %v4172_v38 = vmul.f32 -1.442695, %v6447_v22 }
 0x3eb   :  { %2507 = vst.msk [vmem:[#allocation3 + $0x8] sm:$0x3] %vm2506_vm12, %v7997_v9  ;;  %v4497_v59 = vpop.eup %4496  ;;  %4508 = vpow2.f32 %v4167_v39  ;;  %v4173_v8 = vmul.f32 -1.442695, %v6454_v49  ;;  %v4174_v57 = vmul.f32 -1.442695, %v6460_v18 }
 0x3ec   :  { %2512 = vst.msk [vmem:[#allocation3 + $0x98] sm:$0x3] %vm2506_vm12, %v7997_v9  ;;  %v4499_v51 = vpop.eup %4498  ;;  %4510 = vpow2.f32 %v4168_v13  ;;  %v4175_v35 = vmul.f32 -1.442695, %v6466_v0  ;;  %v6483_v58 = vadd.f32 1.0, %v4497_v59 }
 0x3ed   :  { %2514 = vst.msk [vmem:[#allocation3 + $0x138] sm:$0x3] %vm2506_vm12, %v7997_v9  ;;  %v4501_v30 = vpop.eup %4500  ;;  %4512 = vpow2.f32 %v4169_v48  ;;  %v6496_v12 = vadd.f32 1.0, %v4499_v51  ;;  %v6524_v37 = vmul.f32 -1.442695, %v6405_v50 }
 0x3ee   :  { %2516 = vst.msk [vmem:[#allocation3] sm:$0x1] %vm2515_vm13, %v7997_v9  ;;  %v4503_v32 = vpop.eup %4502  ;;  %4514 = vpow2.f32 %v4170_v53  ;;  %v6489_v21 = vadd.f32 1.0, %v4501_v30  ;;  %vm2254_vm2 = vweird.f32 %v6483_v58 }
 0x3ef   :  { %2517 = vst.msk [vmem:[#allocation3 + $0x10] sm:$0x1] %vm2515_vm13, %v7997_v9  ;;  %v4505_v19 = vpop.eup %4504  ;;  %4516 = vpow2.f32 %v4171_v41  ;;  %v6500_v5 = vadd.f32 1.0, %v4503_v32 }
 0x3f0   :  { %v2593_v17 = vld [vmem:[#allocation3 + $0xa0] sm:$0xff]  ;;  %2518 = vst.msk [vmem:[#allocation3 + $0x20] sm:$0x1] %vm2515_vm13, %v7997_v9  ;;  %v4507_v20 = vpop.eup %4506  ;;  %4518 = vpow2.f32 %v4172_v38  ;;  %v6505_v47 = vadd.f32 1.0, %v4505_v19  ;;  %v2288_v32 = vand.u32 2147483647, %v6489_v21  ;;  %vm2284_vm14 = vweird.f32 %v6489_v21 }
 0x3f1   :  { %v2594_v26 = vld [vmem:[#allocation3 + $0xa8] sm:$0x3]  ;;  %v6485_v6 = vpack.c.bf16 %v2593_v17, %v2593_v17  ;;  %2519 = vst.msk [vmem:[#allocation3 + $0x30] sm:$0x1] %vm2515_vm13, %v7997_v9  ;;  %v4509_v15 = vpop.eup %4508  ;;  %4520 = vpow2.f32 %v4173_v8  ;;  %v6512_v24 = vadd.f32 1.0, %v4507_v20 }
 0x3f2   :  { %v2634_v31 = vpack.c.bf16 %v2594_v26, %v2594_v26  ;;  %2520 = vst.msk [vmem:[#allocation3 + $0x40] sm:$0x1] %vm2515_vm13, %v7997_v9  ;;  %v4511_v63 = vpop.eup %4510  ;;  %4522 = vpow2.f32 %v4174_v57  ;;  %v6526_v25 = vadd.f32 1.0, %v4509_v15  ;;  %v2290_v57 = vand.u32 2147483648, %v6489_v21 }
 0x3f3   :  { %7998 = vst [vmem:[#allocation6_spill] sm:$0xff] %v6485_v6  ;;  %v2701_v34 = vunpack.c.l.b16 %v6485_v6  ;;  %v4513_v1 = vpop.eup %4512  ;;  %4524 = vpow2.f32 %v4175_v35  ;;  %v6533_v3 = vadd.f32 1.0, %v4511_v63  ;;  %v2258_v20 = vand.u32 2147483647, %v6483_v58 }
 0x3f4   :  { %2521 = vst.msk [vmem:[#allocation3 + $0x50] sm:$0x1] %vm2515_vm13, %v7997_v9  ;;  %v2702_v60 = vunpack.c.l.b16 %v2634_v31  ;;  %v4515_v36 = vpop.eup %4514  ;;  %4526 = vrcp.f32 %v6483_v58  ;;  %v6514_v40 = vadd.f32 1.0, %v4513_v1  ;;  %vm6599_vm8 = vcmp.eq.f32.partialorder %v2288_v32, 8.507059e+37 }
 0x3f5   :  { %2522 = vst.msk [vmem:[#allocation3 + $0x60] sm:$0x1] %vm2515_vm13, %v7997_v9  ;;  %v4517_v27 = vpop.eup %4516  ;;  %4528 = vrcp.f32 %v6489_v21  ;;  %v2573_v4 = vld [vmem:[#allocation3] sm:$0xff]  ;;  %v6528_v42 = vadd.f32 1.0, %v4515_v36  ;;  %vm6609_vm7 = vcmp.eq.f32.partialorder %v2258_v20, 8.507059e+37 }
 0x3f6   :  { %2523 = vst.msk [vmem:[#allocation3 + $0x70] sm:$0x1] %vm2515_vm13, %v7997_v9  ;;  %v6508_v45 = vpack.c.b16 %v2702_v60, %v2701_v34  ;;  %v4519_v43 = vpop.eup %4518  ;;  %4530 = vrcp.f32 %v6496_v12  ;;  %v6535_v7 = vadd.f32 1.0, %v4517_v27  ;;  %v6547_v53 = vpack.c.bf16 %v2573_v4, %v2573_v4 }
 0x3f7   :  { %2524 = vst.msk [vmem:[#allocation3 + $0x80] sm:$0x1] %vm2515_vm13, %v7997_v9  ;;  %v4521_v56 = vpop.eup %4520  ;;  %4532 = vrcp.f32 %v6500_v5  ;;  %v6542_v48 = vadd.f32 1.0, %v4519_v43  ;;  %v2380_v59 = vand.u32 2147483648, %v6514_v40  ;;  %v2378_v30 = vand.u32 2147483647, %v6514_v40 }
 0x3f8   :  { %7999 = vst [vmem:[#allocation19_spill] sm:$0xff] %v6508_v45  ;;  %v2790_v55 = vshrl.u32 %v6508_v45, 16  ;;  %v2792_v29 = vshll.u32 %v6508_v45, 16  ;;  %v4523_v11 = vpop.eup %4522  ;;  %4534 = vrcp.f32 %v6505_v47  ;;  %v6552_v51 = vadd.f32 1.0, %v4521_v56 }
 0x3f9   :  { %2525 = vst.msk [vmem:[#allocation3 + $0x90] sm:$0x1] %vm2515_vm13, %v7997_v9  ;;  %v4525_v62 = vpop.eup %4524  ;;  %4536 = vrcp.f32 %v6512_v24  ;;  %v6558_v8 = vadd.f32 1.0, %v4523_v11  ;;  %v6581_v31 = vor.u32 1.1754944e-38, %v2380_v59  ;;  %vm2374_vm4 = vweird.f32 %v6514_v40 }
 0x3fa   :  { %2527 = vst.msk [vmem:[#allocation3 + $0xb0] sm:$0x1] %vm2515_vm13, %v7997_v9  ;;  %v2794_v39 = vrot.slane %v2792_v29, 1  ;;  %v6540_v13 = vpop.eup %4526  ;;  %4538 = vrcp.f32 %v6514_v40  ;;  %v6567_v35 = vadd.f32 1.0, %v4525_v62  ;;  %v2291_v27 = vor.u32 1.1754944e-38, %v2290_v57 }
 0x3fb   :  { %2528 = vst.msk [vmem:[#allocation3 + $0xc0] sm:$0x1] %vm2515_vm13, %v7997_v9  ;;  %v6550_v41 = vpop.eup %4528  ;;  %4540 = vrcp.f32 %v6528_v42  ;;  %v2250_v63 = vmul.f32 %v6540_v13, %v6483_v58  ;;  %vm2255_vm0 = vweird.f32 %v6540_v13  ;;  %v2260_v4 = vand.u32 2147483648, %v6483_v58 }
 0x3fc   :  { %2529 = vst.msk [vmem:[#allocation3 + $0xd0] sm:$0x1] %vm2515_vm13, %v7997_v9  ;;  %v2795_v38 = vor.u32 %v2794_v39, %v2790_v55  ;;  %v6565_v19 = vpop.eup %4530  ;;  %4542 = vrcp.f32 %v6526_v25  ;;  %v2280_v17 = vmul.f32 %v6550_v41, %v6489_v21  ;;  %vm2285_vm6 = vweird.f32 %v6550_v41  ;;  %vm6668_vm3 = vmor %vm2254_vm2, %vm2255_vm0 }
 0x3fd   :  { %2530 = vst.msk [vmem:[#allocation3 + $0xe0] sm:$0x1] %vm2515_vm13, %v7997_v9  ;;  %v6576_v26 = vpop.eup %4532  ;;  %4544 = vrcp.f32 %v6535_v7  ;;  %v2251_v43 = vsub.f32 1.0, %v2250_v63  ;;  %vm6623_vm9 = vcmp.eq.f32.partialorder %v2378_v30, 8.507059e+37  ;;  %vm2389_vm10 = vweird.f32 %v6528_v42  ;;  %vm6651_vm1 = vmor %vm2284_vm14, %vm2285_vm6 }
 0x3fe   :  { %2531 = vst.msk [vmem:[#allocation3 + $0xf0] sm:$0x1] %vm2515_vm13, %v7997_v9  ;;  %2861 = vrot.lane.b32.xlu2 %v2795_v38, %s4578_s3  ;;  %v6586_v34 = vpop.eup %4534  ;;  %v2281_v1 = vsub.f32 1.0, %v2280_v17  ;;  %4546 = vrcp.f32 %v6542_v48  ;;  %v2295_v11 = vmul.f32 %v6576_v26, %v6500_v5  ;;  %v2393_v30 = vand.u32 2147483647, %v6528_v42 }
 0x3ff   :  { %2532 = vst.msk [vmem:[#allocation3 + $0x100] sm:$0x1] %vm2515_vm13, %v7997_v9  ;;  %v6594_v60 = vpop.eup %4536  ;;  %4548 = vrcp.f32 %v6552_v51  ;;  %v2252_v38 = vmul.f32 %v6540_v13, %v2251_v43  ;;  %vm2300_vm12 = vweird.f32 %v6576_v26  ;;  %vm2299_vm6 = vweird.f32 %v6500_v5 }
 0x400   :  { %2533 = vst.msk [vmem:[#allocation3 + $0x110] sm:$0x1] %vm2515_vm13, %v7997_v9  ;;  %v6604_v56 = vpop.eup %4538  ;;  %v2282_v55 = vmul.f32 %v6550_v41, %v2281_v1  ;;  %4550 = vrcp.f32 %v6558_v8  ;;  %v2395_v1 = vand.u32 2147483648, %v6528_v42  ;;  %v2296_v43 = vsub.f32 1.0, %v2295_v11 }
 0x401   :  { %2534 = vst.msk [vmem:[#allocation3 + $0x120] sm:$0x1] %vm2515_vm13, %v7997_v9  ;;  %v6616_v62 = vpop.eup %4540  ;;  %v2370_v39 = vmul.f32 %v6604_v56, %v6514_v40  ;;  %v2253_v63 = vadd.f32 %v6540_v13, %v2252_v38  ;;  %vm2375_vm15 = vweird.f32 %v6604_v56  ;;  %vm6680_vm14 = vcmp.eq.f32.partialorder %v2393_v30, 8.507059e+37 }
 0x402   :  { %2535 = vst.msk [vmem:[#allocation3 + $0x130] sm:$0x1] %vm2515_vm13, %v7997_v9  ;;  %v6629_v32 = vpop.eup %4542  ;;  %v2283_v57 = vadd.f32 %v6550_v41, %v2282_v55  ;;  %v2385_v17 = vmul.f32 %v6616_v62, %v6528_v42  ;;  %vm2390_vm11 = vweird.f32 %v6616_v62  ;;  %vm6694_vm2 = vmor %vm2374_vm4, %vm2375_vm15  ;;  %v2438_v21 = vand.u32 2147483647, %v6552_v51 }
 0x403   :  { %2537 = vst.msk [vmem:[#allocation3 + $0x19] sm:$0x1] %vm2515_vm13, %v7997_v9  ;;  %v2371_v20 = vsub.f32 1.0, %v2370_v39  ;;  %v6642_v15 = vpop.eup %4544  ;;  %v2261_v39 = vor.u32 1.1754944e-38, %v2260_v4  ;;  %v2297_v4 = vmul.f32 %v6576_v26, %v2296_v43  ;;  %v2305_v43 = vand.u32 2147483648, %v6500_v5  ;;  %vm6710_vm4 = vmor %vm2299_vm6, %vm2300_vm12 }
 0x404   :  { %2538 = vst.msk [vmem:[#allocation3 + $0x29] sm:$0x1] %vm2515_vm13, %v7997_v9  ;;  %v2386_v38 = vsub.f32 1.0, %v2385_v17  ;;  %v6656_v11 = vpop.eup %4546  ;;  %v2287_v6 = vsel %vm6651_vm1, %v6550_v41, %v2283_v57  ;;  %v2257_v17 = vsel %vm6668_vm3, %v6540_v13, %v2253_v63  ;;  %v2303_v63 = vand.u32 2147483647, %v6500_v5 }
 0x405   :  { %2539 = vst.msk [vmem:[#allocation3 + $0x39] sm:$0x1] %vm2515_vm13, %v7997_v9  ;;  %v2372_v45 = vmul.f32 %v6604_v56, %v2371_v20  ;;  %v6685_v58 = vpop.eup %4548  ;;  %v2298_v30 = vadd.f32 %v6576_v26, %v2297_v4  ;;  %v2265_v5 = vmul.f32 %v6565_v19, %v6496_v12  ;;  %v2273_v4 = vand.u32 2147483647, %v6496_v12 }
 0x406   :  { %2540 = vst.msk [vmem:[#allocation3 + $0x49] sm:$0x1] %vm2515_vm13, %v7997_v9  ;;  %v2387_v41 = vmul.f32 %v6616_v62, %v2386_v38  ;;  %v6701_v55 = vpop.eup %4550  ;;  %v2396_v38 = vor.u32 1.1754944e-38, %v2395_v1  ;;  %v2306_v1 = vor.u32 1.1754944e-38, %v2305_v43  ;;  %vm2304_vm0 = vcmp.eq.f32.partialorder %v2303_v63, 8.507059e+37 }
 0x407   :  { %2541 = vst.msk [vmem:[#allocation3 + $0x59] sm:$0x1] %vm2515_vm13, %v7997_v9  ;;  %v2373_v20 = vadd.f32 %v6604_v56, %v2372_v45  ;;  %v2292_v45 = vsel %vm6599_vm8, %v2291_v27, %v2287_v6  ;;  %v2262_v6 = vsel %vm6609_vm7, %v2261_v39, %v2257_v17  ;;  %vm2391_vm8 = vmor %vm2389_vm10, %vm2390_vm11  ;;  %v2302_v27 = vsel %vm6710_vm4, %v6576_v26, %v2298_v30  ;;  %v6743_v26 = vld [vmem:[%s7846_s9 + $0x30] sm:$0xff] }
 0x408   :  { %2542 = vst.msk [vmem:[#allocation3 + $0x69] sm:$0x1] %vm2515_vm13, %v7997_v9  ;;  %v2388_v40 = vadd.f32 %v6616_v62, %v2387_v41  ;;  %v2266_v39 = vsub.f32 1.0, %v2265_v5  ;;  %v2491_v42 = vmul.f32 %v2292_v45, %v6399_v14  ;;  %v2307_v59 = vsel %vm2304_vm0, %v2306_v1, %v2302_v27  ;;  %4404 = vmatpush.bf16.msrb.mxu3 %v6743_v26 }
 0x409   :  { %2543 = vst.msk [vmem:[#allocation3 + $0x79] sm:$0x1] %vm2515_vm13, %v7997_v9  ;;  %v2377_v36 = vsel %vm6694_vm2, %v6604_v56, %v2373_v20  ;;  %vm2270_vm7 = vweird.f32 %v6565_v19  ;;  %v2310_v20 = vmul.f32 %v6586_v34, %v6505_v47  ;;  %vm6764_vm10 = vcmp.eq.f32.partialorder %v2273_v4, 8.507059e+37 }
 0x40a   :  { %2544 = vst.msk [vmem:[#allocation3 + $0x89] sm:$0x1] %vm2515_vm13, %v7997_v9  ;;  %v2382_v56 = vsel %vm6623_vm9, %v6581_v31, %v2377_v36  ;;  %v2392_v29 = vsel %vm2391_vm8, %v6616_v62, %v2388_v40  ;;  %v2275_v31 = vand.u32 2147483648, %v6496_v12  ;;  %v2489_v62 = vmul.f32 %v2262_v6, %v6387_v46  ;;  %v4400_v6 = vld [vmem:[%s7847_s10 + $0x8] sm:$0xff] }
 0x40b   :  { %2547 = vst.msk [vmem:[#allocation3 + $0xb9] sm:$0x1] %vm2515_vm13, %v7997_v9  ;;  %v2397_v17 = vsel %vm6680_vm14, %v2396_v38, %v2392_v29  ;;  %v2267_v41 = vmul.f32 %v6565_v19, %v2266_v39  ;;  %v2497_v14 = vmul.f32 %v2382_v56, %v6427_v2  ;;  %vm2269_vm9 = vweird.f32 %v6496_v12  ;;  %3435 = vmatpush.bf16.msra.mxu0 %v4400_v6 }
 0x40c   :  { %2548 = vst.msk [vmem:[#allocation3 + $0xc9] sm:$0x1] %vm2515_vm13, %v7997_v9  ;;  %v2498_v57 = vmul.f32 %v2397_v17, %v6430_v44  ;;  %v2276_v30 = vor.u32 1.1754944e-38, %v2275_v31  ;;  %v2430_v2 = vmul.f32 %v6685_v58, %v6552_v51  ;;  %v2492_v44 = vmul.f32 %v2307_v59, %v6402_v33  ;;  %vm2271_vm15 = vmor %vm2269_vm9, %vm2270_vm7  ;;  %v4399_v17 = vld [vmem:[%s7847_s10] sm:$0xff]  ;;  %v4561_v31 = vld [vmem:[%s7838_s0 + $0x8] sm:$0xff]  ;;  %4401 = vmatpush.bf16.msrb.mxu1 %v4400_v6 }
 0x40d   :  { %2549 = vst.msk [vmem:[#allocation3 + $0xd9] sm:$0x1] %vm2515_vm13, %v7997_v9  ;;  %v2268_v46 = vadd.f32 %v6565_v19, %v2267_v41  ;;  %v2311_v12 = vsub.f32 1.0, %v2310_v20  ;;  %v2318_v63 = vand.u32 2147483647, %v6505_v47  ;;  %v2320_v43 = vand.u32 2147483648, %v6505_v47 }
 0x40e   :  { %2550 = vst.msk [vmem:[#allocation3 + $0xe9] sm:$0x1] %vm2515_vm13, %v7997_v9  ;;  %vm2314_vm1 = vweird.f32 %v6505_v47  ;;  %vm2315_vm11 = vweird.f32 %v6586_v34  ;;  %v2431_v40 = vsub.f32 1.0, %v2430_v2  ;;  %v2440_v5 = vand.u32 2147483648, %v6552_v51  ;;  %v4560_v47 = vld [vmem:[%s7838_s0] sm:$0xff] }
 0x40f   :  { %2551 = vst.msk [vmem:[#allocation3 + $0xf9] sm:$0x1] %vm2515_vm13, %v7997_v9  ;;  %v2272_v45 = vsel %vm2271_vm15, %v6565_v19, %v2268_v46  ;;  %v2312_v38 = vmul.f32 %v6586_v34, %v2311_v12  ;;  %vm2434_vm3 = vweird.f32 %v6552_v51  ;;  %vm2435_vm12 = vweird.f32 %v6685_v58  ;;  %vm6808_vm14 = vmor %vm2314_vm1, %vm2315_vm11  ;;  %3436 = vmatpush.bf16.msra.mxu0 %v4399_v17 }
 0x410   :  { %2552 = vst.msk [vmem:[#allocation3 + $0x109] sm:$0x1] %vm2515_vm13, %v7997_v9  ;;  %v2277_v33 = vsel %vm6764_vm10, %v2276_v30, %v2272_v45  ;;  %v2432_v19 = vmul.f32 %v6685_v58, %v2431_v40  ;;  %v2321_v56 = vor.u32 1.1754944e-38, %v2320_v43  ;;  %v2408_v4 = vand.u32 2147483647, %v6535_v7  ;;  %vm2436_vm6 = vmor %vm2434_vm3, %vm2435_vm12  ;;  %4402 = vmatpush.bf16.msrb.mxu1 %v4399_v17 }
 0x411   :  { %2553 = vst.msk [vmem:[#allocation3 + $0x119] sm:$0x1] %vm2515_vm13, %v7997_v9  ;;  %v2490_v36 = vmul.f32 %v2277_v33, %v6392_v16  ;;  %v2313_v27 = vadd.f32 %v6586_v34, %v2312_v38  ;;  %vm2439_vm2 = vcmp.eq.f32.partialorder %v2438_v21, 8.507059e+37  ;;  %v2441_v41 = vor.u32 1.1754944e-38, %v2440_v5 }
 0x412   :  { %2554 = vst.msk [vmem:[#allocation3 + $0x129] sm:$0x1] %vm2515_vm13, %v7997_v9  ;;  %v2433_v16 = vadd.f32 %v6685_v58, %v2432_v19  ;;  %vm2405_vm4 = vweird.f32 %v6642_v15  ;;  %vm6846_vm8 = vcmp.eq.f32.partialorder %v2408_v4, 8.507059e+37  ;;  %4552 = vrcp.f32 %v6567_v35 }
 0x413   :  { %2536 = vst.msk [vmem:[#allocation3 + $0x9] sm:$0x1] %vm2515_vm13, %v7997_v9  ;;  %v2317_v59 = vsel %vm6808_vm14, %v6586_v34, %v2313_v27  ;;  %v6839_v34 = vmul.f32 %v6594_v60, %v6512_v24  ;;  %vm2404_vm0 = vweird.f32 %v6535_v7  ;;  %3778 = vmatpush.bf16.msrb.mxu0 %v6437_v52  ;;  %v8026_v19 = vunpack.c.l.b16 %v6547_v53 }
 0x414   :  { %2545 = vst.msk [vmem:[#allocation3 + $0x99] sm:$0x1] %vm2515_vm13, %v7997_v9  ;;  %v2437_v20 = vsel %vm2436_vm6, %v6685_v58, %v2433_v16  ;;  %vm6859_vm7 = vmor %vm2404_vm0, %vm2405_vm4  ;;  %vm8028_vm9 = vcmask 261120   ;;  %vm2330_vm10 = vweird.f32 %v6594_v60  ;;  %vm2329_vm15 = vweird.f32 %v6512_v24 }
 0x415   :  { %2555 = vst.msk [vmem:[#allocation3 + $0x139] sm:$0x1] %vm2515_vm13, %v7997_v9  ;;  %v2400_v9 = vmul.f32 %v6642_v15, %v6535_v7  ;;  %vm6799_vm13 = vcmp.eq.f32.partialorder %v2318_v63, 8.507059e+37  ;;  %v2442_v30 = vsel %vm2439_vm2, %v2441_v41, %v2437_v20  ;;  %vm2449_vm1 = vweird.f32 %v6558_v8  ;;  %vm2331_vm12 = vmor %vm2329_vm15, %vm2330_vm10 }
 0x416   :  { %2565 = vst.msk [vmem:[#allocation3 + $0xb1] sm:$0xff] %vm1296_vm5, %v2497_v14  ;;  %v2501_v2 = vmul.f32 %v2442_v30, %v6454_v49  ;;  %vm2450_vm3 = vweird.f32 %v6701_v55  ;;  %vm2420_vm6 = vweird.f32 %v6656_v11  ;;  %4554 = vrcp.f32 %v6533_v3  ;;  %vm8039_vm2 = vmmov %vm8028_vm9 }
 0x417   :  { %2559 = vst.msk [vmem:[#allocation3 + $0x31] sm:$0xff] %vm1296_vm5, %v2491_v42  ;;  %v2401_v39 = vsub.f32 1.0, %v2400_v9  ;;  %v2410_v42 = vand.u32 2147483648, %v6535_v7  ;;  %v2326_v7 = vsub.f32 1.0, %v6839_v34  ;;  %3779 = vmatpush.bf16.msrb.mxu0 %v6743_v26  ;;  %v4368_v26 = vld [vmem:[%s7846_s9 + $0x28] sm:$0xff]  ;;  %vm2419_vm4 = vweird.f32 %v6542_v48 }
 0x418   :  { %2557 = vst.msk [vmem:[#allocation3 + $0x11] sm:$0xff] %vm1296_vm5, %v2489_v62  ;;  %v3381_v62 = vpack.c.bf16 %v4561_v31, %v4560_v47  ;;  %4405 = vmatpush.bf16.msrb.mxu3 %v4368_v26  ;;  %4556 = vpow2.f32 %v6524_v37 }
 0x419   :  { %2566 = vst.msk [vmem:[#allocation3 + $0xc1] sm:$0xff] %vm1296_vm5, %v2498_v57  ;;  %v2322_v57 = vsel %vm6799_vm13, %v2321_v56, %v2317_v59  ;;  %v2402_v46 = vmul.f32 %v6642_v15, %v2401_v39  ;;  %v2411_v12 = vor.u32 1.1754944e-38, %v2410_v42  ;;  %vm2451_vm13 = vmor %vm2449_vm1, %vm2450_vm3  ;;  %vm2345_vm1 = vweird.f32 %v6629_v32 }
 0x41a   :  { %v2574_v14 = vld [vmem:[#allocation3 + $0x8] sm:$0x3]  ;;  %2560 = vst.msk [vmem:[#allocation3 + $0x41] sm:$0xff] %vm1296_vm5, %v2492_v44  ;;  %v2493_v51 = vmul.f32 %v2322_v57, %v6410_v10  ;;  %v2333_v10 = vand.u32 2147483647, %v6512_v24  ;;  %4185 = vmatmul.msk.bf16.vlgmr.msra.gmra.mxu0 %vm8028_vm9, %v3381_v62  ;;  %v6895_v62 = vpop.eup %4552  ;;  %vm2464_vm9 = vweird.f32 %v6567_v35 }
 0x41b   :  { %v2614_v13 = vpack.c.bf16 %v2574_v14, %v2574_v14  ;;  %2558 = vst.msk [vmem:[#allocation3 + $0x21] sm:$0xff] %vm1296_vm5, %v2490_v36  ;;  %v2403_v44 = vadd.f32 %v6642_v15, %v2402_v46  ;;  %3780 = vmatpush.bf16.msrb.mxu0 %v4368_v26 }
 0x41c   :  { %2561 = vst.msk [vmem:[#allocation3 + $0x51] sm:$0xff] %vm1296_vm5, %v2493_v51  ;;  %vm6968_vm11 = vcmp.eq.f32.partialorder %v2333_v10, 8.507059e+37  ;;  %v2327_v10 = vmul.f32 %v6594_v60, %v2326_v7 }
 0x41d   :  { %v2686_v63 = vunpack.c.l.b16 %v2614_v13  ;;  %v2595_v43 = vld [vmem:[#allocation3 + $0xb0] sm:$0xff]  ;;  %v2596_v45 = vld [vmem:[#allocation3 + $0xb8] sm:$0x3]  ;;  %2569 = vst.msk [vmem:[#allocation3 + $0xf1] sm:$0xff] %vm1296_vm5, %v2501_v2  ;;  %v2407_v56 = vsel %vm6859_vm7, %v6642_v15, %v2403_v44  ;;  %vm2465_vm7 = vweird.f32 %v6895_v62 }
 0x41e   :  { %v6854_v49 = vpack.c.bf16 %v2595_v43, %v2595_v43  ;;  %v2636_v40 = vpack.c.bf16 %v2596_v45, %v2596_v45  ;;  %v2579_v33 = vld [vmem:[#allocation3 + $0x30] sm:$0xff]  ;;  %v2580_v38 = vld [vmem:[#allocation3 + $0x38] sm:$0x3]  ;;  %v2328_v7 = vadd.f32 %v6594_v60, %v2327_v10  ;;  %vm2466_vm15 = vmor %vm2464_vm9, %vm2465_vm7 }
 0x41f   :  { %v6868_v9 = vpack.c.b16 %v2686_v63, %v8026_v19  ;;  %v6870_v36 = vpack.c.bf16 %v2579_v33, %v2579_v33  ;;  %v2620_v6 = vpack.c.bf16 %v2580_v38, %v2580_v38  ;;  %v2575_v27 = vld [vmem:[#allocation3 + $0x10] sm:$0xff]  ;;  %v2576_v1 = vld [vmem:[#allocation3 + $0x18] sm:$0x3] }
 0x420   :  { %v6876_v29 = vunpack.c.l.b16 %v6854_v49  ;;  %v2704_v52 = vunpack.c.l.b16 %v2636_v40  ;;  %v6878_v16 = vpack.c.bf16 %v2575_v27, %v2575_v27  ;;  %v2616_v39 = vpack.c.bf16 %v2576_v1, %v2576_v1  ;;  %v2597_v4 = vld [vmem:[#allocation3 + $0xc0] sm:$0xff]  ;;  %v2598_v42 = vld [vmem:[#allocation3 + $0xc8] sm:$0x3] }
 0x421   :  { %8027 = vst [vmem:[#allocation4_spill] sm:$0xff] %v6868_v9  ;;  %v2734_v17 = vshrl.u32 %v6868_v9, 16  ;;  %v2736_v47 = vshll.u32 %v6868_v9, 16  ;;  %v6884_v31 = vunpack.c.l.b16 %v6870_v36  ;;  %v2692_v59 = vunpack.c.l.b16 %v2620_v6  ;;  %v2581_v15 = vld [vmem:[#allocation3 + $0x40] sm:$0xff]  ;;  %v2582_v30 = vld [vmem:[#allocation3 + $0x48] sm:$0x3] }
 0x422   :  { %v6887_v41 = vpack.c.b16 %v2704_v52, %v6876_v29  ;;  %v6890_v14 = vunpack.c.l.b16 %v6878_v16  ;;  %v2688_v57 = vunpack.c.l.b16 %v2616_v39  ;;  %v6892_v20 = vpack.c.bf16 %v2597_v4, %v2597_v4  ;;  %v2577_v45 = vld [vmem:[#allocation3 + $0x20] sm:$0xff]  ;;  %v2578_v19 = vld [vmem:[#allocation3 + $0x28] sm:$0x3] }
 0x423   :  { %v2738_v46 = vrot.slane %v2736_v47, 1  ;;  %v6898_v13 = vpack.c.b16 %v2692_v59, %v6884_v31  ;;  %v2638_v51 = vpack.c.bf16 %v2598_v42, %v2598_v42  ;;  %v6900_v2 = vpack.c.bf16 %v2581_v15, %v2581_v15  ;;  %v2583_v58 = vld [vmem:[#allocation3 + $0x50] sm:$0xff] }
 0x424   :  { %v2799_v44 = vshll.u32 %v6887_v41, 16  ;;  %v6904_v63 = vpack.c.b16 %v2688_v57, %v6890_v14  ;;  %v6907_v43 = vunpack.c.l.b16 %v6892_v20  ;;  %v6914_v40 = vmul.f32 %v6701_v55, %v6558_v8 }
 0x425   :  { %v2739_v33 = vor.u32 %v2738_v46, %v2734_v17  ;;  %v2757_v38 = vshll.u32 %v6898_v13, 16  ;;  %v2706_v21 = vunpack.c.l.b16 %v2638_v51  ;;  %v2412_v6 = vsel %vm6846_vm8, %v2411_v12, %v2407_v56  ;;  %v2584_v12 = vld [vmem:[#allocation3 + $0x58] sm:$0x3]  ;;  %v2603_v46 = vld [vmem:[#allocation3 + $0xf0] sm:$0xff]  ;;  %vm2421_vm8 = vmor %vm2419_vm4, %vm2420_vm6 }
 0x426   :  { %v2801_v27 = vrot.slane %v2799_v44, 1  ;;  %v2755_v1 = vshrl.u32 %v6898_v13, 16  ;;  %v2743_v52 = vshll.u32 %v6904_v63, 16  ;;  %v2622_v39 = vpack.c.bf16 %v2582_v30, %v2582_v30  ;;  %v2604_v51 = vld [vmem:[#allocation3 + $0xf8] sm:$0x3] }
 0x427   :  { %2845 = vrot.lane.b32.xlu0 %v2739_v33, %s4578_s3  ;;  %v2759_v4 = vrot.slane %v2757_v38, 1  ;;  %v6923_v42 = vpack.c.b16 %v2706_v21, %v6907_v43  ;;  %v6926_v17 = vunpack.c.l.b16 %v6900_v2  ;;  %v6928_v47 = vpack.c.bf16 %v2577_v45, %v2577_v45 }
 0x428   :  { %v2741_v56 = vshrl.u32 %v6904_v63, 16  ;;  %v2745_v59 = vrot.slane %v2743_v52, 1  ;;  %v2694_v15 = vunpack.c.l.b16 %v2622_v39  ;;  %v2618_v57 = vpack.c.bf16 %v2578_v19, %v2578_v19 }
 0x429   :  { %v2797_v30 = vshrl.u32 %v6887_v41, 16  ;;  %v6933_v44 = vor.u32 %v2759_v4, %v2755_v1  ;;  %v2806_v26 = vshll.u32 %v6923_v42, 16  ;;  %v6937_v45 = vunpack.c.l.b16 %v6928_v47 }
 0x42a   :  { %v6939_v33 = vor.u32 %v2745_v59, %v2741_v56  ;;  %v6942_v38 = vpack.c.b16 %v2694_v15, %v6926_v17  ;;  %v2690_v21 = vunpack.c.l.b16 %v2618_v57  ;;  %v6944_v19 = vpack.c.bf16 %v2583_v58, %v2583_v58 }
 0x42b   :  { %8029 = vst [vmem:[#allocation17_spill] sm:$0xff] %v6933_v44  ;;  %v6947_v52 = vor.u32 %v2801_v27, %v2797_v30  ;;  %2851 = vrot.lane.b32.xlu2 %v6933_v44, %s4578_s3  ;;  %v2624_v1 = vpack.c.bf16 %v2584_v12, %v2584_v12  ;;  %v6951_v39 = vpack.c.bf16 %v2603_v46, %v2603_v46  ;;  %v2808_v46 = vrot.slane %v2806_v26, 1 }
 0x42c   :  { %8030 = vst [vmem:[#allocation14_spill] sm:$0xff] %v6939_v33  ;;  %v2644_v4 = vpack.c.bf16 %v2604_v51, %v2604_v51  ;;  %2847 = vrot.lane.b32.xlu1 %v6939_v33, %s4578_s3  ;;  %v2764_v56 = vshll.u32 %v6942_v38, 16  ;;  %v6957_v59 = vpack.c.b16 %v2690_v21, %v6937_v45  ;;  %v6960_v58 = vunpack.c.l.b16 %v6944_v19 }
 0x42d   :  { %8031 = vst [vmem:[#allocation13_spill] sm:$0xff] %v6947_v52  ;;  %v2696_v27 = vunpack.c.l.b16 %v2624_v1  ;;  %v6964_v15 = vunpack.c.l.b16 %v6951_v39  ;;  %v2499_v21 = vmul.f32 %v2412_v6, %v6441_v28  ;;  %v2762_v1 = vshrl.u32 %v6942_v38, 16 }
 0x42e   :  { %v2712_v12 = vunpack.c.l.b16 %v2644_v4  ;;  %v2766_v51 = vrot.slane %v2764_v56, 1  ;;  %v2750_v30 = vshll.u32 %v6957_v59, 16  ;;  %v2804_v26 = vshrl.u32 %v6923_v42, 16 }
 0x42f   :  { %2863 = vrot.lane.b32.xlu0 %v6947_v52, %s4578_s3  ;;  %v6978_v5 = vpack.c.b16 %v2696_v27, %v6960_v58  ;;  %v2748_v56 = vshrl.u32 %v6957_v59, 16  ;;  %2567 = vst.msk [vmem:[#allocation3 + $0xd1] sm:$0xff] %vm1296_vm5, %v2499_v21  ;;  %v2446_v6 = vsub.f32 1.0, %v6914_v40  ;;  %v8037_v40 = vand.u32 2147483648, %v6512_v24 }
 0x430   :  { %v6981_v4 = vpack.c.b16 %v2712_v12, %v6964_v15  ;;  %v2752_v28 = vrot.slane %v2750_v30, 1  ;;  %v6990_v52 = vor.u32 %v2766_v51, %v2762_v1  ;;  %v2453_v30 = vand.u32 2147483647, %v6558_v8 }
 0x431   :  { %v2771_v27 = vshll.u32 %v6978_v5, 16  ;;  %v2447_v44 = vmul.f32 %v6701_v55, %v2446_v6  ;;  %v7000_v33 = vor.u32 %v2808_v46, %v2804_v26  ;;  %v2336_v51 = vor.u32 1.1754944e-38, %v8037_v40 }
 0x432   :  { %8034 = vst [vmem:[#allocation15_spill] sm:$0xff] %v6990_v52  ;;  %v2827_v12 = vshll.u32 %v6981_v4, 16  ;;  %v6995_v34 = vor.u32 %v2752_v28, %v2748_v56  ;;  %v2455_v21 = vand.u32 2147483648, %v6558_v8  ;;  %v2415_v1 = vmul.f32 %v6656_v11, %v6542_v48 }
 0x433   :  { %8036 = vst [vmem:[#allocation16_spill] sm:$0xff] %v7000_v33  ;;  %2853 = vrot.lane.b32.xlu2 %v6990_v52, %s4578_s3  ;;  %v2773_v46 = vrot.slane %v2771_v27, 1  ;;  %v2825_v10 = vshrl.u32 %v6981_v4, 16  ;;  %v2332_v26 = vsel %vm2331_vm12, %v6594_v60, %v2328_v7  ;;  %v2448_v56 = vadd.f32 %v6701_v55, %v2447_v44  ;;  %v4562_v7 = vld [vmem:[%s7838_s0 + $0x10] sm:$0xff] }
 0x434   :  { %8035 = vst [vmem:[#allocation8_spill] sm:$0xff] %v6995_v34  ;;  %2849 = vrot.lane.b32.xlu1 %v6995_v34, %s4578_s3  ;;  %v2829_v28 = vrot.slane %v2827_v12, 1  ;;  %v2337_v24 = vsel %vm6968_vm11, %v2336_v51, %v2332_v26  ;;  %vm2454_vm14 = vcmp.eq.f32.partialorder %v2453_v30, 8.507059e+37  ;;  %v2456_v6 = vor.u32 1.1754944e-38, %v2455_v21 }
 0x435   :  { %v2494_v40 = vmul.f32 %v2337_v24, %v6414_v61  ;;  %v2452_v27 = vsel %vm2451_vm13, %v6701_v55, %v2448_v56  ;;  %v2416_v52 = vsub.f32 1.0, %v2415_v1  ;;  %v2423_v12 = vand.u32 2147483647, %v6542_v48  ;;  %v4563_v61 = vld [vmem:[%s7838_s0 + $0x18] sm:$0xff]  ;;  %vm8045_vm13 = vmmov %vm8039_vm2 }
 0x436   :  { %v2599_v60 = vld [vmem:[#allocation3 + $0xd0] sm:$0xff]  ;;  %v2600_v44 = vld [vmem:[#allocation3 + $0xd8] sm:$0x3]  ;;  %v2457_v57 = vsel %vm2454_vm14, %v2456_v6, %v2452_v27  ;;  %v2425_v8 = vand.u32 2147483648, %v6542_v48  ;;  %v3382_v55 = vpack.c.bf16 %v4563_v61, %v4562_v7  ;;  %v2769_v26 = vshrl.u32 %v6978_v5, 16 }
 0x437   :  { %2865 = vrot.lane.b32.xlu0 %v7000_v33, %s4578_s3  ;;  %v7037_v30 = vpack.c.bf16 %v2599_v60, %v2599_v60  ;;  %v2640_v51 = vpack.c.bf16 %v2600_v44, %v2600_v44  ;;  %2562 = vst.msk [vmem:[#allocation3 + $0x61] sm:$0xff] %vm1296_vm5, %v2494_v40  ;;  %v2502_v21 = vmul.f32 %v2457_v57, %v6460_v18  ;;  %v2468_v40 = vand.u32 2147483647, %v6567_v35 }
 0x438   :  { %v2417_v1 = vmul.f32 %v6656_v11, %v2416_v52  ;;  %v7044_v56 = vor.u32 %v2829_v28, %v2825_v10  ;;  %4186 = vmatmul.msk.bf16.gmra.mxu0 %vm8039_vm2, %v3382_v55  ;;  %v2460_v24 = vmul.f32 %v6895_v62, %v6567_v35  ;;  %v7055_v52 = vor.u32 %v2773_v46, %v2769_v26 }
 0x439   :  { %v7050_v6 = vunpack.c.l.b16 %v7037_v30  ;;  %v2708_v27 = vunpack.c.l.b16 %v2640_v51  ;;  %2570 = vst.msk [vmem:[#allocation3 + $0x101] sm:$0xff] %vm1296_vm5, %v2502_v21  ;;  %v2426_v10 = vor.u32 1.1754944e-38, %v2425_v8  ;;  %vm2424_vm0 = vcmp.eq.f32.partialorder %v2423_v12, 8.507059e+37  ;;  %v4367_v8 = vld [vmem:[%s7846_s9 + $0x20] sm:$0xff]  ;;  %v7077_v12 = vpop.eup %4554 }
 0x43a   :  { %8038 = vst [vmem:[#allocation18_spill] sm:$0xff] %v7044_v56  ;;  %v2418_v18 = vadd.f32 %v6656_v11, %v2417_v1  ;;  %v2461_v28 = vsub.f32 1.0, %v2460_v24  ;;  %v2340_v48 = vmul.f32 %v6629_v32, %v6526_v25  ;;  %v2470_v7 = vand.u32 2147483648, %v6567_v35  ;;  %4406 = vmatpush.bf16.msrb.mxu3 %v4367_v8  ;;  %3781 = vmatpush.bf16.msrb.mxu0 %v4367_v8 }
 0x43b   :  { %8040 = vst [vmem:[#allocation7_spill] sm:$0xff] %v7055_v52  ;;  %2871 = vrot.lane.b32.xlu2 %v7044_v56, %s4578_s3  ;;  %v7063_v60 = vpack.c.b16 %v2708_v27, %v7050_v6  ;;  %vm7083_vm10 = vcmp.eq.f32.partialorder %v2468_v40, 8.507059e+37  ;;  %vm2344_vm11 = vweird.f32 %v6526_v25  ;;  %vm2360_vm14 = vweird.f32 %v7077_v12 }
 0x43c   :  { %v2422_v44 = vsel %vm2421_vm8, %v6656_v11, %v2418_v18  ;;  %v2462_v57 = vmul.f32 %v6895_v62, %v2461_v28  ;;  %v2341_v11 = vsub.f32 1.0, %v2340_v48  ;;  %vm2346_vm3 = vmor %vm2344_vm11, %vm2345_vm1  ;;  %vm2359_vm6 = vweird.f32 %v6533_v3 }
 0x43d   :  { %v2427_v46 = vsel %vm2424_vm0, %v2426_v10, %v2422_v44  ;;  %v2813_v61 = vshll.u32 %v7063_v60, 16  ;;  %v2811_v51 = vshrl.u32 %v7063_v60, 16  ;;  %vm2361_vm2 = vmor %vm2359_vm6, %vm2360_vm14 }
 0x43e   :  { %v2500_v55 = vmul.f32 %v2427_v46, %v6447_v22  ;;  %v2585_v21 = vld [vmem:[#allocation3 + $0x60] sm:$0xff]  ;;  %v2586_v1 = vld [vmem:[#allocation3 + $0x68] sm:$0x3]  ;;  %v2463_v26 = vadd.f32 %v6895_v62, %v2462_v57  ;;  %v2350_v22 = vand.u32 2147483648, %v6526_v25  ;;  %v2342_v28 = vmul.f32 %v6629_v32, %v2341_v11  ;;  %vm8049_vm8 = vmmov %vm8045_vm13 }
 0x43f   :  { %2855 = vrot.lane.b32.xlu0 %v7055_v52, %s4578_s3  ;;  %v2815_v27 = vrot.slane %v2813_v61, 1  ;;  %v7088_v18 = vpack.c.bf16 %v2585_v21, %v2585_v21  ;;  %v2626_v10 = vpack.c.bf16 %v2586_v1, %v2586_v1  ;;  %v2471_v46 = vor.u32 1.1754944e-38, %v2470_v7  ;;  %vm8051_vm1 = vmmov %vm8049_vm8 }
 0x440   :  { %2568 = vst.msk [vmem:[#allocation3 + $0xe1] sm:$0xff] %vm1296_vm5, %v2500_v55  ;;  %v2605_v40 = vld [vmem:[#allocation3 + $0x100] sm:$0xff]  ;;  %v2606_v44 = vld [vmem:[#allocation3 + $0x108] sm:$0x3]  ;;  %v2467_v48 = vsel %vm2466_vm15, %v6895_v62, %v2463_v26  ;;  %v2348_v57 = vand.u32 2147483647, %v6526_v25  ;;  %v2343_v11 = vadd.f32 %v6629_v32, %v2342_v28  ;;  %vm8050_vm15 = vmmov %vm8049_vm8 }
 0x441   :  { %v7099_v61 = vor.u32 %v2815_v27, %v2811_v51  ;;  %v7102_v55 = vunpack.c.l.b16 %v7088_v18  ;;  %v2698_v21 = vunpack.c.l.b16 %v2626_v10  ;;  %v7104_v35 = vpack.c.bf16 %v2605_v40, %v2605_v40  ;;  %v4564_v25 = vld [vmem:[%s7838_s0 + $0x20] sm:$0xff]  ;;  %v4565_v10 = vld [vmem:[%s7838_s0 + $0x28] sm:$0xff]  ;;  %vm8053_vm11 = vmmov %vm8051_vm1 }
 0x442   :  { %v2646_v1 = vpack.c.bf16 %v2606_v44, %v2606_v44  ;;  %v2472_v8 = vsel %vm7083_vm10, %v2471_v46, %v2467_v48  ;;  %v2351_v26 = vor.u32 1.1754944e-38, %v2350_v22  ;;  %v2347_v24 = vsel %vm2346_vm3, %v6629_v32, %v2343_v11  ;;  %vm8054_vm3 = vmmov %vm8051_vm1 }
 0x443   :  { %8043 = vst [vmem:[#allocation5_spill] sm:$0xff] %v7099_v61  ;;  %2867 = vrot.lane.b32.xlu1 %v7099_v61, %s4578_s3  ;;  %v7113_v62 = vpack.c.b16 %v2698_v21, %v7102_v55  ;;  %v7116_v7 = vunpack.c.l.b16 %v7104_v35  ;;  %v2503_v51 = vmul.f32 %v2472_v8, %v6466_v0  ;;  %vm2349_vm12 = vcmp.eq.f32.partialorder %v2348_v57, 8.507059e+37 }
 0x444   :  { %8044 = vst [vmem:[#allocation9_spill] sm:$0xff] %v7104_v35  ;;  %v2714_v27 = vunpack.c.l.b16 %v2646_v1  ;;  %v3383_v28 = vpack.c.bf16 %v4565_v10, %v4564_v25  ;;  %v2352_v0 = vsel %vm2349_vm12, %v2351_v26, %v2347_v24  ;;  %v2355_v24 = vmul.f32 %v7077_v12, %v6533_v3  ;;  %v4557_v25 = vpop.eup %4556 }
 0x445   :  { %v2778_v40 = vshll.u32 %v7113_v62, 16  ;;  %2571 = vst.msk [vmem:[#allocation3 + $0x111] sm:$0xff] %vm1296_vm5, %v2503_v51  ;;  %v2495_v48 = vmul.f32 %v2352_v0, %v6419_v54  ;;  %v2776_v46 = vshrl.u32 %v7113_v62, 16  ;;  %v4394_v0 = vld [vmem:[%s7846_s9 + $0xf8] sm:$0xff] }
 0x446   :  { %v7130_v22 = vpack.c.b16 %v2714_v27, %v7116_v7  ;;  %3925 = vmatpush.bf16.msrb.mxu2 %v4394_v0 }
 0x447   :  { %v2601_v32 = vld [vmem:[#allocation3 + $0xe0] sm:$0xff]  ;;  %v2602_v44 = vld [vmem:[#allocation3 + $0xe8] sm:$0x3]  ;;  %v2780_v57 = vrot.slane %v2778_v40, 1  ;;  %2563 = vst.msk [vmem:[#allocation3 + $0x71] sm:$0xff] %vm1296_vm5, %v2495_v48 }
 0x448   :  { %v7134_v21 = vpack.c.bf16 %v2601_v32, %v2601_v32  ;;  %v2642_v1 = vpack.c.bf16 %v2602_v44, %v2602_v44  ;;  %v2834_v8 = vshll.u32 %v7130_v22, 16  ;;  %4187 = vmatmul.msk.bf16.gmra.mxu0 %vm8045_vm13, %v3383_v28  ;;  %v2832_v54 = vshrl.u32 %v7130_v22, 16 }
 0x449   :  { %v7139_v37 = vor.u32 %v2780_v57, %v2776_v46  ;;  %v4366_v46 = vld [vmem:[%s7846_s9 + $0x18] sm:$0xff]  ;;  %v2356_v57 = vsub.f32 1.0, %v2355_v24 }
 0x44a   :  { %v7142_v11 = vunpack.c.l.b16 %v7134_v21  ;;  %v2710_v51 = vunpack.c.l.b16 %v2642_v1  ;;  %v2836_v26 = vrot.slane %v2834_v8, 1  ;;  %4407 = vmatpush.bf16.msrb.mxu3 %v4366_v46  ;;  %3782 = vmatpush.bf16.msrb.mxu0 %v4366_v46 }
 0x44b   :  { %8046 = vst [vmem:[#allocation10_spill] sm:$0xff] %v7139_v37  ;;  %2857 = vrot.lane.b32.xlu0 %v7139_v37, %s4578_s3 }
 0x44c   :  { %v7148_v27 = vpack.c.b16 %v2710_v51, %v7142_v11  ;;  %v7152_v10 = vor.u32 %v2836_v26, %v2832_v54  ;;  %v2607_v28 = vld [vmem:[#allocation3 + $0x110] sm:$0xff]  ;;  %v2608_v40 = vld [vmem:[#allocation3 + $0x118] sm:$0x3] }
 0x44d   :  { %v7158_v44 = vpack.c.bf16 %v2607_v28, %v2607_v28  ;;  %v2648_v48 = vpack.c.bf16 %v2608_v40, %v2608_v40  ;;  %v7169_v40 = vadd.f32 1.0, %v4557_v25 }
 0x44e   :  { %8047 = vst [vmem:[#allocation12_spill] sm:$0xff] %v7152_v10  ;;  %v2820_v32 = vshll.u32 %v7148_v27, 16  ;;  %2873 = vrot.lane.b32.xlu2 %v7152_v10, %s4578_s3  ;;  %v2818_v1 = vshrl.u32 %v7148_v27, 16  ;;  %v2587_v26 = vld [vmem:[#allocation3 + $0x70] sm:$0xff]  ;;  %v2588_v28 = vld [vmem:[#allocation3 + $0x78] sm:$0x3]  ;;  %v2357_v10 = vmul.f32 %v7077_v12, %v2356_v57 }
 0x44f   :  { %v7167_v51 = vunpack.c.l.b16 %v7158_v44  ;;  %v2716_v54 = vunpack.c.l.b16 %v2648_v48  ;;  %v7171_v56 = vpack.c.bf16 %v2587_v26, %v2587_v26  ;;  %v2628_v61 = vpack.c.bf16 %v2588_v28, %v2588_v28  ;;  %v2591_v28 = vld [vmem:[#allocation3 + $0x90] sm:$0xff] }
 0x450   :  { %v2822_v8 = vrot.slane %v2820_v32, 1  ;;  %v2365_v32 = vand.u32 2147483648, %v6533_v3  ;;  %v2358_v25 = vadd.f32 %v7077_v12, %v2357_v10  ;;  %v2363_v26 = vand.u32 2147483647, %v6533_v3  ;;  %v4567_v10 = vld [vmem:[%s7838_s0 + $0x38] sm:$0xff] }
 0x451   :  { %v7177_v24 = vpack.c.b16 %v2716_v54, %v7167_v51  ;;  %v7182_v48 = vunpack.c.l.b16 %v7171_v56  ;;  %v2700_v46 = vunpack.c.l.b16 %v2628_v61  ;;  %4558 = vrcp.f32 %v7169_v40  ;;  %v4566_v61 = vld [vmem:[%s7838_s0 + $0x30] sm:$0xff] }
 0x452   :  { %v7174_v0 = vor.u32 %v2822_v8, %v2818_v1  ;;  %v2898_v1 = vpack.c.b16 %v6937_v45, %v6937_v45  ;;  %v3384_v54 = vpack.c.bf16 %v4567_v10, %v4566_v61  ;;  %v2366_v33 = vor.u32 1.1754944e-38, %v2365_v32 }
 0x453   :  { %v2841_v57 = vshll.u32 %v7177_v24, 16  ;;  %v7194_v8 = vpack.c.b16 %v2700_v46, %v7182_v48  ;;  %v2839_v3 = vshrl.u32 %v7177_v24, 16  ;;  %v2362_v46 = vsel %vm2361_vm2, %v7077_v12, %v2358_v25 }
 0x454   :  { %8048 = vst [vmem:[#allocation11_spill] sm:$0xff] %v7174_v0  ;;  %2869 = vrot.lane.b32.xlu1 %v7174_v0, %s4578_s3  ;;  %v2592_v0 = vld [vmem:[#allocation3 + $0x98] sm:$0x3]  ;;  %vm2364_vm4 = vcmp.eq.f32.partialorder %v2363_v26, 8.507059e+37  ;;  %v7210_v34 = vpack.c.bf16 %v2591_v28, %v2591_v28  ;;  %vm2479_vm7 = vweird.f32 %v7169_v40 }
 0x455   :  { %v2843_v45 = vrot.slane %v2841_v57, 1  ;;  %v2785_v52 = vshll.u32 %v7194_v8, 16  ;;  %v2632_v61 = vpack.c.bf16 %v2592_v0, %v2592_v0  ;;  %v2367_v10 = vsel %vm2364_vm4, %v2366_v33, %v2362_v46 }
 0x456   :  { %2915 = vrot.lane.b32.xlu2 %v2898_v1, %s4578_s3  ;;  %v2783_v9 = vshrl.u32 %v7194_v8, 16  ;;  %v2496_v57 = vmul.f32 %v2367_v10, %v6395_v23  ;;  %v3003_v25 = vunpack.c.l.b16 %v7210_v34  ;;  %v2899_v33 = vpack.c.b16 %v6884_v31, %v6884_v31  ;;  %v4393_v23 = vld [vmem:[%s7846_s9 + $0xf0] sm:$0xff] }
 0x457   :  { %v7208_v37 = vor.u32 %v2843_v45, %v2839_v3  ;;  %v2787_v35 = vrot.slane %v2785_v52, 1  ;;  %v4559_v12 = vpop.eup %4558  ;;  %v3004_v26 = vunpack.c.l.b16 %v2632_v61  ;;  %3926 = vmatpush.bf16.msrb.mxu2 %v4393_v23  ;;  %v2485_v1 = vand.u32 2147483648, %v7169_v40 }
 0x458   :  { %4188 = vmatmul.msk.bf16.gmra.mxu0 %vm8049_vm8, %v3384_v54  ;;  %2564 = vst.msk [vmem:[#allocation3 + $0x81] sm:$0xff] %vm1296_vm5, %v2496_v57  ;;  %v2475_v52 = vmul.f32 %v4559_v12, %v7169_v40  ;;  %vm2480_vm0 = vweird.f32 %v4559_v12  ;;  %v2483_v45 = vand.u32 2147483647, %v7169_v40  ;;  %v2897_v46 = vpack.c.b16 %v6890_v14, %v6890_v14  ;;  %v4568_v14 = vld [vmem:[%s7838_s0 + $0x40] sm:$0xff] }
 0x459   :  { %2875 = vrot.lane.b32.xlu0 %v7208_v37, %s4578_s3  ;;  %v7217_v32 = vor.u32 %v2787_v35, %v2783_v9  ;;  %v4365_v9 = vld [vmem:[%s7846_s9 + $0x10] sm:$0xff]  ;;  %v2878_v35 = vrot.slane %v6904_v63, 1  ;;  %v7234_v0 = vpack.c.b16 %v3004_v26, %v3003_v25  ;;  %v7246_v57 = vrot.slane %v6942_v38, 1  ;;  %v4569_v38 = vld [vmem:[%s7838_s0 + $0x48] sm:$0xff]  ;;  %vm2481_vm9 = vmor %vm2479_vm7, %vm2480_vm0 }
 0x45a   :  { %4408 = vmatpush.bf16.msrb.mxu3 %v4365_v9  ;;  %3783 = vmatpush.bf16.msrb.mxu0 %v4365_v9  ;;  %v2476_v31 = vsub.f32 1.0, %v2475_v52  ;;  %v3385_v9 = vpack.c.bf16 %v4569_v38, %v4568_v14  ;;  %v2611_v52 = vld [vmem:[#allocation3 + $0x130] sm:$0xff]  ;;  %v2486_v40 = vor.u32 1.1754944e-38, %v2485_v1  ;;  %vm2484_vm10 = vcmp.eq.f32.partialorder %v2483_v45, 8.507059e+37 }
 0x45b   :  { %v3031_v26 = vrot.slane %v7234_v0, 1  ;;  %v7278_v45 = vrot.slane %v6957_v59, 1  ;;  %v4364_v59 = vld [vmem:[%s7846_s9 + $0x8] sm:$0xff] }
 0x45c   :  { %2859 = vrot.lane.b32.xlu1 %v7217_v32, %s4578_s3  ;;  %v2477_v3 = vmul.f32 %v4559_v12, %v2476_v31  ;;  %v2612_v31 = vld [vmem:[#allocation3 + $0x138] sm:$0x3] }
 0x45d   :  { %v2652_v14 = vpack.c.bf16 %v2612_v31, %v2612_v31  ;;  %v7273_v1 = vunpack.c.l.b16 %v3031_v26  ;;  %v7287_v26 = vrot.slane %v6978_v5, 1  ;;  %v3010_v31 = vshrl.u32 %v7234_v0, 16 }
 0x45e   :  { %2917 = vrot.lane.b32.xlu2 %v2899_v33, %s4578_s3  ;;  %v2478_v25 = vadd.f32 %v4559_v12, %v2477_v3  ;;  %v2901_v5 = vpack.c.b16 %v6960_v58, %v6960_v58  ;;  %4409 = vmatpush.bf16.msrb.mxu3 %v4364_v59  ;;  %v3245_v63 = vunpack.c.l.b16 %v7278_v45 }
 0x45f   :  { %v2589_v54 = vld [vmem:[#allocation3 + $0x80] sm:$0xff]  ;;  %v2590_v28 = vld [vmem:[#allocation3 + $0x88] sm:$0x3]  ;;  %3784 = vmatpush.bf16.msrb.mxu0 %v4364_v59 }
 0x460   :  { %v7243_v61 = vpack.c.bf16 %v2589_v54, %v2589_v54  ;;  %v2630_v10 = vpack.c.bf16 %v2590_v28, %v2590_v28  ;;  %v2482_v54 = vsel %vm2481_vm9, %v4559_v12, %v2478_v25 }
 0x461   :  { %2967 = vrot.lane.b32.xlu0 %v2878_v35, %s4578_s3  ;;  %v2487_v3 = vsel %vm2484_vm10, %v2486_v40, %v2482_v54 }
 0x462   :  { %v7252_v33 = vunpack.c.l.b16 %v7243_v61  ;;  %v2947_v23 = vunpack.c.l.b16 %v2630_v10  ;;  %v7268_v10 = vpack.c.bf16 %v2611_v52, %v2611_v52  ;;  %v2504_v38 = vmul.f32 %v2487_v3, %v6405_v50 }
 0x463   :  { %v3006_v50 = vunpack.c.l.b16 %v2652_v14  ;;  %v7308_v52 = vrot.slane %v6898_v13, 1 }
 0x464   :  { %2913 = vrot.lane.b32.xlu1 %v2897_v46, %s4578_s3  ;;  %v7264_v28 = vpack.c.b16 %v2947_v23, %v7252_v33  ;;  %v2900_v46 = vpack.c.b16 %v6926_v17, %v6926_v17  ;;  %2572 = vst.msk [vmem:[#allocation3 + $0x121] sm:$0xff] %vm1296_vm5, %v2504_v38  ;;  %v3012_v17 = vshll.u32 %v7234_v0, 16  ;;  %v3005_v23 = vunpack.c.l.b16 %v7268_v10 }
 0x466   :  { %2973 = vrot.lane.b32.xlu2 %v7246_v57, %s4578_s3  ;;  %v2965_v12 = vrot.slane %v7264_v28, 1  ;;  %v3014_v40 = vrot.slane %v3012_v17, 1  ;;  %v7302_v54 = vpack.c.b16 %v3006_v50, %v3005_v23  ;;  %v4570_v23 = vld [vmem:[%s7838_s0 + $0x50] sm:$0xff]  ;;  %v4571_v50 = vld [vmem:[%s7838_s0 + $0x58] sm:$0xff] }
 0x467   :  { %v3386_v13 = vpack.c.bf16 %v4571_v50, %v4570_v23  ;;  %v2903_v23 = vpack.c.b16 %v7182_v48, %v7182_v48  ;;  %v2904_v48 = vpack.c.b16 %v7252_v33, %v7252_v33  ;;  %v4389_v33 = vld [vmem:[%s7846_s9 + $0xd0] sm:$0xff] }
 0x468   :  { %4189 = vmatmul.msk.bf16.gmra.mxu0 %vm8050_vm15, %v3385_v9  ;;  %v7281_v25 = vunpack.c.l.b16 %v2965_v12  ;;  %v4392_v9 = vld [vmem:[%s7846_s9 + $0xe8] sm:$0xff]  ;;  %v3015_v0 = vor.u32 %v3014_v40, %v3010_v31  ;;  %v3032_v58 = vrot.slane %v7302_v54, 1  ;;  %v7327_v31 = vrot.slane %v7113_v62, 1 }
 0x469   :  { %2919 = vrot.lane.b32.xlu0 %v2900_v46, %s4578_s3  ;;  %3927 = vmatpush.bf16.msrb.mxu2 %v4392_v9 }
 0x46b   :  { %v2609_v3 = vld [vmem:[#allocation3 + $0x120] sm:$0xff]  ;;  %v2610_v46 = vld [vmem:[#allocation3 + $0x128] sm:$0x3] }
 0x46c   :  { %2969 = vrot.lane.b32.xlu1 %v7278_v45, %s4578_s3  ;;  %v7305_v14 = vpack.c.bf16 %v2609_v3, %v2609_v3  ;;  %v2650_v38 = vpack.c.bf16 %v2610_v46, %v2610_v46  ;;  %v2902_v46 = vpack.c.b16 %v7102_v55, %v7102_v55 }
 0x46e   :  { %2975 = vrot.lane.b32.xlu2 %v7287_v26, %s4578_s3  ;;  %v7311_v17 = vunpack.c.l.b16 %v7305_v14  ;;  %v2948_v9 = vunpack.c.l.b16 %v2650_v38  ;;  %v2954_v38 = vshll.u32 %v7264_v28, 16 }
 0x470   :  { %v7323_v59 = vpack.c.b16 %v2948_v9, %v7311_v17  ;;  %v4391_v9 = vld [vmem:[%s7846_s9 + $0xe0] sm:$0xff]  ;;  %v2956_v55 = vrot.slane %v2954_v38, 1  ;;  %v2905_v38 = vpack.c.b16 %v6876_v29, %v6876_v29 }
 0x471   :  { %2921 = vrot.lane.b32.xlu0 %v2901_v5, %s4578_s3  ;;  %v7330_v5 = vunpack.c.l.b16 %v3032_v58  ;;  %v4363_v58 = vld [vmem:[%s7846_s9] sm:$0xff]  ;;  %3928 = vmatpush.bf16.msrb.mxu2 %v4391_v9  ;;  %v7394_v9 = vrot.slane %v7148_v27, 1  ;;  %v2908_v27 = vpack.c.b16 %v7142_v11, %v7142_v11 }
 0x472   :  { %v2966_v40 = vrot.slane %v7323_v59, 1  ;;  %4410 = vmatpush.bf16.msrb.mxu3 %v4363_v58  ;;  %3785 = vmatpush.bf16.msrb.mxu0 %v4363_v58  ;;  %v4388_v58 = vld [vmem:[%s7846_s9 + $0xc8] sm:$0xff]  ;;  %v4387_v29 = vld [vmem:[%s7846_s9 + $0xc0] sm:$0xff] }
 0x473   :  { %v4572_v11 = vld [vmem:[%s7838_s0 + $0x60] sm:$0xff] }
 0x474   :  { %2971 = vrot.lane.b32.xlu1 %v7308_v52, %s4578_s3  ;;  %v7337_v3 = vunpack.c.l.b16 %v2966_v40 }
 0x476   :  { %3025 = vrot.lane.b32.xlu2 %v3015_v0, %s4578_s3  ;;  %v7346_v0 = vrot.slane %v7194_v8, 1  ;;  %v2952_v8 = vshrl.u32 %v7264_v28, 16  ;;  %v2907_v28 = vpack.c.b16 %v7050_v6, %v7050_v6  ;;  %v2886_v6 = vrot.slane %v6887_v41, 1 }
 0x478   :  { %4190 = vmatmul.msk.bf16.gmra.mxu0 %vm8051_vm1, %v3386_v13  ;;  %v7360_v50 = vor.u32 %v2956_v55, %v2952_v8  ;;  %v2906_v13 = vpack.c.b16 %v6907_v43, %v6907_v43  ;;  %v4378_v43 = vld [vmem:[%s7846_s9 + $0x78] sm:$0xff]  ;;  %v4377_v55 = vld [vmem:[%s7846_s9 + $0x70] sm:$0xff] }
 0x479   :  { %2977 = vrot.lane.b32.xlu0 %v7327_v31, %s4578_s3  ;;  %3827 = vmatpush.bf16.msra.mxu0 %v4378_v43 }
 0x47c   :  { %2923 = vrot.lane.b32.xlu1 %v2902_v46, %s4578_s3  ;;  %v4390_v46 = vld [vmem:[%s7846_s9 + $0xd8] sm:$0xff] }
 0x47d   :  { %3929 = vmatpush.bf16.msrb.mxu2 %v4390_v46  ;;  %3828 = vmatpush.bf16.msra.mxu0 %v4377_v55  ;;  %v3017_v55 = vshrl.u32 %v7302_v54, 16 }
 0x47e   :  { %2979 = vrot.lane.b32.xlu2 %v7346_v0, %s4578_s3 }
 0x481   :  { %2925 = vrot.lane.b32.xlu0 %v2903_v23, %s4578_s3  ;;  %3930 = vmatpush.bf16.msrb.mxu2 %v4389_v33  ;;  %v2862_v23 = vpop.permute.xlu2 %2861  ;;  %v8052_v33 = vld [vmem:[#allocation6_spill] sm:$0xff] }
 0x484   :  { %3023 = vrot.lane.b32.xlu1 %v7360_v50, %s4578_s3 }
 0x485   :  { %3931 = vmatpush.bf16.msrb.mxu2 %v4388_v58 }
 0x486   :  { %2931 = vrot.lane.b32.xlu2 %v2906_v13, %s4578_s3  ;;  %v7411_v13 = vrot.slane %v6923_v42, 1  ;;  %v4573_v42 = vld [vmem:[%s7838_s0 + $0x68] sm:$0xff] }
 0x487   :  { %v3387_v43 = vpack.c.bf16 %v4573_v42, %v4572_v11 }
 0x489   :  { %2981 = vrot.lane.b32.xlu0 %v2965_v12, %s4578_s3  ;;  %v4398_v12 = vld [vmem:[%s7846_s9 + $0x118] sm:$0xff]  ;;  %3932 = vmatpush.bf16.msrb.mxu2 %v4387_v29  ;;  %v2852_v62 = vpop.permute.xlu2 %2851 }
 0x48a   :  { %3978 = vmatpush.bf16.msra.mxu3 %v4398_v12  ;;  %v4376_v12 = vld [vmem:[%s7846_s9 + $0x68] sm:$0xff]  ;;  %4191 = vmatmul.msk.bf16.vlgmr.msrb.gmra.mxu1 %vm8053_vm11, %v3387_v43 }
 0x48b   :  { %3829 = vmatpush.bf16.msra.mxu0 %v4376_v12 }
 0x48c   :  { %2927 = vrot.lane.b32.xlu1 %v2904_v48, %s4578_s3  ;;  %v3019_v48 = vshll.u32 %v7302_v54, 16 }
 0x48e   :  { %2933 = vrot.lane.b32.xlu2 %v2907_v28, %s4578_s3  ;;  %v7417_v28 = vrot.slane %v6981_v4, 1  ;;  %v4397_v4 = vld [vmem:[%s7846_s9 + $0x110] sm:$0xff]  ;;  %v3021_v29 = vrot.slane %v3019_v48, 1 }
 0x48f   :  { %3979 = vmatpush.bf16.msra.mxu3 %v4397_v4 }
 0x490   :  { %v3022_v43 = vor.u32 %v3021_v29, %v3017_v55  ;;  %v2961_v29 = vshll.u32 %v7323_v59, 16 }
 0x491   :  { %2983 = vrot.lane.b32.xlu0 %v2886_v6, %s4578_s3 }
 0x494   :  { %2929 = vrot.lane.b32.xlu1 %v2905_v38, %s4578_s3  ;;  %v3059_v38 = vsel %vm1296_vm5, %v8052_v33, %v2862_v23 }
 0x495   :  { %v3275_v23 = vunpack.c.l.b16 %v3059_v38 }
 0x496   :  { %2989 = vrot.lane.b32.xlu2 %v7394_v9, %s4578_s3 }
 0x499   :  { %v2846_v8 = vpop.permute.xlu0 %2845  ;;  %2935 = vrot.lane.b32.xlu0 %v2908_v27, %s4578_s3 }
 0x49a   :  { %v3035_v46 = vsel %vm1296_vm5, %v6547_v53, %v2846_v8  ;;  %v4386_v53 = vld [vmem:[%s7846_s9 + $0xb8] sm:$0xff]  ;;  %v2909_v8 = vpack.c.b16 %v6964_v15, %v6964_v15  ;;  %v3044_v15 = vsel %vm1296_vm5, %v6870_v36, %v2852_v62  ;;  %v4385_v36 = vld [vmem:[%s7846_s9 + $0xb0] sm:$0xff]  ;;  %v4375_v62 = vld [vmem:[%s7846_s9 + $0x60] sm:$0xff] }
 0x49b   :  { %v3241_v11 = vunpack.c.l.b16 %v3035_v46  ;;  %3876 = vmatpush.bf16.msra.mxu1 %v4386_v53  ;;  %v3249_v4 = vunpack.c.l.b16 %v3044_v15  ;;  %3830 = vmatpush.bf16.msra.mxu0 %v4375_v62 }
 0x49c   :  { %2985 = vrot.lane.b32.xlu1 %v7411_v13, %s4578_s3 }
 0x49e   :  { %v2848_v58 = vpop.permute.xlu1 %2847  ;;  %2991 = vrot.lane.b32.xlu2 %v7417_v28, %s4578_s3 }
 0x49f   :  { %v3038_v27 = vsel %vm1296_vm5, %v6878_v16, %v2848_v58  ;;  %v7450_v16 = vrot.slane %v7063_v60, 1  ;;  %v7460_v60 = vrot.slane %v7130_v22, 1  ;;  %3877 = vmatpush.bf16.msra.mxu1 %v4385_v36  ;;  %v2910_v22 = vpack.c.b16 %v7116_v7, %v7116_v7 }
 0x4a0   :  { %v3246_v42 = vunpack.c.l.b16 %v3038_v27  ;;  %v7476_v27 = vpop.f32.mrf.mxu0  ;;  %v2911_v7 = vpack.c.b16 %v7167_v51, %v7167_v51  ;;  %v4374_v51 = vld [vmem:[%s7846_s9 + $0x58] sm:$0xff] }
 0x4a1   :  { %v2864_v33 = vpop.permute.xlu0 %2863  ;;  %2937 = vrot.lane.b32.xlu0 %v2909_v8, %s4578_s3  ;;  %v2854_v8 = vpop.permute.xlu2 %2853  ;;  %3831 = vmatpush.bf16.msra.mxu0 %v4374_v51  ;;  %v3284_v41 = vunpack.c.l.b16 %v7450_v16 }
 0x4a2   :  { %v3062_v54 = vsel %vm1296_vm5, %v6854_v49, %v2864_v33  ;;  %v3478_v48 = vpack.c.b16 %v3246_v42, %v3241_v11  ;;  %v7480_v11 = vrot.slane %v7177_v24, 1  ;;  %v2963_v42 = vrot.slane %v2961_v29, 1  ;;  %v4574_v24 = vld [vmem:[%s7838_s0 + $0x70] sm:$0xff] }
 0x4a3   :  { %v3280_v58 = vunpack.c.l.b16 %v3062_v54  ;;  %v4383_v54 = vld [vmem:[%s7846_s9 + $0xa0] sm:$0xff] }
 0x4a4   :  { %3786 = vmatmul.bf16.vlgmr.msrb.gmra.mxu0 %v3478_v48  ;;  %2987 = vrot.lane.b32.xlu1 %v7450_v16, %s4578_s3  ;;  %v4575_v48 = vld [vmem:[%s7838_s0 + $0x78] sm:$0xff] }
 0x4a5   :  { %v3495_v46 = vpack.c.b16 %v3280_v58, %v3275_v23  ;;  %v2959_v23 = vshrl.u32 %v7323_v59, 16  ;;  %v4396_v58 = vld [vmem:[%s7846_s9 + $0x108] sm:$0xff] }
 0x4a6   :  { %v2850_v12 = vpop.permute.xlu1 %2849  ;;  %3029 = vrot.lane.b32.xlu2 %v3022_v43, %s4578_s3  ;;  %v3388_v43 = vpack.c.bf16 %v4575_v48, %v4574_v24  ;;  %3980 = vmatpush.bf16.msra.mxu3 %v4396_v58  ;;  %v4380_v59 = vld [vmem:[%s7846_s9 + $0x88] sm:$0xff] }
 0x4a7   :  { %3806 = vmatmul.bf16.vlgmr.msrb.gmra.mxu3 %v3495_v46  ;;  %v3041_v49 = vsel %vm1296_vm5, %v6928_v47, %v2850_v12  ;;  %v4384_v47 = vld [vmem:[%s7846_s9 + $0xa8] sm:$0xff]  ;;  %v7503_v15 = vor.u32 %v2963_v42, %v2959_v23  ;;  %v4382_v12 = vld [vmem:[%s7846_s9 + $0x98] sm:$0xff] }
 0x4a8   :  { %v3244_v53 = vunpack.c.l.b16 %v3041_v49  ;;  %3878 = vmatpush.bf16.msra.mxu1 %v4384_v47  ;;  %v3047_v49 = vsel %vm1296_vm5, %v6900_v2, %v2854_v8  ;;  %v4381_v8 = vld [vmem:[%s7846_s9 + $0x90] sm:$0xff]  ;;  %v4372_v23 = vld [vmem:[%s7846_s9 + $0x48] sm:$0xff] }
 0x4a9   :  { %v2866_v38 = vpop.permute.xlu0 %2865  ;;  %2993 = vrot.lane.b32.xlu0 %v7460_v60, %s4578_s3  ;;  %4192 = vmatmul.msk.bf16.gmra.mxu1 %vm8054_vm3, %v3388_v43  ;;  %v2872_v62 = vpop.permute.xlu2 %2871  ;;  %v3253_v47 = vunpack.c.l.b16 %v3047_v49 }
 0x4aa   :  { %v3481_v55 = vpack.c.b16 %v3249_v4, %v3244_v53  ;;  %v3065_v4 = vsel %vm1296_vm5, %v6892_v20, %v2866_v38  ;;  %v7517_v53 = vpop.f32.mrf.mxu0  ;;  %v2912_v38 = vpack.c.b16 %v7311_v17, %v7311_v17 }
 0x4ac   :  { %3933 = vmatmul.bf16.vlgmr.msrb.gmra.mxu2 %v3481_v55  ;;  %2939 = vrot.lane.b32.xlu1 %v2910_v22, %s4578_s3  ;;  %v3278_v22 = vunpack.c.l.b16 %v3065_v4 }
 0x4ad   :  { %3879 = vmatpush.bf16.msra.mxu1 %v4383_v54  ;;  %v4395_v54 = vld [vmem:[%s7846_s9 + $0x100] sm:$0xff] }
 0x4ae   :  { %2995 = vrot.lane.b32.xlu2 %v7480_v11, %s4578_s3  ;;  %3981 = vmatpush.bf16.msra.mxu3 %v4395_v54 }
 0x4b1   :  { %v2856_v33 = vpop.permute.xlu0 %2855  ;;  %2941 = vrot.lane.b32.xlu0 %v2911_v7, %s4578_s3  ;;  %3880 = vmatpush.bf16.msra.mxu1 %v4382_v12  ;;  %v4379_v7 = vld [vmem:[%s7846_s9 + $0x80] sm:$0xff] }
 0x4b2   :  { %v3050_v46 = vsel %vm1296_vm5, %v6944_v19, %v2856_v33  ;;  %v3074_v33 = vsel %vm1296_vm5, %v6951_v39, %v2872_v62 }
 0x4b3   :  { %v3257_v19 = vunpack.c.l.b16 %v3050_v46  ;;  %v3291_v43 = vunpack.c.l.b16 %v3074_v33  ;;  %v4371_v46 = vld [vmem:[%s7846_s9 + $0x40] sm:$0xff]  ;;  %v8057_v33 = vld [vmem:[#allocation14_spill] sm:$0xff] }
 0x4b4   :  { %3791 = vmatmul.bf16.gmra.mxu0 %v3481_v55  ;;  %3027 = vrot.lane.b32.xlu1 %v7503_v15, %s4578_s3 }
 0x4b5   :  { %v2868_v36 = vpop.permute.xlu1 %2867  ;;  %v3485_v20 = vpack.c.b16 %v3257_v19, %v3253_v47  ;;  %3881 = vmatpush.bf16.msra.mxu1 %v4381_v8  ;;  %v7539_v17 = vpop.f32.mrf.mxu0 }
 0x4b6   :  { %v3068_v55 = vsel %vm1296_vm5, %v7037_v30, %v2868_v36  ;;  %v4373_v30 = vld [vmem:[%s7846_s9 + $0x50] sm:$0xff] }
 0x4b7   :  { %v3283_v29 = vunpack.c.l.b16 %v3068_v55  ;;  %3832 = vmatpush.bf16.msra.mxu0 %v4373_v30 }
 0x4b9   :  { %2997 = vrot.lane.b32.xlu0 %v2966_v40, %s4578_s3  ;;  %v7524_v2 = vpack.c.b16 %v3283_v29, %v3278_v22  ;;  %v2874_v40 = vpop.permute.xlu2 %2873  ;;  %3882 = vmatpush.bf16.msra.mxu1 %v4380_v59  ;;  %v8055_v29 = vld [vmem:[#allocation9_spill] sm:$0xff] }
 0x4bb   :  { %3811 = vmatmul.bf16.gmra.mxu3 %v7524_v2  ;;  %3833 = vmatpush.bf16.msra.mxu0 %v4372_v23 }
 0x4bc   :  { %3938 = vmatmul.bf16.gmra.mxu2 %v3485_v20  ;;  %2943 = vrot.lane.b32.xlu1 %v2912_v38, %s4578_s3 }
 0x4bd   :  { %v2858_v42 = vpop.permute.xlu0 %2857  ;;  %3883 = vmatpush.bf16.msra.mxu1 %v4379_v7  ;;  %v7554_v58 = vpop.f32.mrf.mxu0 }
 0x4be   :  { %v3053_v4 = vsel %vm1296_vm5, %v7088_v18, %v2858_v42  ;;  %v8056_v42 = vld [vmem:[#allocation4_spill] sm:$0xff] }
 0x4bf   :  { %3834 = vmatpush.bf16.msra.mxu0 %v4371_v46  ;;  %v3261_v36 = vunpack.c.l.b16 %v3053_v4 }
 0x4c1   :  { %v2916_v12 = vpop.permute.xlu2 %2915 }
 0x4c4   :  { %3796 = vmatmul.bf16.gmra.mxu0 %v3485_v20  ;;  %v3077_v20 = vsel %vm1296_vm5, %v8055_v29, %v2874_v40  ;;  %v3086_v40 = vsel %vm1296_vm5, %v2878_v35, %v2916_v12  ;;  %v3250_v35 = vunpack.c.l.b16 %v7308_v52 }
 0x4c5   :  { %v7568_v22 = vpop.f32.mrf.mxu0  ;;  %v3295_v59 = vunpack.c.l.b16 %v3077_v20 }
 0x4c6   :  { %v2870_v24 = vpop.permute.xlu1 %2869  ;;  %v3482_v29 = vpack.c.b16 %v3250_v35, %v3245_v63 }
 0x4c7   :  { %v3071_v48 = vsel %vm1296_vm5, %v7134_v21, %v2870_v24 }
 0x4c8   :  { %v3287_v51 = vunpack.c.l.b16 %v3071_v48 }
 0x4c9   :  { %v2918_v38 = vpop.permute.xlu2 %2917 }
 0x4ca   :  { %v7559_v39 = vpack.c.b16 %v3291_v43, %v3287_v51  ;;  %v8058_v51 = vld [vmem:[#allocation8_spill] sm:$0xff] }
 0x4cb   :  { %v2876_v49 = vpop.permute.xlu0 %2875 }
 0x4cc   :  { %3816 = vmatmul.bf16.gmra.mxu3 %v7559_v39  ;;  %v3080_v55 = vsel %vm1296_vm5, %v7158_v44, %v2876_v49  ;;  %v3247_v49 = vunpack.c.l.b16 %v3086_v40 }
 0x4cd   :  { %v3299_v8 = vunpack.c.l.b16 %v3080_v55  ;;  %v7577_v44 = vpop.f32.mrf.mxu0 }
 0x4ce   :  { %v2860_v21 = vpop.permute.xlu1 %2859 }
 0x4cf   :  { %v3056_v19 = vsel %vm1296_vm5, %v7171_v56, %v2860_v21  ;;  %v2877_v56 = vrot.slane %v8056_v42, 1  ;;  %v7573_v7 = vpack.c.b16 %v3299_v8, %v3295_v59  ;;  %v3089_v59 = vsel %vm1296_vm5, %v7278_v45, %v2918_v38  ;;  %v8060_v42 = vld [vmem:[#allocation15_spill] sm:$0xff] }
 0x4d0   :  { %v3265_v62 = vunpack.c.l.b16 %v3056_v19  ;;  %v3254_v45 = vunpack.c.l.b16 %v7246_v57  ;;  %v3258_v38 = vunpack.c.l.b16 %v7287_v26 }
 0x4d1   :  { %v2974_v24 = vpop.permute.xlu2 %2973 }
 0x4d2   :  { %v3489_v47 = vpack.c.b16 %v3265_v62, %v3261_v36 }
 0x4d3   :  { %v2968_v18 = vpop.permute.xlu0 %2967 }
 0x4d4   :  { %3943 = vmatmul.bf16.gmra.mxu2 %v3489_v47  ;;  %3801 = vmatmul.bf16.gmra.mxu0 %v3489_v47  ;;  %v3131_v54 = vsel %vm1296_vm5, %v8057_v33, %v2968_v18  ;;  %v8059_v18 = vld [vmem:[#allocation17_spill] sm:$0xff] }
 0x4d5   :  { %v3243_v4 = vunpack.c.l.b16 %v3131_v54  ;;  %v7588_v55 = vpop.f32.mrf.mxu0  ;;  %v3251_v54 = vunpack.c.l.b16 %v3089_v59 }
 0x4d6   :  { %v2914_v30 = vpop.permute.xlu1 %2913 }
 0x4d7   :  { %v3083_v23 = vsel %vm1296_vm5, %v2877_v56, %v2914_v30  ;;  %v3140_v56 = vsel %vm1296_vm5, %v8060_v42, %v2974_v24 }
 0x4d8   :  { %v3242_v48 = vunpack.c.l.b16 %v3083_v23 }
 0x4d9   :  { %v2976_v47 = vpop.permute.xlu2 %2975 }
 0x4da   :  { %v3479_v36 = vpack.c.b16 %v3247_v49, %v3242_v48  ;;  %v3256_v48 = vunpack.c.l.b16 %v3140_v56 }
 0x4db   :  { %v2920_v21 = vpop.permute.xlu0 %2919 }
 0x4dc   :  { %3821 = vmatmul.bf16.gmra.mxu3 %v7573_v7  ;;  %v3092_v8 = vsel %vm1296_vm5, %v7308_v52, %v2920_v21 }
 0x4dd   :  { %v3255_v23 = vunpack.c.l.b16 %v3092_v8  ;;  %v8062_v8 = vld [vmem:[#allocation7_spill] sm:$0xff] }
 0x4de   :  { %v2970_v43 = vpop.permute.xlu1 %2969 }
 0x4df   :  { %v3134_v46 = vsel %vm1296_vm5, %v8058_v51, %v2970_v43  ;;  %v7599_v43 = vpop.f32.mrf.mxu0 }
 0x4e0   :  { %v3248_v19 = vunpack.c.l.b16 %v3134_v46  ;;  %v3483_v46 = vpack.c.b16 %v3255_v23, %v3251_v54 }
 0x4e1   :  { %v3026_v51 = vpop.permute.xlu2 %3025 }
 0x4e2   :  { %v3480_v62 = vpack.c.b16 %v3248_v19, %v3243_v4  ;;  %v3182_v49 = vsel %vm1296_vm5, %v7210_v34, %v3026_v51 }
 0x4e3   :  { %v2922_v20 = vpop.permute.xlu0 %2921  ;;  %v3273_v24 = vunpack.c.l.b16 %v3182_v49 }
 0x4e4   :  { %3884 = vmatmul.bf16.vlgmr.msra.gmra.mxu1 %v3480_v62  ;;  %3835 = vmatmul.bf16.vlgmr.msra.gmra.mxu0 %v3479_v36  ;;  %v3486_v62 = vpack.c.b16 %v3258_v38, %v3254_v45 }
 0x4e6   :  { %v2972_v12 = vpop.permute.xlu1 %2971 }
 0x4e7   :  { %v3137_v30 = vsel %vm1296_vm5, %v8059_v18, %v2972_v12  ;;  %v7607_v35 = vpop.f32.mrf.mxu0  ;;  %v8061_v12 = vld [vmem:[#allocation10_spill] sm:$0xff]  ;;  %v3143_v18 = vsel %vm1296_vm5, %v8062_v8, %v2976_v47  ;;  %v3266_v47 = vunpack.c.l.b16 %v7346_v0 }
 0x4e8   :  { %v3252_v40 = vunpack.c.l.b16 %v3137_v30  ;;  %v3260_v23 = vunpack.c.l.b16 %v3143_v18 }
 0x4ea   :  { %v3484_v52 = vpack.c.b16 %v3256_v48, %v3252_v40  ;;  %v2980_v40 = vpop.permute.xlu2 %2979 }
 0x4eb   :  { %v2978_v4 = vpop.permute.xlu0 %2977  ;;  %v3149_v45 = vsel %vm1296_vm5, %v7217_v32, %v2980_v40 }
 0x4ec   :  { %4337 = vmatmul.msk.bf16.vlgmr.msra.gmra.mxu3 %vm1296_vm5, %v3482_v29  ;;  %v3146_v34 = vsel %vm1296_vm5, %v8061_v12, %v2978_v4 }
 0x4ed   :  { %v3264_v30 = vunpack.c.l.b16 %v3146_v34 }
 0x4ee   :  { %v2924_v33 = vpop.permute.xlu1 %2923 }
 0x4ef   :  { %v3098_v29 = vsel %vm1296_vm5, %v7287_v26, %v2924_v33  ;;  %v3488_v48 = vpack.c.b16 %v3264_v30, %v3260_v23  ;;  %v7618_v26 = vpop.f32.mrf.mxu0  ;;  %v3262_v33 = vunpack.c.l.b16 %v7327_v31 }
 0x4f0   :  { %v3263_v59 = vunpack.c.l.b16 %v3098_v29 }
 0x4f3   :  { %v2926_v42 = vpop.permute.xlu0 %2925 }
 0x4f4   :  { %3889 = vmatmul.bf16.gmra.mxu1 %v3484_v52  ;;  %3840 = vmatmul.bf16.gmra.mxu0 %v3483_v46  ;;  %v3101_v38 = vsel %vm1296_vm5, %v7327_v31, %v2926_v42  ;;  %v8064_v31 = vld [vmem:[#allocation16_spill] sm:$0xff]  ;;  %v8066_v42 = vld [vmem:[#allocation13_spill] sm:$0xff] }
 0x4f6   :  { %v3024_v21 = vpop.permute.xlu1 %3023 }
 0x4f7   :  { %v3179_v19 = vsel %vm1296_vm5, %v7243_v61, %v3024_v21  ;;  %v3095_v61 = vsel %vm1296_vm5, %v7246_v57, %v2922_v20  ;;  %v3490_v57 = vpack.c.b16 %v3266_v47, %v3262_v33  ;;  %v2932_v20 = vpop.permute.xlu2 %2931 }
 0x4f8   :  { %v3269_v36 = vunpack.c.l.b16 %v3179_v19  ;;  %v3259_v54 = vunpack.c.l.b16 %v3095_v61  ;;  %v7632_v19 = vpop.f32.mrf.mxu0  ;;  %v8065_v61 = vpack.c.b16 %v7273_v1, %v7281_v25 }
 0x4fa   :  { %v3493_v63 = vpack.c.b16 %v3273_v24, %v3269_v36  ;;  %v3487_v51 = vpack.c.b16 %v3263_v59, %v3259_v54  ;;  %v3268_v36 = vunpack.c.l.b16 %v3149_v45  ;;  %v3110_v59 = vsel %vm1296_vm5, %v2886_v6, %v2932_v20 }
 0x4fb   :  { %v2982_v52 = vpop.permute.xlu0 %2981 }
 0x4fc   :  { %4338 = vmatmul.msk.bf16.gmra.mxu3 %vm1296_vm5, %v3486_v62  ;;  %3948 = vmatmul.bf16.gmra.mxu2 %v3493_v63  ;;  %v3152_v49 = vsel %vm1296_vm5, %v7360_v50, %v2982_v52  ;;  %v3267_v62 = vunpack.c.l.b16 %v3101_v38  ;;  %v8067_v38 = vld [vmem:[#allocation5_spill] sm:$0xff] }
 0x4fd   :  { %v3272_v24 = vunpack.c.l.b16 %v3152_v49 }
 0x4fe   :  { %v2928_v56 = vpop.permute.xlu1 %2927 }
 0x4ff   :  { %v3104_v4 = vsel %vm1296_vm5, %v7346_v0, %v2928_v56  ;;  %v3492_v63 = vpack.c.b16 %v3272_v24, %v3268_v36  ;;  %v2934_v0 = vpop.permute.xlu2 %2933  ;;  %v8068_v36 = vld [vmem:[#allocation11_spill] sm:$0xff] }
 0x500   :  { %v3271_v21 = vunpack.c.l.b16 %v3104_v4  ;;  %v7635_v8 = vpop.f32.mrf.mxu0 }
 0x502   :  { %v3491_v12 = vpack.c.b16 %v3271_v21, %v3267_v62  ;;  %v3113_v21 = vsel %vm1296_vm5, %v7411_v13, %v2934_v0 }
 0x503   :  { %v2984_v34 = vpop.permute.xlu0 %2983 }
 0x504   :  { %3894 = vmatmul.bf16.gmra.mxu1 %v3488_v48  ;;  %3845 = vmatmul.bf16.gmra.mxu0 %v3487_v51  ;;  %v3155_v56 = vsel %vm1296_vm5, %v8066_v42, %v2984_v34  ;;  %v3281_v51 = vunpack.c.l.b16 %v3110_v59 }
 0x505   :  { %v3277_v33 = vunpack.c.l.b16 %v3155_v56 }
 0x506   :  { %v2930_v46 = vpop.permute.xlu1 %2929 }
 0x507   :  { %v2990_v23 = vpop.permute.xlu2 %2989  ;;  %v3468_v56 = vpop.f32.mrf.mxu1 }
 0x508   :  { %v3164_v62 = vsel %vm1296_vm5, %v8068_v36, %v2990_v23 }
 0x50b   :  { %v2936_v48 = vpop.permute.xlu0 %2935 }
 0x50c   :  { %4339 = vmatmul.msk.bf16.gmra.mxu3 %vm1296_vm5, %v3490_v57  ;;  %3953 = vmatmul.bf16.gmra.mxu2 %v7524_v2  ;;  %v8063_v2 = vld [vmem:[#allocation19_spill] sm:$0xff]  ;;  %v3116_v45 = vsel %vm1296_vm5, %v7450_v16, %v2936_v48  ;;  %v8070_v48 = vld [vmem:[#allocation18_spill] sm:$0xff] }
 0x50d   :  { %v2885_v29 = vrot.slane %v8063_v2, 1 }
 0x50e   :  { %v2986_v50 = vpop.permute.xlu1 %2985 }
 0x50f   :  { %v3107_v32 = vsel %vm1296_vm5, %v2885_v29, %v2930_v46  ;;  %v3158_v18 = vsel %vm1296_vm5, %v8064_v31, %v2986_v50  ;;  %v2992_v52 = vpop.permute.xlu2 %2991  ;;  %v3289_v50 = vunpack.c.l.b16 %v3116_v45 }
 0x510   :  { %v3276_v40 = vunpack.c.l.b16 %v3107_v32  ;;  %v3282_v54 = vunpack.c.l.b16 %v3158_v18  ;;  %v3288_v18 = vunpack.c.l.b16 %v7394_v9 }
 0x512   :  { %v3497_v1 = vpack.c.b16 %v3282_v54, %v3277_v33  ;;  %v3496_v25 = vpack.c.b16 %v3281_v51, %v3276_v40  ;;  %v3167_v51 = vsel %vm1296_vm5, %v8070_v48, %v2992_v52  ;;  %v3296_v52 = vunpack.c.l.b16 %v7460_v60 }
 0x513   :  { %v2938_v57 = vpop.permute.xlu0 %2937 }
 0x514   :  { %3899 = vmatmul.bf16.gmra.mxu1 %v3492_v63  ;;  %3850 = vmatmul.bf16.gmra.mxu0 %v3491_v12  ;;  %v3290_v12 = vunpack.c.l.b16 %v3164_v62  ;;  %v3119_v33 = vsel %vm1296_vm5, %v7394_v9, %v2938_v57  ;;  %v3300_v9 = vunpack.c.l.b16 %v7480_v11 }
 0x515   :  { %v3293_v45 = vunpack.c.l.b16 %v3119_v33 }
 0x516   :  { %v2988_v30 = vpop.permute.xlu1 %2987 }
 0x517   :  { %v3161_v24 = vsel %vm1296_vm5, %v8067_v38, %v2988_v30  ;;  %v3030_v16 = vpop.permute.xlu2 %3029 }
 0x518   :  { %v3286_v63 = vunpack.c.l.b16 %v3161_v24  ;;  %v3188_v31 = vsel %vm1296_vm5, %v7268_v10, %v3030_v16  ;;  %v8069_v10 = vld [vmem:[#allocation12_spill] sm:$0xff]  ;;  %v3470_v24 = vpop.f32.mrf.mxu1 }
 0x519   :  { %v3307_v30 = vunpack.c.l.b16 %v3188_v31 }
 0x51a   :  { %v3501_v29 = vpack.c.b16 %v3290_v12, %v3286_v63 }
 0x51c   :  { %4340 = vmatmul.msk.bf16.gmra.mxu3 %vm1296_vm5, %v8065_v61  ;;  %3958 = vmatmul.bf16.gmra.mxu2 %v7559_v39  ;;  %v3279_v39 = vunpack.c.l.b16 %v7411_v13  ;;  %v3292_v61 = vunpack.c.l.b16 %v7417_v28 }
 0x51e   :  { %v2940_v6 = vpop.permute.xlu1 %2939  ;;  %v3499_v20 = vpack.c.b16 %v3284_v41, %v3279_v39  ;;  %v3503_v23 = vpack.c.b16 %v3292_v61, %v3288_v18 }
 0x51f   :  { %v2996_v63 = vpop.permute.xlu2 %2995 }
 0x521   :  { %v7650_v47 = vpop.f32.mrf.mxu0 }
 0x524   :  { %3904 = vmatmul.bf16.gmra.mxu1 %v3497_v1  ;;  %3855 = vmatmul.bf16.gmra.mxu0 %v3496_v25 }
 0x526   :  { %v3028_v34 = vpop.permute.xlu1 %3027  ;;  %v3473_v16 = vpop.f32.mrf.mxu1 }
 0x527   :  { %v3185_v13 = vsel %vm1296_vm5, %v7305_v14, %v3028_v34  ;;  %v3122_v14 = vsel %vm1296_vm5, %v7417_v28, %v2940_v6  ;;  %v3173_v34 = vsel %vm1296_vm5, %v7208_v37, %v2996_v63 }
 0x528   :  { %v3303_v59 = vunpack.c.l.b16 %v3185_v13  ;;  %v3297_v39 = vunpack.c.l.b16 %v3122_v14  ;;  %v3302_v18 = vunpack.c.l.b16 %v3173_v34  ;;  %v3788_v14 = vadd.f32 %v7650_v47, %v7476_v27  ;;  %v7734_v27 = vld [vmem:[%s7848_s11] ss:$0 sm:$0xff] }
 0x529   :  { %v7654_v46 = vpop.f32.mrf.mxu0 }
 0x52a   :  { %v3807_v49 = vpop.f32.mrf.mxu3  ;;  %v3510_v40 = vpack.c.b16 %v3307_v30, %v3303_v59  ;;  %v3504_v6 = vpack.c.b16 %v3297_v39, %v3293_v45 }
 0x52b   :  { %v7657_v4 = vadd.f32 %v3807_v49, %v7607_v35  ;;  %v3285_v35 = vunpack.c.l.b16 %v3113_v21  ;;  %v3294_v49 = vunpack.c.l.b16 %v3167_v51 }
 0x52c   :  { %4341 = vmatmul.msk.bf16.gmra.mxu3 %vm1296_vm5, %v3499_v20  ;;  %3963 = vmatmul.bf16.gmra.mxu2 %v7573_v7  ;;  %v2994_v7 = vpop.permute.xlu0 %2993 }
 0x52d   :  { %v3500_v32 = vpack.c.b16 %v3289_v50, %v3285_v35  ;;  %v3170_v54 = vsel %vm1296_vm5, %v8069_v10, %v2994_v7  ;;  %v3507_v50 = vpack.c.b16 %v3300_v9, %v3296_v52  ;;  %v8071_v10 = vpack.c.b16 %v7330_v5, %v7337_v3 }
 0x52e   :  { %v3298_v25 = vunpack.c.l.b16 %v3170_v54  ;;  %v3475_v37 = vpop.f32.mrf.mxu1 }
 0x52f   :  { %v3934_v31 = vpop.f32.mrf.mxu2 }
 0x530   :  { %v3505_v28 = vpack.c.b16 %v3298_v25, %v3294_v49  ;;  %v3790_v49 = vadd.f32 %v7654_v46, %v7517_v53 }
 0x531   :  { %v7669_v2 = vpop.f32.mrf.mxu0 }
 0x532   :  { %v7675_v0 = vpop.f32.mrf.mxu3  ;;  %v3793_v9 = vadd.f32 %v7669_v2, %v7539_v17 }
 0x534   :  { %3909 = vmatmul.bf16.gmra.mxu1 %v3501_v29  ;;  %3860 = vmatmul.bf16.gmra.mxu0 %v3500_v32  ;;  %v2942_v1 = vpop.permute.xlu0 %2941 }
 0x539   :  { %v7679_v42 = vpop.f32.mrf.mxu0 }
 0x53a   :  { %v3795_v34 = vadd.f32 %v7679_v42, %v7554_v58 }
 0x53c   :  { %4342 = vmatmul.msk.bf16.gmra.mxu3 %vm1296_vm5, %v3503_v23  ;;  %3968 = vmatmul.bf16.gmra.mxu2 %v3510_v40  ;;  %v2998_v21 = vpop.permute.xlu0 %2997 }
 0x53d   :  { %v3176_v35 = vsel %vm1296_vm5, %v7503_v15, %v2998_v21 }
 0x53e   :  { %v3812_v41 = vpop.f32.mrf.mxu3  ;;  %v3306_v29 = vunpack.c.l.b16 %v3176_v35 }
 0x53f   :  { %v7691_v20 = vadd.f32 %v3812_v41, %v7632_v19  ;;  %v2944_v19 = vpop.permute.xlu1 %2943 }
 0x540   :  { %v3128_v12 = vsel %vm1296_vm5, %v7480_v11, %v2944_v19  ;;  %v3509_v11 = vpack.c.b16 %v3306_v29, %v3302_v18 }
 0x541   :  { %v7693_v38 = vpop.f32.mrf.mxu0  ;;  %v3305_v32 = vunpack.c.l.b16 %v3128_v12 }
 0x544   :  { %3914 = vmatmul.bf16.gmra.mxu1 %v3505_v28  ;;  %3865 = vmatmul.bf16.gmra.mxu0 %v3504_v6 }
 0x546   :  { %v3814_v57 = vpop.f32.mrf.mxu3 }
 0x547   :  { %v7698_v36 = vadd.f32 %v3814_v57, %v7635_v8  ;;  %v3125_v8 = vsel %vm1296_vm5, %v7460_v60, %v2942_v1  ;;  %v3936_v60 = vpop.f32.mrf.mxu2 }
 0x548   :  { %v3301_v15 = vunpack.c.l.b16 %v3125_v8 }
 0x549   :  { %v7700_v62 = vpop.f32.mrf.mxu0 }
 0x54a   :  { %v3508_v30 = vpack.c.b16 %v3305_v32, %v3301_v15  ;;  %v3798_v15 = vadd.f32 %v7693_v38, %v7568_v22 }
 0x54c   :  { %4343 = vmatmul.msk.bf16.gmra.mxu3 %vm1296_vm5, %v3507_v50 }
 0x54f   :  { %v3817_v7 = vpop.f32.mrf.mxu3  ;;  %v3939_v33 = vpop.f32.mrf.mxu2 }
 0x550   :  { %v7711_v13 = vadd.f32 %v3817_v7, %v3468_v56 }
 0x551   :  { %v7713_v61 = vpop.f32.mrf.mxu0 }
 0x554   :  { %3919 = vmatmul.bf16.gmra.mxu1 %v3509_v11  ;;  %3870 = vmatmul.bf16.gmra.mxu0 %v3508_v30 }
 0x557   :  { %v3819_v59 = vpop.f32.mrf.mxu3  ;;  %v3941_v6 = vpop.f32.mrf.mxu2 }
 0x558   :  { %v7715_v23 = vadd.f32 %v3819_v59, %v3470_v24 }
 0x559   :  { %v7717_v40 = vpop.f32.mrf.mxu0 }
 0x55c   :  { %4344 = vmatmul.msk.bf16.gmra.mxu3 %vm1296_vm5, %v8071_v10 }
 0x55f   :  { %v3822_v56 = vpop.f32.mrf.mxu3  ;;  %v3944_v50 = vpop.f32.mrf.mxu2 }
 0x560   :  { %v7723_v54 = vadd.f32 %v3822_v56, %v3473_v16 }
 0x561   :  { %v3885_v48 = vpop.f32.mrf.mxu1  ;;  %v3836_v51 = vpop.f32.mrf.mxu0 }
 0x562   :  { %v3837_v1 = vadd.f32 %v3836_v51, %v3788_v14  ;;  %v3800_v14 = vadd.f32 %v7700_v62, %v7577_v44 }
 0x564   :  { %v3886_v41 = vadd.f32 %v3885_v48, %v3837_v1 }
 0x566   :  { %v3935_v45 = vadd.f32 %v3934_v31, %v3886_v41 }
 0x567   :  { %v3824_v25 = vpop.f32.mrf.mxu3  ;;  %v3946_v18 = vpop.f32.mrf.mxu2 }
 0x568   :  { %v7727_v39 = vadd.f32 %v3824_v25, %v3475_v37 }
 0x569   :  { %v3887_v5 = vpop.f32.mrf.mxu1  ;;  %v3838_v3 = vpop.f32.mrf.mxu0 }
 0x56a   :  { %v3839_v28 = vadd.f32 %v3838_v3, %v3790_v49  ;;  %v3803_v49 = vadd.f32 %v7713_v61, %v7588_v55 }
 0x56c   :  { %v3888_v52 = vadd.f32 %v3887_v5, %v3839_v28 }
 0x56e   :  { %v3937_v46 = vadd.f32 %v3936_v60, %v3888_v52  ;;  %v3805_v52 = vadd.f32 %v7717_v40, %v7599_v43 }
 0x56f   :  { %v3983_v47 = vpop.f32.mrf.mxu3 }
 0x570   :  { %v3984_v24 = vadd.f32 %v3983_v47, %v3935_v45 }
 0x571   :  { %v3890_v57 = vpop.f32.mrf.mxu1  ;;  %v3841_v53 = vpop.f32.mrf.mxu0 }
 0x572   :  { %v4027_v21 = vadd.f32 %v7734_v27, %v3984_v24  ;;  %v3842_v19 = vadd.f32 %v3841_v53, %v3793_v9 }
 0x574   :  { %4043 = vst.msk [vmem:[%s7849_s12] sm:$0xff] %vm1296_vm5, %v4027_v21  ;;  %v3891_v12 = vadd.f32 %v3890_v57, %v3842_v19 }
 0x576   :  { %v3940_v16 = vadd.f32 %v3939_v33, %v3891_v12 }
 0x577   :  { %v3985_v63 = vpop.f32.mrf.mxu3 }
 0x578   :  { %v3986_v35 = vadd.f32 %v3985_v63, %v3937_v46 }
 0x579   :  { %v3892_v8 = vpop.f32.mrf.mxu1  ;;  %v3843_v2 = vpop.f32.mrf.mxu0 }
 0x57a   :  { %v4028_v17 = vadd.f32 %v7734_v27, %v3986_v35  ;;  %v3844_v29 = vadd.f32 %v3843_v2, %v3795_v34 }
 0x57c   :  { %4044 = vst.msk [vmem:[%s7849_s12 + $0x8] sm:$0xff] %vm1296_vm5, %v4028_v17  ;;  %v3893_v7 = vadd.f32 %v3892_v8, %v3844_v29 }
 0x57e   :  { %v3942_v30 = vadd.f32 %v3941_v6, %v3893_v7 }
 0x57f   :  { %v3988_v32 = vpop.f32.mrf.mxu3  ;;  %v3949_v56 = vpop.f32.mrf.mxu2 }
 0x580   :  { %v3989_v31 = vadd.f32 %v3988_v32, %v3940_v16  ;;  %v3810_v16 = vadd.f32 %v7675_v0, %v7618_v26 }
 0x581   :  { %v3895_v11 = vpop.f32.mrf.mxu1  ;;  %v3846_v42 = vpop.f32.mrf.mxu0 }
 0x582   :  { %v4029_v58 = vadd.f32 %v7734_v27, %v3989_v31  ;;  %v3847_v59 = vadd.f32 %v3846_v42, %v3798_v15 }
 0x584   :  { %4045 = vst.msk [vmem:[%s7849_s12 + $0x10] sm:$0xff] %vm1296_vm5, %v4029_v58  ;;  %v3896_v10 = vadd.f32 %v3895_v11, %v3847_v59 }
 0x586   :  { %v3945_v51 = vadd.f32 %v3944_v50, %v3896_v10 }
 0x587   :  { %v3990_v37 = vpop.f32.mrf.mxu3  ;;  %v3951_v3 = vpop.f32.mrf.mxu2 }
 0x588   :  { %v3991_v60 = vadd.f32 %v3990_v37, %v3942_v30 }
 0x589   :  { %v3897_v48 = vpop.f32.mrf.mxu1  ;;  %v3848_v38 = vpop.f32.mrf.mxu0 }
 0x58a   :  { %v4030_v22 = vadd.f32 %v7734_v27, %v3991_v60  ;;  %v3849_v33 = vadd.f32 %v3848_v38, %v3800_v14 }
 0x58c   :  { %4046 = vst.msk [vmem:[%s7849_s12 + $0x18] sm:$0xff] %vm1296_vm5, %v4030_v22  ;;  %v3898_v41 = vadd.f32 %v3897_v48, %v3849_v33 }
 0x58e   :  { %v3947_v45 = vadd.f32 %v3946_v18, %v3898_v41 }
 0x58f   :  { %v3993_v1 = vpop.f32.mrf.mxu3  ;;  %v3954_v53 = vpop.f32.mrf.mxu2 }
 0x590   :  { %v3994_v25 = vadd.f32 %v3993_v1, %v3945_v51 }
 0x591   :  { %v3900_v5 = vpop.f32.mrf.mxu1  ;;  %v3851_v62 = vpop.f32.mrf.mxu0 }
 0x592   :  { %v4031_v44 = vadd.f32 %v7734_v27, %v3994_v25  ;;  %v3852_v28 = vadd.f32 %v3851_v62, %v3803_v49 }
 0x594   :  { %4047 = vst.msk [vmem:[%s7849_s12 + $0x20] sm:$0xff] %vm1296_vm5, %v4031_v44  ;;  %v3901_v24 = vadd.f32 %v3900_v5, %v3852_v28 }
 0x596   :  { %v3950_v57 = vadd.f32 %v3949_v56, %v3901_v24 }
 0x597   :  { %v3995_v6 = vpop.f32.mrf.mxu3  ;;  %v3956_v34 = vpop.f32.mrf.mxu2 }
 0x598   :  { %v3996_v47 = vadd.f32 %v3995_v6, %v3947_v45 }
 0x599   :  { %v3902_v9 = vpop.f32.mrf.mxu1  ;;  %v3853_v61 = vpop.f32.mrf.mxu0 }
 0x59a   :  { %v4032_v55 = vadd.f32 %v7734_v27, %v3996_v47  ;;  %v3854_v21 = vadd.f32 %v3853_v61, %v3805_v52 }
 0x59c   :  { %4048 = vst.msk [vmem:[%s7849_s12 + $0x28] sm:$0xff] %vm1296_vm5, %v4032_v55  ;;  %v3903_v50 = vadd.f32 %v3902_v9, %v3854_v21 }
 0x59e   :  { %v3952_v43 = vadd.f32 %v3951_v3, %v3903_v50 }
 0x59f   :  { %v3998_v46 = vpop.f32.mrf.mxu3  ;;  %v3959_v58 = vpop.f32.mrf.mxu2 }
 0x5a0   :  { %v3999_v19 = vadd.f32 %v3998_v46, %v3950_v57 }
 0x5a1   :  { %v3905_v63 = vpop.f32.mrf.mxu1  ;;  %v3856_v12 = vpop.f32.mrf.mxu0 }
 0x5a2   :  { %v4033_v35 = vadd.f32 %v7734_v27, %v3999_v19  ;;  %v3857_v40 = vadd.f32 %v3856_v12, %v7657_v4 }
 0x5a4   :  { %4049 = vst.msk [vmem:[%s7849_s12 + $0x30] sm:$0xff] %vm1296_vm5, %v4033_v35  ;;  %v3906_v2 = vadd.f32 %v3905_v63, %v3857_v40 }
 0x5a6   :  { %v3955_v7 = vadd.f32 %v3954_v53, %v3906_v2 }
 0x5a7   :  { %v4000_v8 = vpop.f32.mrf.mxu3  ;;  %v3961_v22 = vpop.f32.mrf.mxu2 }
 0x5a8   :  { %v4001_v17 = vadd.f32 %v4000_v8, %v3952_v43 }
 0x5a9   :  { %v3907_v29 = vpop.f32.mrf.mxu1  ;;  %v3858_v31 = vpop.f32.mrf.mxu0 }
 0x5aa   :  { %v4034_v32 = vadd.f32 %v7734_v27, %v4001_v17  ;;  %v3859_v18 = vadd.f32 %v3858_v31, %v3810_v16 }
 0x5ac   :  { %4050 = vst.msk [vmem:[%s7849_s12 + $0x38] sm:$0xff] %vm1296_vm5, %v4034_v32  ;;  %v3908_v11 = vadd.f32 %v3907_v29, %v3859_v18 }
 0x5ae   :  { %v3957_v26 = vadd.f32 %v3956_v34, %v3908_v11 }
 0x5af   :  { %v4003_v15 = vpop.f32.mrf.mxu3  ;;  %v3964_v62 = vpop.f32.mrf.mxu2 }
 0x5b0   :  { %v4004_v4 = vadd.f32 %v4003_v15, %v3955_v7 }
 0x5b1   :  { %v3910_v42 = vpop.f32.mrf.mxu1  ;;  %v3861_v59 = vpop.f32.mrf.mxu0 }
 0x5b2   :  { %v4035_v30 = vadd.f32 %v7734_v27, %v4004_v4  ;;  %v3862_v0 = vadd.f32 %v3861_v59, %v7691_v20 }
 0x5b4   :  { %4051 = vst.msk [vmem:[%s7849_s12 + $0x40] sm:$0xff] %vm1296_vm5, %v4035_v30  ;;  %v3911_v10 = vadd.f32 %v3910_v42, %v3862_v0 }
 0x5b6   :  { %v3960_v38 = vadd.f32 %v3959_v58, %v3911_v10 }
 0x5b7   :  { %v4005_v37 = vpop.f32.mrf.mxu3  ;;  %v3966_v9 = vpop.f32.mrf.mxu2 }
 0x5b8   :  { %v4006_v60 = vadd.f32 %v4005_v37, %v3957_v26 }
 0x5b9   :  { %v3912_v56 = vpop.f32.mrf.mxu1  ;;  %v3863_v48 = vpop.f32.mrf.mxu0 }
 0x5ba   :  { %v4036_v14 = vadd.f32 %v7734_v27, %v4006_v60  ;;  %v3864_v51 = vadd.f32 %v3863_v48, %v7698_v36 }
 0x5bc   :  { %4052 = vst.msk [vmem:[%s7849_s12 + $0x48] sm:$0xff] %vm1296_vm5, %v4036_v14  ;;  %v3913_v25 = vadd.f32 %v3912_v56, %v3864_v51 }
 0x5be   :  { %v3962_v5 = vadd.f32 %v3961_v22, %v3913_v25 }
 0x5bf   :  { %v4008_v33 = vpop.f32.mrf.mxu3 }
 0x5c0   :  { %v4009_v1 = vadd.f32 %v4008_v33, %v3960_v38 }
 0x5c1   :  { %v3915_v20 = vpop.f32.mrf.mxu1  ;;  %v3866_v49 = vpop.f32.mrf.mxu0 }
 0x5c2   :  { %v4037_v41 = vadd.f32 %v7734_v27, %v4009_v1  ;;  %v3867_v44 = vadd.f32 %v3866_v49, %v7711_v13 }
 0x5c4   :  { %4053 = vst.msk [vmem:[%s7849_s12 + $0x50] sm:$0xff] %vm1296_vm5, %v4037_v41  ;;  %v3916_v28 = vadd.f32 %v3915_v20, %v3867_v44 }
 0x5c6   :  { %v3965_v24 = vadd.f32 %v3964_v62, %v3916_v28 }
 0x5c7   :  { %v4010_v3 = vpop.f32.mrf.mxu3 }
 0x5c8   :  { %v4011_v45 = vadd.f32 %v4010_v3, %v3962_v5 }
 0x5c9   :  { %v3868_v6 = vpop.f32.mrf.mxu0  ;;  %v3917_v47 = vpop.f32.mrf.mxu1 }
 0x5ca   :  { %v4038_v36 = vadd.f32 %v7734_v27, %v4011_v45  ;;  %v3869_v52 = vadd.f32 %v3868_v6, %v7715_v23  ;;  %v3969_v23 = vpop.f32.mrf.mxu2 }
 0x5cc   :  { %4054 = vst.msk [vmem:[%s7849_s12 + $0x58] sm:$0xff] %vm1296_vm5, %v4038_v36  ;;  %v3918_v13 = vadd.f32 %v3917_v47, %v3869_v52 }
 0x5ce   :  { %v3967_v53 = vadd.f32 %v3966_v9, %v3918_v13 }
 0x5cf   :  { %v4013_v55 = vpop.f32.mrf.mxu3 }
 0x5d0   :  { %v4014_v61 = vadd.f32 %v4013_v55, %v3965_v24 }
 0x5d1   :  { %v3871_v21 = vpop.f32.mrf.mxu0  ;;  %v3920_v19 = vpop.f32.mrf.mxu1 }
 0x5d2   :  { %v4039_v57 = vadd.f32 %v7734_v27, %v4014_v61  ;;  %v3872_v46 = vadd.f32 %v3871_v21, %v7723_v54  ;;  %v3971_v29 = vpop.f32.mrf.mxu2 }
 0x5d4   :  { %4055 = vst.msk [vmem:[%s7849_s12 + $0x60] sm:$0xff] %vm1296_vm5, %v4039_v57  ;;  %v3921_v35 = vadd.f32 %v3920_v19, %v3872_v46 }
 0x5d6   :  { %v3970_v40 = vadd.f32 %v3969_v23, %v3921_v35 }
 0x5d7   :  { %v4015_v50 = vpop.f32.mrf.mxu3 }
 0x5d8   :  { %v4016_v63 = vadd.f32 %v4015_v50, %v3967_v53 }
 0x5d9   :  { %v3873_v43 = vpop.f32.mrf.mxu0  ;;  %v3922_v8 = vpop.f32.mrf.mxu1 }
 0x5da   :  { %v4040_v12 = vadd.f32 %v7734_v27, %v4016_v63  ;;  %v3874_v34 = vadd.f32 %v3873_v43, %v7727_v39 }
 0x5dc   :  { %4056 = vst.msk [vmem:[%s7849_s12 + $0x68] sm:$0xff] %vm1296_vm5, %v4040_v12  ;;  %v3923_v54 = vadd.f32 %v3922_v8, %v3874_v34 }
 0x5de   :  { %v3972_v32 = vadd.f32 %v3971_v29, %v3923_v54 }
 0x5df   :  { %v4018_v17 = vpop.f32.mrf.mxu3 }
 0x5e0   :  { %v4019_v2 = vadd.f32 %v4018_v17, %v3970_v40 }
 0x5e2   :  { %v4041_v16 = vadd.f32 %v7734_v27, %v4019_v2 }
 0x5e4   :  { %4057 = vst.msk [vmem:[%s7849_s12 + $0x70] sm:$0xff] %vm1296_vm5, %v4041_v16 }
 0x5e7   :  { %v4020_v31 = vpop.f32.mrf.mxu3 }
 0x5e8   :  { %v4021_v7 = vadd.f32 %v4020_v31, %v3972_v32 }
 0x5ea   :  { %v4042_v18 = vadd.f32 %v7734_v27, %v4021_v7 }
 0x5ec   :  { %4058 = vst.msk [vmem:[%s7849_s12 + $0x78] sm:$0xff] %vm1296_vm5, %v4042_v18 }

</bundles_post_ra>
